<compile_context>
chip_gen: v7x
topology: tpu7x:2x2x1
jax: 0.10.0
libtpu: 0.0.40
codegen_flags: <defaults>
</compile_context>

<pallas_src>
import functools

import jax
import jax.numpy as jnp
import numpy as np
from jax import lax
from jax.experimental import pallas as pl
from jax.experimental.pallas import tpu as pltpu


_SQRT_HALF = 0.7071067811865476


def _erf_approx(z):
    """Abramowitz & Stegun 7.1.26 rational erf approximation, |err| < 1.5e-7.

    Uses only exp / div / FMA so it lowers cleanly in Mosaic (exp runs on the
    otherwise-idle EUP slot)."""
    az = jnp.abs(z)
    t = 1.0 / (1.0 + 0.3275911 * az)
    poly = t * (0.254829592 + t * (-0.284496736 + t * (1.421413741
                + t * (-1.453152027 + t * 1.061405429))))
    e = 1.0 - poly * jnp.exp(-az * az)
    return jnp.where(z < 0.0, -e, e)


def _gelu_exact(x):
    """Exact (erf-based) GELU, matching torch.nn.GELU() to ~1e-7 abs."""
    return 0.5 * x * (1.0 + _erf_approx(x * _SQRT_HALF))


def mspmlp_kernel(x_ref, w1_ref, b1_ref, dww_ref, dwb_ref, w2_ref, b2_ref,
                  o_ref, hpad_ref, *, H, W, Cin, Chid, Cout):
    """One batch element per grid step. x_ref block is (1, H, W, Cin), NHWC."""
    x = x_ref[0]                                              # (H, W, Cin)

    # ---- msp_fc1: 1x1 conv == (H*W, Cin) @ (Cin, Chid) on the MXU ----
    h = jnp.dot(x.reshape(H * W, Cin), w1_ref[...],
                preferred_element_type=jnp.float32) + b1_ref[...]   # (H*W, Chid)

    # ---- msp_dwconv: 3x3 depthwise, padding=1, groups=Chid, bias ----
    # Scratch (H+2, W+2, Chid): zero only the 1-pixel halo (interior is fully
    # overwritten each step; halo zeroing is re-done every step so it stays
    # correct under megacore "parallel" sharding of the batch axis).
    hpad_ref[0:1, :, :] = jnp.zeros((1, W + 2, Chid), jnp.float32)
    hpad_ref[H + 1:H + 2, :, :] = jnp.zeros((1, W + 2, Chid), jnp.float32)
    hpad_ref[:, 0:1, :] = jnp.zeros((H + 2, 1, Chid), jnp.float32)
    hpad_ref[:, W + 1:W + 2, :] = jnp.zeros((H + 2, 1, Chid), jnp.float32)
    hpad_ref[1:H + 1, 1:W + 1, :] = h.reshape(H, W, Chid)

    # 9 shifted taps; H-shift = leading-dim offset (free), W-shift = sublane slice.
    # Per-channel weights broadcast along lanes (cross-correlation, as in PyTorch).
    acc = hpad_ref[0:H, 0:W, :] * dww_ref[0:1, :].reshape(1, 1, Chid)
    for dh in range(3):
        for dw in range(3):
            k = 3 * dh + dw
            if k == 0:
                continue
            wt = dww_ref[k:k + 1, :].reshape(1, 1, Chid)
            acc = acc + hpad_ref[dh:dh + H, dw:dw + W, :] * wt
    acc = acc + dwb_ref[...].reshape(1, 1, Chid)              # (H, W, Chid)

    # ---- msp_act: exact GELU ----
    a = _gelu_exact(acc)
    # msp_drop has p=0.0 -> identity (inference); nothing to do.

    # ---- msp_fc2: 1x1 conv == (H*W, Chid) @ (Chid, Cout) on the MXU ----
    y = jnp.dot(a.reshape(H * W, Chid), w2_ref[...],
                preferred_element_type=jnp.float32) + b2_ref[...]   # (H*W, Cout)

    o_ref[0] = y.reshape(H, W, Cout)                          # lane-dense store


def mspmlp_forward(x, w1, b1, dw_w, dw_b, w2, b2):
    """x: (N, H, W, Cin) float32, NHWC. Returns (N, H, W, Cout)."""
    N, H, W, Cin = x.shape
    Chid = w1.shape[1]
    Cout = w2.shape[1]

    kernel = functools.partial(mspmlp_kernel, H=H, W=W,
                               Cin=Cin, Chid=Chid, Cout=Cout)
    return pl.pallas_call(
        kernel,
        out_shape=jax.ShapeDtypeStruct((N, H, W, Cout), jnp.float32),
        grid_spec=pltpu.PrefetchScalarGridSpec(
            num_scalar_prefetch=0,
            grid=(N,),
            in_specs=[
                pl.BlockSpec((1, H, W, Cin), lambda n: (n, 0, 0, 0)),   # x
                pl.BlockSpec((Cin, Chid), lambda n: (0, 0)),            # fc1 weight
                pl.BlockSpec((1, Chid), lambda n: (0, 0)),              # fc1 bias
                pl.BlockSpec((9, Chid), lambda n: (0, 0)),              # dw weight (3*3, C)
                pl.BlockSpec((1, Chid), lambda n: (0, 0)),              # dw bias
                pl.BlockSpec((Chid, Cout), lambda n: (0, 0)),           # fc2 weight
                pl.BlockSpec((1, Cout), lambda n: (0, 0)),              # fc2 bias
            ],
            out_specs=pl.BlockSpec((1, H, W, Cout), lambda n: (n, 0, 0, 0)),
            scratch_shapes=[
                pltpu.VMEM((H + 2, W + 2, Chid), jnp.float32),  # zero-padded hidden act
            ],
        ),
        compiler_params=pltpu.CompilerParams(
            dimension_semantics=("parallel",)),   # batch elems independent -> 2 TCs on v7x
    )(x, w1, b1.reshape(1, Chid), dw_w.reshape(9, Chid),
      dw_b.reshape(1, Chid), w2, b2.reshape(1, Cout))


def mspmlp_reference(x, w1, b1, dw_w, dw_b, w2, b2):
    """Pure-JAX reference matching PyTorch MSPMlp semantics (NHWC, drop=0)."""
    C = dw_w.shape[-1]
    hp = lax.Precision.HIGHEST
    h = jnp.einsum("nhwc,cd->nhwd", x, w1, precision=hp) + b1
    h = lax.conv_general_dilated(
        h, dw_w.reshape(3, 3, 1, C), (1, 1), [(1, 1), (1, 1)],
        dimension_numbers=("NHWC", "HWIO", "NHWC"),
        feature_group_count=C, precision=hp) + dw_b
    h = jax.nn.gelu(h, approximate=False)       # torch.nn.GELU default (exact)
    y = jnp.einsum("nhwc,cd->nhwd", h, w2, precision=hp) + b2
    return y


if __name__ == "__main__":
    # MSPMlp(in_features=128) defaults: hidden_features = out_features = 128.
    # 128 channels keeps the whole pipeline lane-dense (the main perf lever);
    # total data is still tiny (256 KiB of activations per batch element).
    N, H, W = 2, 16, 16
    Cin = Chid = Cout = 128

    key = jax.random.PRNGKey(0)
    k1, k2, k3, k4, k5, k6, k7 = jax.random.split(key, 7)
    # Synthetic parameters in the layouts the kernel expects:
    #  fc weights as (Cin, Cout) = torch Conv2d(.,.,1).weight[:, :, 0, 0].T
    #  depthwise weight as (3, 3, C) = torch Conv2d(C,C,3,groups=C).weight[:,0].transpose
    w1 = 0.1 * jax.random.normal(k1, (Cin, Chid), jnp.float32)
    b1 = 0.05 * jax.random.normal(k2, (Chid,), jnp.float32)
    dw_w = 0.1 * jax.random.normal(k3, (3, 3, Chid), jnp.float32)
    dw_b = 0.05 * jax.random.normal(k4, (Chid,), jnp.float32)
    w2 = 0.1 * jax.random.normal(k5, (Chid, Cout), jnp.float32)
    b2 = 0.05 * jax.random.normal(k6, (Cout,), jnp.float32)
    x = jax.random.normal(k7, (N, H, W, Cin), jnp.float32)

    out = jax.block_until_ready(mspmlp_forward(x, w1, b1, dw_w, dw_b, w2, b2))
    ref = jax.block_until_ready(mspmlp_reference(x, w1, b1, dw_w, dw_b, w2, b2))

    np.testing.assert_allclose(np.asarray(out), np.asarray(ref),
                               rtol=1e-4, atol=1e-4)
    print("KERNEL_OK")
</pallas_src>

<mosaic_0001>
module attributes {stable_mosaic.version = 11 : i64} {
  func.func @mspmlp_kernel(%arg0: i32, %arg1: memref<1x16x16x128xf32, #tpu.memory_space<vmem>>, %arg2: memref<128x128xf32, #tpu.memory_space<vmem>>, %arg3: memref<1x128xf32, #tpu.memory_space<vmem>>, %arg4: memref<9x128xf32, #tpu.memory_space<vmem>>, %arg5: memref<1x128xf32, #tpu.memory_space<vmem>>, %arg6: memref<128x128xf32, #tpu.memory_space<vmem>>, %arg7: memref<1x128xf32, #tpu.memory_space<vmem>>, %arg8: memref<1x16x16x128xf32, #tpu.memory_space<vmem>>, %arg9: memref<18x18x128xf32, #tpu.memory_space<vmem>>) attributes {dimension_semantics = [#tpu.dimension_semantics<parallel>], iteration_bounds = array<i64: 2>, scalar_prefetch = 0 : i64, scratch_operands = 1 : i64, tpu.core_type = #tpu.core_type<tc>, window_params = [{transform_indices = @transform_0, window_bounds = array<i64: 1, 16, 16, 128>}, {pipeline_mode = #tpu.pipeline_mode<synchronous>, transform_indices = @transform_1, window_bounds = array<i64: 128, 128>}, {pipeline_mode = #tpu.pipeline_mode<synchronous>, transform_indices = @transform_2, window_bounds = array<i64: 1, 128>}, {pipeline_mode = #tpu.pipeline_mode<synchronous>, transform_indices = @transform_3, window_bounds = array<i64: 9, 128>}, {pipeline_mode = #tpu.pipeline_mode<synchronous>, transform_indices = @transform_4, window_bounds = array<i64: 1, 128>}, {pipeline_mode = #tpu.pipeline_mode<synchronous>, transform_indices = @transform_5, window_bounds = array<i64: 128, 128>}, {pipeline_mode = #tpu.pipeline_mode<synchronous>, transform_indices = @transform_6, window_bounds = array<i64: 1, 128>}, {transform_indices = @transform_7, window_bounds = array<i64: 1, 16, 16, 128>}]} {
    %c0 = arith.constant 0 : index
    %c0_0 = arith.constant 0 : index
    %c0_1 = arith.constant 0 : index
    %c0_2 = arith.constant 0 : index
    %0 = vector.load %arg1[%c0, %c0_0, %c0_1, %c0_2] : memref<1x16x16x128xf32, #tpu.memory_space<vmem>>, vector<1x16x16x128xf32>
    %1 = vector.shape_cast %0 : vector<1x16x16x128xf32> to vector<16x16x128xf32>
    %2 = vector.shape_cast %1 : vector<16x16x128xf32> to vector<256x128xf32>
    %c0_3 = arith.constant 0 : index
    %c0_4 = arith.constant 0 : index
    %3 = vector.load %arg2[%c0_3, %c0_4] : memref<128x128xf32, #tpu.memory_space<vmem>>, vector<128x128xf32>
    %cst = arith.constant dense<0.000000e+00> : vector<256x128xf32>
    %4 = tpu.matmul %2, %3, %cst {dimension_numbers = #tpu.dot_dimension_numbers<[1], [0], [0], [1], [0, 0, 1, 1], [], []>} : vector<256x128xf32>, vector<128x128xf32>, vector<256x128xf32> -> vector<256x128xf32>
    %c0_5 = arith.constant 0 : index
    %c0_6 = arith.constant 0 : index
    %5 = vector.load %arg3[%c0_5, %c0_6] : memref<1x128xf32, #tpu.memory_space<vmem>>, vector<1x128xf32>
    %6 = vector.broadcast %5 : vector<1x128xf32> to vector<256x128xf32>
    %7 = arith.addf %4, %6 : vector<256x128xf32>
    %cst_7 = arith.constant 0.000000e+00 : f32
    %8 = vector.broadcast %cst_7 : f32 to vector<1x18x128xf32>
    %c0_8 = arith.constant 0 : index
    %c0_9 = arith.constant 0 : index
    %c0_10 = arith.constant 0 : index
    %9 = vector.load %arg9[%c0_8, %c0_9, %c0_10] : memref<18x18x128xf32, #tpu.memory_space<vmem>>, vector<1x18x128xf32>
    tpu.vector_store %arg9[%c0_8, %c0_9, %c0_10], %8 {strides = array<i32>} : memref<18x18x128xf32, #tpu.memory_space<vmem>>, vector<1x18x128xf32>,
    %cst_11 = arith.constant 0.000000e+00 : f32
    %10 = vector.broadcast %cst_11 : f32 to vector<1x18x128xf32>
    %c17 = arith.constant 17 : index
    %c0_12 = arith.constant 0 : index
    %c0_13 = arith.constant 0 : index
    %11 = vector.load %arg9[%c17, %c0_12, %c0_13] : memref<18x18x128xf32, #tpu.memory_space<vmem>>, vector<1x18x128xf32>
    tpu.vector_store %arg9[%c17, %c0_12, %c0_13], %10 {strides = array<i32>} : memref<18x18x128xf32, #tpu.memory_space<vmem>>, vector<1x18x128xf32>,
    %cst_14 = arith.constant 0.000000e+00 : f32
    %12 = vector.broadcast %cst_14 : f32 to vector<18x1x128xf32>
    %c0_15 = arith.constant 0 : index
    %c0_16 = arith.constant 0 : index
    %c0_17 = arith.constant 0 : index
    %13 = vector.load %arg9[%c0_15, %c0_16, %c0_17] : memref<18x18x128xf32, #tpu.memory_space<vmem>>, vector<18x1x128xf32>
    tpu.vector_store %arg9[%c0_15, %c0_16, %c0_17], %12 {strides = array<i32>} : memref<18x18x128xf32, #tpu.memory_space<vmem>>, vector<18x1x128xf32>,
    %cst_18 = arith.constant 0.000000e+00 : f32
    %14 = vector.broadcast %cst_18 : f32 to vector<18x1x128xf32>
    %c0_19 = arith.constant 0 : index
    %c17_20 = arith.constant 17 : index
    %c0_21 = arith.constant 0 : index
    %15 = vector.load %arg9[%c0_19, %c17_20, %c0_21] : memref<18x18x128xf32, #tpu.memory_space<vmem>>, vector<18x1x128xf32>
    tpu.vector_store %arg9[%c0_19, %c17_20, %c0_21], %14 {strides = array<i32>} : memref<18x18x128xf32, #tpu.memory_space<vmem>>, vector<18x1x128xf32>,
    %16 = vector.shape_cast %7 : vector<256x128xf32> to vector<16x16x128xf32>
    %c1 = arith.constant 1 : index
    %c1_22 = arith.constant 1 : index
    %c0_23 = arith.constant 0 : index
    %17 = vector.load %arg9[%c1, %c1_22, %c0_23] : memref<18x18x128xf32, #tpu.memory_space<vmem>>, vector<16x16x128xf32>
    tpu.vector_store %arg9[%c1, %c1_22, %c0_23], %16 {strides = array<i32>} : memref<18x18x128xf32, #tpu.memory_space<vmem>>, vector<16x16x128xf32>,
    %c0_24 = arith.constant 0 : index
    %c0_25 = arith.constant 0 : index
    %c0_26 = arith.constant 0 : index
    %18 = vector.load %arg9[%c0_24, %c0_25, %c0_26] : memref<18x18x128xf32, #tpu.memory_space<vmem>>, vector<16x16x128xf32>
    %c0_27 = arith.constant 0 : index
    %c0_28 = arith.constant 0 : index
    %19 = vector.load %arg4[%c0_27, %c0_28] : memref<9x128xf32, #tpu.memory_space<vmem>>, vector<1x128xf32>
    %20 = vector.shape_cast %19 : vector<1x128xf32> to vector<1x1x128xf32>
    %21 = vector.broadcast %20 : vector<1x1x128xf32> to vector<16x16x128xf32>
    %22 = arith.mulf %18, %21 : vector<16x16x128xf32>
    %c1_29 = arith.constant 1 : index
    %c0_30 = arith.constant 0 : index
    %23 = vector.load %arg4[%c1_29, %c0_30] : memref<9x128xf32, #tpu.memory_space<vmem>>, vector<1x128xf32>
    %24 = vector.shape_cast %23 : vector<1x128xf32> to vector<1x1x128xf32>
    %c0_31 = arith.constant 0 : index
    %c1_32 = arith.constant 1 : index
    %c0_33 = arith.constant 0 : index
    %25 = vector.load %arg9[%c0_31, %c1_32, %c0_33] : memref<18x18x128xf32, #tpu.memory_space<vmem>>, vector<16x16x128xf32>
    %26 = vector.broadcast %24 : vector<1x1x128xf32> to vector<16x16x128xf32>
    %27 = arith.mulf %25, %26 : vector<16x16x128xf32>
    %28 = arith.addf %22, %27 : vector<16x16x128xf32>
    %c2 = arith.constant 2 : index
    %c0_34 = arith.constant 0 : index
    %29 = vector.load %arg4[%c2, %c0_34] : memref<9x128xf32, #tpu.memory_space<vmem>>, vector<1x128xf32>
    %30 = vector.shape_cast %29 : vector<1x128xf32> to vector<1x1x128xf32>
    %c0_35 = arith.constant 0 : index
    %c2_36 = arith.constant 2 : index
    %c0_37 = arith.constant 0 : index
    %31 = vector.load %arg9[%c0_35, %c2_36, %c0_37] : memref<18x18x128xf32, #tpu.memory_space<vmem>>, vector<16x16x128xf32>
    %32 = vector.broadcast %30 : vector<1x1x128xf32> to vector<16x16x128xf32>
    %33 = arith.mulf %31, %32 : vector<16x16x128xf32>
    %34 = arith.addf %28, %33 : vector<16x16x128xf32>
    %c3 = arith.constant 3 : index
    %c0_38 = arith.constant 0 : index
    %35 = vector.load %arg4[%c3, %c0_38] : memref<9x128xf32, #tpu.memory_space<vmem>>, vector<1x128xf32>
    %36 = vector.shape_cast %35 : vector<1x128xf32> to vector<1x1x128xf32>
    %c1_39 = arith.constant 1 : index
    %c0_40 = arith.constant 0 : index
    %c0_41 = arith.constant 0 : index
    %37 = vector.load %arg9[%c1_39, %c0_40, %c0_41] : memref<18x18x128xf32, #tpu.memory_space<vmem>>, vector<16x16x128xf32>
    %38 = vector.broadcast %36 : vector<1x1x128xf32> to vector<16x16x128xf32>
    %39 = arith.mulf %37, %38 : vector<16x16x128xf32>
    %40 = arith.addf %34, %39 : vector<16x16x128xf32>
    %c4 = arith.constant 4 : index
    %c0_42 = arith.constant 0 : index
    %41 = vector.load %arg4[%c4, %c0_42] : memref<9x128xf32, #tpu.memory_space<vmem>>, vector<1x128xf32>
    %42 = vector.shape_cast %41 : vector<1x128xf32> to vector<1x1x128xf32>
    %c1_43 = arith.constant 1 : index
    %c1_44 = arith.constant 1 : index
    %c0_45 = arith.constant 0 : index
    %43 = vector.load %arg9[%c1_43, %c1_44, %c0_45] : memref<18x18x128xf32, #tpu.memory_space<vmem>>, vector<16x16x128xf32>
    %44 = vector.broadcast %42 : vector<1x1x128xf32> to vector<16x16x128xf32>
    %45 = arith.mulf %43, %44 : vector<16x16x128xf32>
    %46 = arith.addf %40, %45 : vector<16x16x128xf32>
    %c5 = arith.constant 5 : index
    %c0_46 = arith.constant 0 : index
    %47 = vector.load %arg4[%c5, %c0_46] : memref<9x128xf32, #tpu.memory_space<vmem>>, vector<1x128xf32>
    %48 = vector.shape_cast %47 : vector<1x128xf32> to vector<1x1x128xf32>
    %c1_47 = arith.constant 1 : index
    %c2_48 = arith.constant 2 : index
    %c0_49 = arith.constant 0 : index
    %49 = vector.load %arg9[%c1_47, %c2_48, %c0_49] : memref<18x18x128xf32, #tpu.memory_space<vmem>>, vector<16x16x128xf32>
    %50 = vector.broadcast %48 : vector<1x1x128xf32> to vector<16x16x128xf32>
    %51 = arith.mulf %49, %50 : vector<16x16x128xf32>
    %52 = arith.addf %46, %51 : vector<16x16x128xf32>
    %c6 = arith.constant 6 : index
    %c0_50 = arith.constant 0 : index
    %53 = vector.load %arg4[%c6, %c0_50] : memref<9x128xf32, #tpu.memory_space<vmem>>, vector<1x128xf32>
    %54 = vector.shape_cast %53 : vector<1x128xf32> to vector<1x1x128xf32>
    %c2_51 = arith.constant 2 : index
    %c0_52 = arith.constant 0 : index
    %c0_53 = arith.constant 0 : index
    %55 = vector.load %arg9[%c2_51, %c0_52, %c0_53] : memref<18x18x128xf32, #tpu.memory_space<vmem>>, vector<16x16x128xf32>
    %56 = vector.broadcast %54 : vector<1x1x128xf32> to vector<16x16x128xf32>
    %57 = arith.mulf %55, %56 : vector<16x16x128xf32>
    %58 = arith.addf %52, %57 : vector<16x16x128xf32>
    %c7 = arith.constant 7 : index
    %c0_54 = arith.constant 0 : index
    %59 = vector.load %arg4[%c7, %c0_54] : memref<9x128xf32, #tpu.memory_space<vmem>>, vector<1x128xf32>
    %60 = vector.shape_cast %59 : vector<1x128xf32> to vector<1x1x128xf32>
    %c2_55 = arith.constant 2 : index
    %c1_56 = arith.constant 1 : index
    %c0_57 = arith.constant 0 : index
    %61 = vector.load %arg9[%c2_55, %c1_56, %c0_57] : memref<18x18x128xf32, #tpu.memory_space<vmem>>, vector<16x16x128xf32>
    %62 = vector.broadcast %60 : vector<1x1x128xf32> to vector<16x16x128xf32>
    %63 = arith.mulf %61, %62 : vector<16x16x128xf32>
    %64 = arith.addf %58, %63 : vector<16x16x128xf32>
    %c8 = arith.constant 8 : index
    %c0_58 = arith.constant 0 : index
    %65 = vector.load %arg4[%c8, %c0_58] : memref<9x128xf32, #tpu.memory_space<vmem>>, vector<1x128xf32>
    %66 = vector.shape_cast %65 : vector<1x128xf32> to vector<1x1x128xf32>
    %c2_59 = arith.constant 2 : index
    %c2_60 = arith.constant 2 : index
    %c0_61 = arith.constant 0 : index
    %67 = vector.load %arg9[%c2_59, %c2_60, %c0_61] : memref<18x18x128xf32, #tpu.memory_space<vmem>>, vector<16x16x128xf32>
    %68 = vector.broadcast %66 : vector<1x1x128xf32> to vector<16x16x128xf32>
    %69 = arith.mulf %67, %68 : vector<16x16x128xf32>
    %70 = arith.addf %64, %69 : vector<16x16x128xf32>
    %c0_62 = arith.constant 0 : index
    %c0_63 = arith.constant 0 : index
    %71 = vector.load %arg5[%c0_62, %c0_63] : memref<1x128xf32, #tpu.memory_space<vmem>>, vector<1x128xf32>
    %72 = vector.shape_cast %71 : vector<1x128xf32> to vector<1x1x128xf32>
    %73 = vector.broadcast %72 : vector<1x1x128xf32> to vector<16x16x128xf32>
    %74 = arith.addf %70, %73 : vector<16x16x128xf32>
    %cst_64 = arith.constant 5.000000e-01 : f32
    %75 = vector.broadcast %cst_64 : f32 to vector<16x16x128xf32>
    %76 = arith.mulf %75, %74 : vector<16x16x128xf32>
    %cst_65 = arith.constant 0.707106769 : f32
    %77 = vector.broadcast %cst_65 : f32 to vector<16x16x128xf32>
    %78 = arith.mulf %74, %77 : vector<16x16x128xf32>
    %79 = math.absf %78 : vector<16x16x128xf32>
    %cst_66 = arith.constant 0.327591091 : f32
    %80 = vector.broadcast %cst_66 : f32 to vector<16x16x128xf32>
    %81 = arith.mulf %80, %79 : vector<16x16x128xf32>
    %cst_67 = arith.constant 1.000000e+00 : f32
    %82 = vector.broadcast %cst_67 : f32 to vector<16x16x128xf32>
    %83 = arith.addf %82, %81 : vector<16x16x128xf32>
    %cst_68 = arith.constant 1.000000e+00 : f32
    %84 = vector.broadcast %cst_68 : f32 to vector<16x16x128xf32>
    %85 = arith.divf %84, %83 : vector<16x16x128xf32>
    %cst_69 = arith.constant 1.06140542 : f32
    %86 = vector.broadcast %cst_69 : f32 to vector<16x16x128xf32>
    %87 = arith.mulf %85, %86 : vector<16x16x128xf32>
    %cst_70 = arith.constant -1.45315206 : f32
    %88 = vector.broadcast %cst_70 : f32 to vector<16x16x128xf32>
    %89 = arith.addf %88, %87 : vector<16x16x128xf32>
    %90 = arith.mulf %85, %89 : vector<16x16x128xf32>
    %cst_71 = arith.constant 1.42141378 : f32
    %91 = vector.broadcast %cst_71 : f32 to vector<16x16x128xf32>
    %92 = arith.addf %91, %90 : vector<16x16x128xf32>
    %93 = arith.mulf %85, %92 : vector<16x16x128xf32>
    %cst_72 = arith.constant -0.284496725 : f32
    %94 = vector.broadcast %cst_72 : f32 to vector<16x16x128xf32>
    %95 = arith.addf %94, %93 : vector<16x16x128xf32>
    %96 = arith.mulf %85, %95 : vector<16x16x128xf32>
    %cst_73 = arith.constant 0.254829586 : f32
    %97 = vector.broadcast %cst_73 : f32 to vector<16x16x128xf32>
    %98 = arith.addf %97, %96 : vector<16x16x128xf32>
    %99 = arith.mulf %85, %98 : vector<16x16x128xf32>
    %cst_74 = arith.constant 0.000000e+00 : f32
    %100 = vector.broadcast %cst_74 : f32 to vector<16x16x128xf32>
    %101 = arith.subf %100, %79 : vector<16x16x128xf32>
    %102 = arith.mulf %101, %79 : vector<16x16x128xf32>
    %103 = math.exp %102 : vector<16x16x128xf32>
    %104 = arith.mulf %99, %103 : vector<16x16x128xf32>
    %cst_75 = arith.constant 1.000000e+00 : f32
    %105 = vector.broadcast %cst_75 : f32 to vector<16x16x128xf32>
    %106 = arith.subf %105, %104 : vector<16x16x128xf32>
    %cst_76 = arith.constant 0.000000e+00 : f32
    %107 = vector.broadcast %cst_76 : f32 to vector<16x16x128xf32>
    %108 = arith.cmpf olt, %78, %107 : vector<16x16x128xf32>
    %cst_77 = arith.constant 0.000000e+00 : f32
    %109 = vector.broadcast %cst_77 : f32 to vector<16x16x128xf32>
    %110 = arith.subf %109, %106 : vector<16x16x128xf32>
    %111 = arith.select %108, %110, %106 : vector<16x16x128xi1>, vector<16x16x128xf32>
    %cst_78 = arith.constant 1.000000e+00 : f32
    %112 = vector.broadcast %cst_78 : f32 to vector<16x16x128xf32>
    %113 = arith.addf %112, %111 : vector<16x16x128xf32>
    %114 = arith.mulf %76, %113 : vector<16x16x128xf32>
    %115 = vector.shape_cast %114 : vector<16x16x128xf32> to vector<256x128xf32>
    %c0_79 = arith.constant 0 : index
    %c0_80 = arith.constant 0 : index
    %116 = vector.load %arg6[%c0_79, %c0_80] : memref<128x128xf32, #tpu.memory_space<vmem>>, vector<128x128xf32>
    %cst_81 = arith.constant dense<0.000000e+00> : vector<256x128xf32>
    %117 = tpu.matmul %115, %116, %cst_81 {dimension_numbers = #tpu.dot_dimension_numbers<[1], [0], [0], [1], [0, 0, 1, 1], [], []>} : vector<256x128xf32>, vector<128x128xf32>, vector<256x128xf32> -> vector<256x128xf32>
    %c0_82 = arith.constant 0 : index
    %c0_83 = arith.constant 0 : index
    %118 = vector.load %arg7[%c0_82, %c0_83] : memref<1x128xf32, #tpu.memory_space<vmem>>, vector<1x128xf32>
    %119 = vector.broadcast %118 : vector<1x128xf32> to vector<256x128xf32>
    %120 = arith.addf %117, %119 : vector<256x128xf32>
    %121 = vector.shape_cast %120 : vector<256x128xf32> to vector<16x16x128xf32>
    %c0_84 = arith.constant 0 : index
    %c0_85 = arith.constant 0 : index
    %c0_86 = arith.constant 0 : index
    %c0_87 = arith.constant 0 : index
    %122 = vector.load %arg8[%c0_84, %c0_85, %c0_86, %c0_87] : memref<1x16x16x128xf32, #tpu.memory_space<vmem>>, vector<1x16x16x128xf32>
    %123 = vector.shape_cast %122 : vector<1x16x16x128xf32> to vector<16x16x128xf32>
    %124 = vector.shape_cast %121 : vector<16x16x128xf32> to vector<1x16x16x128xf32>
    tpu.vector_store %arg8[%c0_84, %c0_85, %c0_86, %c0_87], %124 {strides = array<i32>} : memref<1x16x16x128xf32, #tpu.memory_space<vmem>>, vector<1x16x16x128xf32>,
    return
  }
  func.func @transform_0(%arg0: i32) -> (i32, i32, i32, i32) {
    %c0_i32 = arith.constant 0 : i32
    %c0_i32_0 = arith.constant 0 : i32
    %c0_i32_1 = arith.constant 0 : i32
    %c0_i32_2 = arith.constant 0 : i32
    return %arg0, %c0_i32, %c0_i32_0, %c0_i32_1 : i32, i32, i32, i32
  }
  func.func @transform_1(%arg0: i32) -> (i32, i32) {
    %c0_i32 = arith.constant 0 : i32
    %c0_i32_0 = arith.constant 0 : i32
    %c0_i32_1 = arith.constant 0 : i32
    return %c0_i32, %c0_i32_0 : i32, i32
  }
  func.func @transform_2(%arg0: i32) -> (i32, i32) {
    %c0_i32 = arith.constant 0 : i32
    %c0_i32_0 = arith.constant 0 : i32
    %c0_i32_1 = arith.constant 0 : i32
    return %c0_i32, %c0_i32_0 : i32, i32
  }
  func.func @transform_3(%arg0: i32) -> (i32, i32) {
    %c0_i32 = arith.constant 0 : i32
    %c0_i32_0 = arith.constant 0 : i32
    %c0_i32_1 = arith.constant 0 : i32
    return %c0_i32, %c0_i32_0 : i32, i32
  }
  func.func @transform_4(%arg0: i32) -> (i32, i32) {
    %c0_i32 = arith.constant 0 : i32
    %c0_i32_0 = arith.constant 0 : i32
    %c0_i32_1 = arith.constant 0 : i32
    return %c0_i32, %c0_i32_0 : i32, i32
  }
  func.func @transform_5(%arg0: i32) -> (i32, i32) {
    %c0_i32 = arith.constant 0 : i32
    %c0_i32_0 = arith.constant 0 : i32
    %c0_i32_1 = arith.constant 0 : i32
    return %c0_i32, %c0_i32_0 : i32, i32
  }
  func.func @transform_6(%arg0: i32) -> (i32, i32) {
    %c0_i32 = arith.constant 0 : i32
    %c0_i32_0 = arith.constant 0 : i32
    %c0_i32_1 = arith.constant 0 : i32
    return %c0_i32, %c0_i32_0 : i32, i32
  }
  func.func @transform_7(%arg0: i32) -> (i32, i32, i32, i32) {
    %c0_i32 = arith.constant 0 : i32
    %c0_i32_0 = arith.constant 0 : i32
    %c0_i32_1 = arith.constant 0 : i32
    %c0_i32_2 = arith.constant 0 : i32
    return %arg0, %c0_i32, %c0_i32_0, %c0_i32_1 : i32, i32, i32, i32
  }
}

</mosaic_0001>

<bundles_post_ra>
// kernel: tpu_custom_call.1
= control target key start
LH: loop header
LB: loop body
LE: loop exit
PB: predicated region body
PF: predicated region fallthrough
CT: control target
= control target key end

     0   :  { %12 = vsyncpa [#allocation4], 0  ;;  %s5490_s0 = inlined_call_operand.hbm [shape: f32[2,16,16,128], index: 0, kind: input, shape index: {}]   ;;  %s5491_s1 = inlined_call_operand.hbm [shape: f32[128,128], index: 1, kind: input, shape index: {}]   ;;  %s5492_s2 = inlined_call_operand.vmem [shape: f32[1,128], index: 2, kind: input, shape index: {}]   ;;  %s5493_s3 = inlined_call_operand.hbm [shape: f32[9,128], index: 3, kind: input, shape index: {}]   ;;  %s5494_s4 = inlined_call_operand.vmem [shape: f32[1,128], index: 4, kind: input, shape index: {}]   ;;  %s5495_s5 = inlined_call_operand.hbm [shape: f32[128,128], index: 5, kind: input, shape index: {}]   ;;  %s5496_s6 = inlined_call_operand.vmem [shape: f32[1,128], index: 6, kind: input, shape index: {}]   ;;  %s5497_s7 = inlined_call_operand.hbm [shape: f32[2,16,16,128], index: 7, kind: output, shape index: {}]  }
   0x1   :  { %14 = vsyncpa [#allocation4 + $0x1], 0 }
   0x2   :  { %15 = vsyncpa [#allocation7], 0 }
   0x3   :  { %16 = vsyncpa [#allocation10], 0 }
   0x4   :  { %17 = vsyncpa [#allocation5], 0 }
   0x5   :  { %19 = vsyncpa [#allocation5 + $0x1], 0  ;;  %s3699_s24 = smov 0   ;;  %s3701_s25 = smov 0  }
   0x6   :  { %s3703_s26 = smov 0   ;;  %s3705_s27 = smov 0  }
   0x7 LB: > { %s3720_s28 = sadd.s32 4294967295, %s3647_s27   ;;  %s2874_s29 = sadd.s32 4294967294, %s3647_s27   ;;  %s3647_s27 = sphi %s3705_s27, %s5523_s27   ;;  %s3643_s26 = sphi %s3703_s26, %s5522_s26   ;;  %s3639_s25 = sphi %s3701_s25, %s5521_s25   ;;  %s3635_s24 = sphi %s3699_s24, %s5520_s24  }
   0x8   : > { %p45_p0 = scmp.ne.s32.totalorder %s3639_s25, %s3635_s24  ;;  %p5498_p1 = scmp.eq.s32.totalorder %s3720_s28, 0 }
   0x9   : > { %p201_p3 = scmp.eq.s32.totalorder %s2874_s29, 1  ;;  %p2875_p5 = scmp.ge.s32.totalorder %s3647_s27, 1 }
   0xa   : > { %p3729_p4 = por %p5498_p1, %p45_p0  ;;  %p208_p7 = scmp.lt.s32.totalorder %s3647_s27, 3 }
   0xb   : > { %p3734_p6 = por %p201_p3, %p45_p0  ;;  %s3649_s10 = smov [#allocation6]  }
   0xc   : > { %s5502_s30 = scalar_select %p3729_p4, 1, 0 }
   0xd   : > { %s5503_s8 = scalar_select %p3734_p6, 1, 0 }
   0xe   : > { %p3739_p8 = pnand %p2875_p5, %p208_p7  ;;  %s220_s11 = sshll.u32 %s3649_s10, 4  ;;  %s3743_s11 = int_to_ptr.vmem [resolvable:$true] %s220_s11 }
   0xf   : > { %5504 = sst [smem:[#allocation16_spill]] %s5503_s8  ;;  %s3650_s13 = smov [#allocation8]  }
  0x10   : > { %s5505_s9 = scalar_select %p3739_p8, 1, 0 }
  0x11   : > { %p3244_p9 = pneg %p3739_p8  ;;  %s236_s14 = sshll.u32 %s3650_s13, 4  ;;  %s3754_s14 = int_to_ptr.vmem [resolvable:$true] %s236_s14 }
  0x12   : > { %s3651_s15 = smov [#allocation9]   ;;  %s3459_s19 = scalar_lea.hbm %s5491_s1, 2048 }
  0x13   : > { %p3750_p11 = pnand %p3244_p9, %p5498_p1  ;;  %s3756_s16 = sshll.u32 %s3651_s15, 4  ;;  %s253_s16 = int_to_ptr.vmem [resolvable:$true] %s3756_s16 }
  0x14   : > { %p3460_p12 = scmp.ne.s32.totalorder %s5491_s1, %s3459_s19  ;;  %p3466_p5 = scmp.lt.u32.totalorder %s3459_s19, %s5491_s1 }
  0x15   : > { %p3766_p13 = pneg %p3750_p11 }
  0x17   : > { %p3462_p0 = pnand %p3766_p13, %p3460_p12 }
  0x19   : > { %p3463_p3 = pneg %p3462_p0 }
  0x1b   : > { %p3468_p7 = pnand %p3466_p5, %p3463_p3 }
  0x1d   : > { %3471 = shalt.err (!%p3468_p7)
}
  0x1e   : > { %s3472_s10 = scalar_lea.vmem %s3743_s11, 2048  ;;  %p3480_p2 = scmp.lt.s32.totalorder %s3743_s11, %s3743_s11 }
  0x1f   : > { %p3473_p9 = scmp.ne.s32.totalorder %s3743_s11, %s3472_s10  ;;  %p3481_p6 = scmp.lt.s32.totalorder %s3472_s10, %s3472_s10 }
  0x21   : > { %p3475_p10 = pnand %p3473_p9, %p3766_p13  ;;  %p3482_p12 = por %p3481_p6, %p3480_p2 }
  0x23   : > { %p3476_p1 = pneg %p3475_p10 }
  0x25   : > { %p3483_p0 = pnand %p3482_p12, %p3476_p1 }
  0x27   : > { %3486 = shalt.err (!%p3483_p0)
}
  0x28   : > { %s3652_s13 = smov 128   ;;  %s3653_s15 = smov 8  }
  0x29   : > { %3247 = dma.hbm_to_vmem [thread:$0]  (!%p3750_p11), %s5491_s1, 2048, %s3743_s11, [#allocation7], %s3652_s13, %s3652_s13, %s3653_s15  }
  0x2a   : > { %s3487_s21 = scalar_lea.hbm %s5493_s3, 256 }
  0x2b   : > { %p3488_p1 = scmp.ne.s32.totalorder %s5493_s3, %s3487_s21  ;;  %p3494_p10 = scmp.lt.u32.totalorder %s3487_s21, %s5493_s3 }
  0x2d   : > { %p3490_p2 = pnand %p3488_p1, %p3766_p13 }
  0x2f   : > { %p3491_p6 = pneg %p3490_p2 }
  0x31   : > { %p3496_p3 = pnand %p3494_p10, %p3491_p6 }
  0x33   : > { %3499 = shalt.err (!%p3496_p3)
}
  0x34   : > { %s3500_s11 = scalar_lea.vmem %s3754_s14, 256  ;;  %p3508_p12 = scmp.lt.s32.totalorder %s3754_s14, %s3754_s14 }
  0x35   : > { %p3501_p5 = scmp.ne.s32.totalorder %s3754_s14, %s3500_s11  ;;  %p3509_p0 = scmp.lt.s32.totalorder %s3500_s11, %s3500_s11 }
  0x37   : > { %p3503_p7 = pnand %p3501_p5, %p3766_p13  ;;  %p3510_p1 = por %p3509_p0, %p3508_p12 }
  0x39   : > { %p3504_p9 = pneg %p3503_p7 }
  0x3b   : > { %p3511_p2 = pnand %p3510_p1, %p3504_p9 }
  0x3d   : > { %3514 = shalt.err (!%p3511_p2)
}
  0x3e   : > { %3250 = dma.hbm_to_vmem [thread:$0]  (!%p3750_p11), %s5493_s3, 256, %s3754_s14, [#allocation7], %s3652_s13, %s3652_s13, %s3653_s15  }
  0x3f   : > { %s3515_s20 = scalar_lea.hbm %s5495_s5, 2048 }
  0x40   : > { %p3516_p6 = scmp.ne.s32.totalorder %s5495_s5, %s3515_s20  ;;  %p3522_p5 = scmp.lt.u32.totalorder %s3515_s20, %s5495_s5 }
  0x42   : > { %p3518_p10 = pnand %p3516_p6, %p3766_p13 }
  0x44   : > { %p3519_p3 = pneg %p3518_p10 }
  0x46   : > { %p3524_p7 = pnand %p3522_p5, %p3519_p3 }
  0x48   : > { %3527 = shalt.err (!%p3524_p7)
}
  0x49   : > { %s3528_s11 = scalar_lea.vmem %s253_s16, 2048  ;;  %p3536_p1 = scmp.lt.s32.totalorder %s253_s16, %s253_s16 }
  0x4a   : > { %p3529_p9 = scmp.ne.s32.totalorder %s253_s16, %s3528_s11  ;;  %p3537_p2 = scmp.lt.s32.totalorder %s3528_s11, %s3528_s11 }
  0x4c   : > { %p3531_p12 = pnand %p3529_p9, %p3766_p13  ;;  %p3538_p4 = por %p3537_p2, %p3536_p1 }
  0x4e   : > { %p3532_p0 = pneg %p3531_p12 }
  0x50   : > { %p3539_p8 = pnand %p3538_p4, %p3532_p0 }
  0x52   : > { %3542 = shalt.err (!%p3539_p8)
}
  0x53   : > { %3253 = dma.hbm_to_vmem [thread:$0]  (!%p3750_p11), %s5495_s5, 2048, %s253_s16, [#allocation10], %s3652_s13, %s3652_s13, %s3653_s15  }
  0x54   : > { %s3839_s22 = sadd.s32 1, %s3647_s27   ;;  %s32_s17 = sadd.s32 1, %s3643_s26 }
  0x55   : > { %s29_s12 = ssub.s32 %s3647_s27, %s3839_s22  ;;  %p39_p8 = scmp.ne.s32.totalorder %s3643_s26, %s3639_s25 }
  0x56   : > { %p30_p4 = scmp.eq.s32.totalorder %s29_s12, 0  ;;  %p40_p13 = scmp.eq.s32.totalorder %s3647_s27, 0 }
  0x57   : > { %p3265_p6 = scmp.lt.s32.totalorder %s3647_s27, 2  ;;  %p5508_p3 = scmp.eq.s32.totalorder %s3720_s28, 1 }
  0x58   : > { %s3849_s18 = scalar_select %p30_p4, %s3643_s26, %s32_s17  }
  0x59   : > { %p41_p10 = por %p40_p13, %p39_p8  ;;  %p3853_p5 = por %p5508_p3, %p39_p8 }
  0x5a   : > { %s269_s20 = sand.u32 1, %s3643_s26   ;;  %s2906_s21 = sshll.u32 %s3647_s27, 12 }
  0x5b   : > { %s2880_s16 = sshll.u32 %s269_s20, 8  ;;  %s3862_s10 = scalar_lea.hbm %s5490_s0, %s2906_s21 }
  0x5c   : > { %s273_s11 = scalar_lea.vmem [#allocation3], %s2880_s16  ;;  %p3864_p11 = pnand %p3265_p6, %p41_p10 }
  0x5d   : > { %s280_s14 = sshll.u32 %s273_s11, 4  ;;  %s3870_s12 = scalar_lea.sflag [#allocation4], %s269_s20  ;;  %s3868_s14 = int_to_ptr.vmem [resolvable:$true] %s280_s14 }
  0x5e   : > { %s3543_s17 = scalar_lea.hbm %s3862_s10, 4096  ;;  %p3545_p9 = pneg %p3864_p11 }
  0x5f   : > { %p3544_p7 = scmp.ne.s32.totalorder %s3862_s10, %s3543_s17  ;;  %s3548_s23 = scalar_lea.hbm %s5490_s0, 8192 }
  0x60   : > { %p3549_p1 = scmp.lt.u32.totalorder %s3862_s10, %s5490_s0  ;;  %p3550_p2 = scmp.lt.u32.totalorder %s3548_s23, %s3543_s17 }
  0x61   : > { %p3546_p12 = pnand %p3545_p9, %p3544_p7  ;;  %p3552_p8 = scmp.lt.u32.totalorder %s3543_s17, %s3862_s10 }
  0x62   : > { %p3551_p4 = por %p3550_p2, %p3549_p1 }
  0x63   : > { %p3547_p0 = pneg %p3546_p12 }
  0x64   : > { %p3553_p13 = por %p3552_p8, %p3551_p4 }
  0x66   : > { %p3554_p6 = pnand %p3553_p13, %p3547_p0 }
  0x68   : > { %3557 = shalt.err (!%p3554_p6)
}
  0x69   : > { %s3558_s20 = scalar_lea.vmem %s3868_s14, 4096  ;;  %s3654_s21 = smov [#allocation3]  }
  0x6a   : > { %p3559_p10 = scmp.ne.s32.totalorder %s3868_s14, %s3558_s20  ;;  %s3563_s16 = sshll.u32 %s3654_s21, 4  ;;  %s3564_s16 = int_to_ptr.vmem [resolvable:$false] %s3563_s16 }
  0x6b   : > { %s3565_s29 = scalar_lea.vmem %s3564_s16, 8192  ;;  %p3566_p12 = scmp.lt.s32.totalorder %s3868_s14, %s3564_s16 }
  0x6c   : > { %p3561_p3 = pnand %p3559_p10, %p3545_p9  ;;  %p3567_p1 = scmp.lt.s32.totalorder %s3565_s29, %s3558_s20 }
  0x6e   : > { %p3562_p7 = pneg %p3561_p3  ;;  %p3568_p2 = por %p3567_p1, %p3566_p12 }
  0x70   : > { %p3569_p4 = pnand %p3568_p2, %p3562_p7 }
  0x72   : > { %3572 = shalt.err (!%p3569_p4)
}
  0x73   : > { %3257 = dma.hbm_to_vmem [thread:$0]  (!%p3864_p11), %s3862_s10, 4096, %s3868_s14, %s3870_s12, %s3652_s13, %s3652_s13, %s3653_s15  }
  0x74   : > { %p5511_p9 = scmp.ne.s32.totalorder %s5505_s9, 0 }
  0x75   : > { %s3904_s17 = sand.u32 (!%p5511_p9), 1, %s3639_s25   ;;  %p5512_p0 = scmp.ne.s32.totalorder (!%p5511_p9), %s5502_s30, 0 }
  0x76   : > { %292 = sbr.rel (%p5511_p9) target bundleno = 1007 (0x3ef), region = 48  ;;  %s2884_s23 = sshll.u32 (!%p5511_p9), %s3904_s17, 8 }
  0x77   : > { %s295_s11 = scalar_lea.sflag (!%p5511_p9), [#allocation4], %s3904_s17  ;;  %s3910_s8 = scalar_lea.vmem (!%p5511_p9), [#allocation3], %s2884_s23 }
  0x7d   : > { %3618 = dma.done.wait (%p5512_p0), %s295_s11, 4096  }
  0x7e   : > { %3620 = vsyncadd (%p5512_p0), %s295_s11, 4294963200  ;;  %p5513_p11 = scmp.eq.s32.totalorder %s3720_s28, 0 }
  0x80   : > { %3622 = dma.done.wait (%p5513_p11), [#allocation7], 2304   ;;  %p5514_p8 = pmov %p5513_p11 }
  0x82   : > { %3624 = vsyncadd (%p5514_p8), [#allocation7], 4294964992  ;;  %p5515_p13 = pmov %p5514_p8 }
  0x83   : > { %p5516_p6 = pmov %p5514_p8 }
  0x84   : > { %3626 = dma.done.wait (%p5515_p13), [#allocation10], 2048  }
  0x85   : > { %3628 = vsyncadd (%p5516_p6), [#allocation10], 4294965248  ;;  %v373_v0 = vld [vmem:[#allocation6] sm:$0xff]  ;;  %v374_v1 = vld [vmem:[#allocation6 + $0x8] sm:$0xff]  ;;  %v3655_v56 = vmov 0.0   ;;  %s5347_s29 = scalar_lea.vmem [#allocation11], %s2884_s23 }
  0x86   : > { %v375_v2 = vld [vmem:[#allocation6 + $0x10] sm:$0xff]  ;;  %v3164_v3 = vpack.c.bf16 %v374_v1, %v373_v0  ;;  %v376_v4 = vld [vmem:[#allocation6 + $0x18] sm:$0xff]  ;;  %v377_v6 = vld [vmem:[#allocation6 + $0x20] sm:$0xff]  ;;  %621 = vst [vmem:[#allocation2] sm:$0xff] %v3655_v56  ;;  %s2907_s23 = sshll.u32 %s3720_s28, 12  ;;  %s2772_s11 = sshll.u32 %s5347_s29, 4  ;;  %s5443_s11 = int_to_ptr.vmem [resolvable:$true] %s2772_s11 }
  0x87   : > { %v3168_v5 = vpack.c.bf16 %v376_v4, %v375_v2  ;;  %v378_v7 = vld [vmem:[#allocation6 + $0x28] sm:$0xff]  ;;  %v341_v9 = vld [vmem:[%s3910_s8] sm:$0xff]  ;;  %v379_v10 = vld [vmem:[#allocation6 + $0x30] sm:$0xff]  ;;  %622 = vst [vmem:[#allocation2 + $0x8] sm:$0xff] %v3655_v56  ;;  %s5441_s9 = scalar_lea.hbm %s5497_s7, %s2907_s23  ;;  %s2759_s28 = scalar_lea.sflag [#allocation5], %s3904_s17 }
  0x88   : > { %3165 = vmatprep.subr.bf16.mxu0 %v3164_v3  ;;  %v3172_v8 = vpack.c.bf16 %v378_v7, %v377_v6  ;;  %v380_v11 = vld [vmem:[#allocation6 + $0x38] sm:$0xff]  ;;  %3036 = vmatprep.mubr.f32.mxu0 %v341_v9  ;;  %v381_v13 = vld [vmem:[#allocation6 + $0x40] sm:$0xff]  ;;  %v382_v14 = vld [vmem:[#allocation6 + $0x48] sm:$0xff]  ;;  %629 = vst [vmem:[#allocation2 + $0x18] sm:$0x1] %v3655_v56  ;;  %s3573_s13 = scalar_lea.vmem %s5443_s11, 4096 }
  0x89   : > { %3167 = vmatpush3.bf16.msra.mxu0 %v3164_v3  ;;  %v3176_v12 = vpack.c.bf16 %v380_v11, %v379_v10  ;;  %v3180_v15 = vpack.c.bf16 %v382_v14, %v381_v13  ;;  %v383_v16 = vld [vmem:[#allocation6 + $0x50] sm:$0xff]  ;;  %v384_v17 = vld [vmem:[#allocation6 + $0x58] sm:$0xff]  ;;  %v385_v19 = vld [vmem:[#allocation6 + $0x60] sm:$0xff]  ;;  %630 = vst [vmem:[#allocation2 + $0x30] sm:$0x1] %v3655_v56  ;;  %p3574_p10 = scmp.ne.s32.totalorder %s5443_s11, %s3573_s13  ;;  %s3656_s15 = smov [#allocation11]  }
  0x8a   : > { %3169 = vmatprep.subr.bf16.mxu0 %v3168_v5  ;;  %v3184_v18 = vpack.c.bf16 %v384_v17, %v383_v16  ;;  %v386_v20 = vld [vmem:[#allocation6 + $0x68] sm:$0xff]  ;;  %v387_v22 = vld [vmem:[#allocation6 + $0x70] sm:$0xff]  ;;  %v388_v23 = vld [vmem:[#allocation6 + $0x78] sm:$0xff]  ;;  %623 = vst [vmem:[#allocation2 + $0x10] sm:$0x3] %v3655_v56  ;;  %s3577_s10 = sshll.u32 %s3656_s15, 4  ;;  %s3578_s10 = int_to_ptr.vmem [resolvable:$false] %s3577_s10 }
  0x8b   : > { %v3188_v21 = vpack.c.bf16 %v386_v20, %v385_v19  ;;  %v3192_v24 = vpack.c.bf16 %v388_v23, %v387_v22  ;;  %v342_v25 = vld [vmem:[%s3910_s8 + $0x8] sm:$0xff]  ;;  %v343_v26 = vld [vmem:[%s3910_s8 + $0x10] sm:$0xff]  ;;  %v344_v27 = vld [vmem:[%s3910_s8 + $0x18] sm:$0xff]  ;;  %625 = vst [vmem:[#allocation2 + $0x198] sm:$0xff] %v3655_v56  ;;  %p3575_p3 = pnand %p3574_p10, %p3853_p5  ;;  %s3579_s14 = scalar_lea.vmem %s3578_s10, 8192 }
  0x8c   : > { %v345_v28 = vld [vmem:[%s3910_s8 + $0x20] sm:$0xff]  ;;  %v346_v29 = vld [vmem:[%s3910_s8 + $0x28] sm:$0xff]  ;;  %v347_v30 = vld [vmem:[%s3910_s8 + $0x30] sm:$0xff]  ;;  %626 = vst [vmem:[#allocation2 + $0x1a0] sm:$0xff] %v3655_v56  ;;  %p3580_p12 = scmp.lt.s32.totalorder %s5443_s11, %s3578_s10  ;;  %p3581_p1 = scmp.lt.s32.totalorder %s3579_s14, %s3573_s13 }
  0x8d   : > { %3171 = vmatpush3.bf16.msra.mxu0 %v3168_v5  ;;  %v348_v31 = vld [vmem:[%s3910_s8 + $0x38] sm:$0xff]  ;;  %v349_v32 = vld [vmem:[%s3910_s8 + $0x40] sm:$0xff]  ;;  %v350_v33 = vld [vmem:[%s3910_s8 + $0x48] sm:$0xff]  ;;  %627 = vst [vmem:[#allocation2 + $0x1a8] sm:$0x3] %v3655_v56  ;;  %p3576_p7 = pneg %p3575_p3 }
  0x8e   : > { %3173 = vmatprep.subr.bf16.mxu0 %v3172_v8  ;;  %v351_v34 = vld [vmem:[%s3910_s8 + $0x50] sm:$0xff]  ;;  %v352_v35 = vld [vmem:[%s3910_s8 + $0x58] sm:$0xff]  ;;  %v353_v36 = vld [vmem:[%s3910_s8 + $0x60] sm:$0xff]  ;;  %631 = vst [vmem:[#allocation2 + $0x48] sm:$0x1] %v3655_v56  ;;  %p3582_p2 = por %p3581_p1, %p3580_p12 }
  0x8f   : > { %v354_v37 = vld [vmem:[%s3910_s8 + $0x68] sm:$0xff]  ;;  %v355_v38 = vld [vmem:[%s3910_s8 + $0x70] sm:$0xff]  ;;  %v356_v39 = vld [vmem:[%s3910_s8 + $0x78] sm:$0xff]  ;;  %632 = vst [vmem:[#allocation2 + $0x60] sm:$0x1] %v3655_v56 }
  0x90   : > { %v357_v40 = vld [vmem:[%s3910_s8 + $0x80] sm:$0xff]  ;;  %v358_v41 = vld [vmem:[%s3910_s8 + $0x88] sm:$0xff]  ;;  %v359_v42 = vld [vmem:[%s3910_s8 + $0x90] sm:$0xff]  ;;  %633 = vst [vmem:[#allocation2 + $0x78] sm:$0x1] %v3655_v56  ;;  %p3583_p4 = pnand %p3582_p2, %p3576_p7 }
  0x91   : > { %3175 = vmatpush3.bf16.msra.mxu0 %v3172_v8  ;;  %v360_v43 = vld [vmem:[%s3910_s8 + $0x98] sm:$0xff]  ;;  %v361_v44 = vld [vmem:[%s3910_s8 + $0xa0] sm:$0xff]  ;;  %v362_v45 = vld [vmem:[%s3910_s8 + $0xa8] sm:$0xff]  ;;  %634 = vst [vmem:[#allocation2 + $0x90] sm:$0x1] %v3655_v56 }
  0x92   : > { %3177 = vmatprep.subr.bf16.mxu0 %v3176_v12  ;;  %v363_v46 = vld [vmem:[%s3910_s8 + $0xb0] sm:$0xff]  ;;  %v364_v47 = vld [vmem:[%s3910_s8 + $0xb8] sm:$0xff]  ;;  %v365_v48 = vld [vmem:[%s3910_s8 + $0xc0] sm:$0xff]  ;;  %635 = vst [vmem:[#allocation2 + $0xa8] sm:$0x1] %v3655_v56 }
  0x93   : > { %v366_v49 = vld [vmem:[%s3910_s8 + $0xc8] sm:$0xff]  ;;  %v367_v50 = vld [vmem:[%s3910_s8 + $0xd0] sm:$0xff]  ;;  %v368_v51 = vld [vmem:[%s3910_s8 + $0xd8] sm:$0xff]  ;;  %636 = vst [vmem:[#allocation2 + $0xc0] sm:$0x1] %v3655_v56 }
  0x94   : > { %v369_v52 = vld [vmem:[%s3910_s8 + $0xe0] sm:$0xff]  ;;  %v370_v53 = vld [vmem:[%s3910_s8 + $0xe8] sm:$0xff]  ;;  %v371_v54 = vld [vmem:[%s3910_s8 + $0xf0] sm:$0xff]  ;;  %637 = vst [vmem:[#allocation2 + $0xd8] sm:$0x1] %v3655_v56 }
  0x95   : > { %3179 = vmatpush3.bf16.msra.mxu0 %v3176_v12  ;;  %v372_v55 = vld [vmem:[%s3910_s8 + $0xf8] sm:$0xff]  ;;  %638 = vst [vmem:[#allocation2 + $0xf0] sm:$0x1] %v3655_v56  ;;  %639 = vst [vmem:[#allocation2 + $0x108] sm:$0x1] %v3655_v56  ;;  %v2478_v57 = vld [vmem:[#allocation9] sm:$0xff] }
  0x96   : > { %3181 = vmatprep.subr.bf16.mxu0 %v3180_v15  ;;  %640 = vst [vmem:[#allocation2 + $0x120] sm:$0x1] %v3655_v56  ;;  %641 = vst [vmem:[#allocation2 + $0x138] sm:$0x1] %v3655_v56  ;;  %v2479_v58 = vld [vmem:[#allocation9 + $0x8] sm:$0xff]  ;;  %v2480_v60 = vld [vmem:[#allocation9 + $0x10] sm:$0xff] }
  0x97   : > { %642 = vst [vmem:[#allocation2 + $0x150] sm:$0x1] %v3655_v56  ;;  %643 = vst [vmem:[#allocation2 + $0x168] sm:$0x1] %v3655_v56  ;;  %v3196_v59 = vpack.c.bf16 %v2479_v58, %v2478_v57  ;;  %v2481_v61 = vld [vmem:[#allocation9 + $0x18] sm:$0xff]  ;;  %v2482_v63 = vld [vmem:[#allocation9 + $0x20] sm:$0xff] }
  0x98   : > { %644 = vst [vmem:[#allocation2 + $0x180] sm:$0x1] %v3655_v56  ;;  %647 = vst [vmem:[#allocation2 + $0x29] sm:$0x1] %v3655_v56  ;;  %v3200_v62 = vpack.c.bf16 %v2481_v61, %v2480_v60  ;;  %v2483_v0 = vld [vmem:[#allocation9 + $0x28] sm:$0xff]  ;;  %v2484_v2 = vld [vmem:[#allocation9 + $0x30] sm:$0xff] }
  0x99   : > { %3183 = vmatpush3.bf16.msra.mxu0 %v3180_v15  ;;  %648 = vst [vmem:[#allocation2 + $0x41] sm:$0x1] %v3655_v56  ;;  %649 = vst [vmem:[#allocation2 + $0x59] sm:$0x1] %v3655_v56  ;;  %3197 = vmatprep.subr.bf16.mxu1 %v3196_v59  ;;  %v3204_v1 = vpack.c.bf16 %v2483_v0, %v2482_v63  ;;  %v2485_v3 = vld [vmem:[#allocation9 + $0x38] sm:$0xff]  ;;  %v2486_v5 = vld [vmem:[#allocation9 + $0x40] sm:$0xff] }
  0x9a   : > { %3185 = vmatprep.subr.bf16.mxu0 %v3184_v18  ;;  %650 = vst [vmem:[#allocation2 + $0x71] sm:$0x1] %v3655_v56  ;;  %651 = vst [vmem:[#allocation2 + $0x89] sm:$0x1] %v3655_v56  ;;  %3199 = vmatpush3.bf16.msra.mxu1 %v3196_v59  ;;  %v3208_v4 = vpack.c.bf16 %v2485_v3, %v2484_v2  ;;  %v2487_v6 = vld [vmem:[#allocation9 + $0x48] sm:$0xff]  ;;  %v2488_v8 = vld [vmem:[#allocation9 + $0x50] sm:$0xff] }
  0x9b   : > { %652 = vst [vmem:[#allocation2 + $0xa1] sm:$0x1] %v3655_v56  ;;  %653 = vst [vmem:[#allocation2 + $0xb9] sm:$0x1] %v3655_v56  ;;  %3201 = vmatprep.subr.bf16.mxu1 %v3200_v62  ;;  %v3212_v7 = vpack.c.bf16 %v2487_v6, %v2486_v5  ;;  %v2489_v9 = vld [vmem:[#allocation9 + $0x58] sm:$0xff]  ;;  %v2490_v11 = vld [vmem:[#allocation9 + $0x60] sm:$0xff] }
  0x9c   : > { %654 = vst [vmem:[#allocation2 + $0xd1] sm:$0x1] %v3655_v56  ;;  %655 = vst [vmem:[#allocation2 + $0xe9] sm:$0x1] %v3655_v56  ;;  %v3216_v10 = vpack.c.bf16 %v2489_v9, %v2488_v8  ;;  %v2491_v12 = vld [vmem:[#allocation9 + $0x68] sm:$0xff]  ;;  %v2492_v13 = vld [vmem:[#allocation9 + $0x70] sm:$0xff] }
  0x9d   : > { %3187 = vmatpush3.bf16.msra.mxu0 %v3184_v18  ;;  %656 = vst [vmem:[#allocation2 + $0x101] sm:$0x1] %v3655_v56  ;;  %657 = vst [vmem:[#allocation2 + $0x119] sm:$0x1] %v3655_v56  ;;  %v3220_v14 = vpack.c.bf16 %v2491_v12, %v2490_v11  ;;  %v2493_v15 = vld [vmem:[#allocation9 + $0x78] sm:$0xff]  ;;  %v767_v20 = vld [vmem:[#allocation2 + $0x1] sm:$0xff] }
  0x9e   : > { %3189 = vmatprep.subr.bf16.mxu0 %v3188_v21  ;;  %658 = vst [vmem:[#allocation2 + $0x131] sm:$0x1] %v3655_v56  ;;  %659 = vst [vmem:[#allocation2 + $0x149] sm:$0x1] %v3655_v56  ;;  %3203 = vmatpush3.bf16.msra.mxu1 %v3200_v62  ;;  %v3224_v16 = vpack.c.bf16 %v2493_v15, %v2492_v13  ;;  %v3959_v17 = vld [vmem:[%s5492_s2] ss:$0 sm:$0xff] }
  0x9f   : > { %660 = vst [vmem:[#allocation2 + $0x161] sm:$0x1] %v3655_v56  ;;  %661 = vst [vmem:[#allocation2 + $0x179] sm:$0x1] %v3655_v56  ;;  %3205 = vmatprep.subr.bf16.mxu1 %v3204_v1  ;;  %v3961_v19 = vld [vmem:[#allocation8] ss:$0 sm:$0xff] }
  0xa0   : > { %662 = vst [vmem:[#allocation2 + $0x191] sm:$0x1] %v3655_v56  ;;  %628 = vst [vmem:[#allocation2] sm:$0x1] %v3655_v56  ;;  %v3963_v23 = vld [vmem:[#allocation8 + $0x1] ss:$0 sm:$0xff] }
  0xa1   : > { %3191 = vmatpush3.bf16.msra.mxu0 %v3188_v21  ;;  %646 = vst [vmem:[#allocation2 + $0x11] sm:$0x1] %v3655_v56  ;;  %645 = vst [vmem:[#allocation2 + $0x198] sm:$0x1] %v3655_v56  ;;  %v768_v21 = vld [vmem:[#allocation2 + $0x9] sm:$0xff] }
  0xa2   : > { %3193 = vmatprep.subr.bf16.mxu0 %v3192_v24  ;;  %663 = vst [vmem:[#allocation2 + $0x1a9] sm:$0x1] %v3655_v56  ;;  %3207 = vmatpush3.bf16.msra.mxu1 %v3204_v1  ;;  %v4007_v61 = vld [vmem:[#allocation8 + $0x5] ss:$0 sm:$0xff] }
  0xa3   : > { %3209 = vmatprep.subr.bf16.mxu1 %v3208_v4 }
  0xa5   : > { %3195 = vmatpush3.bf16.msra.mxu0 %v3192_v24 }
  0xa6   : > { %3211 = vmatpush3.bf16.msra.mxu1 %v3208_v4 }
  0xa7   : > { %3213 = vmatprep.subr.bf16.mxu1 %v3212_v7  ;;  %v697_v18 = vld [vmem:[#allocation2] sm:$0xff] }
  0xa8   : > { %3037 = vmatmul.mubr.f32.vlgmr.msra.gmra.mrb[0].mxu0 %v342_v25 }
  0xa9   : > { %3039 = vmatprep.mubr.f32.mxu0 %v343_v26  ;;  %v734_v26 = vmul.f32 %v3961_v19, %v697_v18 }
  0xaa   : > { %3215 = vmatpush3.bf16.msra.mxu1 %v3212_v7 }
  0xab   : > { %3217 = vmatprep.subr.bf16.mxu1 %v3216_v10 }
  0xac   : > { %3040 = vmatmul.mubr.f32.gmra.mrb[2].mxu0 %v344_v27  ;;  %v803_v27 = vmul.f32 %v3963_v23, %v767_v20 }
  0xad   : > { %3042 = vmatprep.mubr.f32.mxu0 %v345_v28 }
  0xae   : > { %3219 = vmatpush3.bf16.msra.mxu1 %v3216_v10  ;;  %v4023_v10 = vld [vmem:[#allocation8 + $0x6] ss:$0 sm:$0xff] }
  0xaf   : > { %3221 = vmatprep.subr.bf16.mxu1 %v3220_v14 }
  0xb0   : > { %3043 = vmatmul.mubr.f32.gmra.mrb[4].mxu0 %v346_v29  ;;  %v3969_v29 = vld [vmem:[#allocation8 + $0x2] ss:$0 sm:$0xff] }
  0xb1   : > { %3045 = vmatprep.mubr.f32.mxu0 %v347_v30  ;;  %v868_v30 = vld [vmem:[#allocation2 + $0x2] sm:$0xff] }
  0xb2   : > { %3223 = vmatpush3.bf16.msra.mxu1 %v3220_v14 }
  0xb3   : > { %3225 = vmatprep.subr.bf16.mxu1 %v3224_v16 }
  0xb4   : > { %3046 = vmatmul.mubr.f32.gmra.mrb[6].mxu0 %v348_v31  ;;  %v735_v31 = vmul.f32 0.0, %v3961_v19 }
  0xb5   : > { %3048 = vmatprep.mubr.f32.mxu0 %v349_v32  ;;  %v804_v32 = vmul.f32 %v3963_v23, %v768_v21 }
  0xb6   : > { %3227 = vmatpush3.bf16.msra.mxu1 %v3224_v16 }
  0xb8   : > { %3049 = vmatmul.mubr.f32.gmra.mrb[8].mxu0 %v350_v33  ;;  %v869_v33 = vld [vmem:[#allocation2 + $0xa] sm:$0xff] }
  0xb9   : > { %3051 = vmatprep.mubr.f32.mxu0 %v351_v34 }
  0xbc   : > { %3052 = vmatmul.mubr.f32.gmra.mrb[10].mxu0 %v352_v35 }
  0xbd   : > { %3054 = vmatprep.mubr.f32.mxu0 %v353_v36 }
  0xc0   : > { %3055 = vmatmul.mubr.f32.gmra.mrb[12].mxu0 %v354_v37  ;;  %v835_v37 = vadd.f32 %v803_v27, %v734_v26 }
  0xc1   : > { %3057 = vmatprep.mubr.f32.mxu0 %v355_v38  ;;  %v904_v38 = vmul.f32 %v3969_v29, %v868_v30 }
  0xc4   : > { %3058 = vmatmul.mubr.f32.gmra.mrb[14].mxu0 %v356_v39 }
  0xc5   : > { %3060 = vmatprep.mubr.f32.mxu0 %v357_v40  ;;  %v836_v40 = vadd.f32 %v804_v32, %v735_v31 }
  0xc8   : > { %3061 = vmatmul.mubr.f32.gmra.mrb[16].mxu0 %v358_v41  ;;  %v905_v41 = vmul.f32 %v3969_v29, %v869_v33 }
  0xc9   : > { %3063 = vmatprep.mubr.f32.mxu0 %v359_v42  ;;  %v3980_v42 = vld [vmem:[#allocation8 + $0x4] ss:$0 sm:$0xff] }
  0xcc   : > { %3064 = vmatmul.mubr.f32.gmra.mrb[18].mxu0 %v360_v43 }
  0xcd   : > { %3066 = vmatprep.mubr.f32.mxu0 %v361_v44  ;;  %v3982_v44 = vld [vmem:[#allocation8 + $0x7] ss:$0 sm:$0xff] }
  0xd0   : > { %3067 = vmatmul.mubr.f32.gmra.mrb[20].mxu0 %v362_v45 }
  0xd1   : > { %3069 = vmatprep.mubr.f32.mxu0 %v363_v46 }
  0xd4   : > { %3070 = vmatmul.mubr.f32.gmra.mrb[22].mxu0 %v364_v47  ;;  %v936_v47 = vadd.f32 %v904_v38, %v835_v37 }
  0xd5   : > { %3072 = vmatprep.mubr.f32.mxu0 %v365_v48  ;;  %v3987_v48 = vld [vmem:[#allocation8 + $0x3] ss:$0 sm:$0xff] }
  0xd8   : > { %3073 = vmatmul.mubr.f32.gmra.mrb[24].mxu0 %v366_v49 }
  0xd9   : > { %3075 = vmatprep.mubr.f32.mxu0 %v367_v50  ;;  %v937_v50 = vadd.f32 %v905_v41, %v836_v40 }
  0xdc   : > { %3076 = vmatmul.mubr.f32.gmra.mrb[26].mxu0 %v368_v51 }
  0xdd   : > { %3078 = vmatprep.mubr.f32.mxu0 %v369_v52 }
  0xe0   : > { %3079 = vmatmul.mubr.f32.gmra.mrb[28].mxu0 %v370_v53 }
  0xe1   : > { %3081 = vmatprep.mubr.f32.mxu0 %v371_v54 }
  0xe4   : > { %3082 = vmatmul.mubr.f32.gmra.mrb[30].mxu0 %v372_v55 }
 0x17b   : > { %v3038_v22 = vpop.f32.mrb[0].mxu0 }
 0x17c   : > { %v468_v24 = vadd.f32 %v3038_v22, %v3959_v17  ;;  %v462_v25 = vpop.f32.mrb[1].mxu0 }
 0x17d   : > { %v463_v28 = vadd.f32 %v3959_v17, %v462_v25  ;;  %v4033_v25 = vld [vmem:[#allocation8 + $0x8] ss:$0 sm:$0xff] }
 0x17e   : > { %666 = vst [vmem:[#allocation2 + $0x21] sm:$0xff] %v468_v24  ;;  %v1107_v51 = vmul.f32 %v3980_v42, %v468_v24  ;;  %v806_v52 = vmul.f32 %v3963_v23, %v468_v24 }
 0x17f   : > { %665 = vst [vmem:[#allocation2 + $0x19] sm:$0xff] %v463_v28  ;;  %v3041_v34 = vpop.f32.mrb[2].mxu0  ;;  %v1106_v54 = vmul.f32 %v3980_v42, %v463_v28  ;;  %v805_v57 = vmul.f32 %v3963_v23, %v463_v28 }
 0x180   : > { %v3974_v35 = vadd.f32 %v3041_v34, %v3959_v17  ;;  %v472_v36 = vpop.f32.mrb[3].mxu0 }
 0x181   : > { %v473_v39 = vadd.f32 %v3959_v17, %v472_v36 }
 0x182   : > { %668 = vst [vmem:[#allocation2 + $0x39] sm:$0xff] %v3974_v35  ;;  %v3998_v56 = vmul.f32 %v3982_v44, %v3974_v35  ;;  %v4003_v58 = vmul.f32 %v3980_v42, %v3974_v35 }
 0x183   : > { %667 = vst [vmem:[#allocation2 + $0x31] sm:$0xff] %v473_v39  ;;  %v3044_v43 = vpop.f32.mrb[4].mxu0  ;;  %v1410_v63 = vmul.f32 %v3982_v44, %v473_v39  ;;  %v1108_v5 = vmul.f32 %v3980_v42, %v473_v39  ;;  %v4018_v7 = vmul.f32 %v3963_v23, %v473_v39 }
 0x184   : > { %v3985_v45 = vadd.f32 %v3044_v43, %v3959_v17  ;;  %v482_v46 = vpop.f32.mrb[5].mxu0 }
 0x185   : > { %v3990_v49 = vadd.f32 %v3959_v17, %v482_v46  ;;  %v1172_v1 = vld [vmem:[#allocation2 + $0x22] sm:$0xff] }
 0x186   : > { %670 = vst [vmem:[#allocation2 + $0x51] sm:$0xff] %v3985_v45  ;;  %v969_v53 = vld [vmem:[#allocation2 + $0x18] sm:$0xff]  ;;  %v970_v55 = vld [vmem:[#allocation2 + $0x20] sm:$0xff]  ;;  %v1208_v14 = vmul.f32 %v4007_v61, %v1172_v1  ;;  %v907_v20 = vmul.f32 %v3969_v29, %v1172_v1 }
 0x187   : > { %669 = vst [vmem:[#allocation2 + $0x49] sm:$0xff] %v3990_v49  ;;  %v3047_v59 = vpop.f32.mrb[6].mxu0  ;;  %v1005_v60 = vmul.f32 %v3987_v48, %v969_v53  ;;  %v1171_v62 = vld [vmem:[#allocation2 + $0x1a] sm:$0xff]  ;;  %v1006_v0 = vmul.f32 %v3987_v48, %v970_v55  ;;  %v736_v2 = vmul.f32 %v3961_v19, %v969_v53  ;;  %v737_v6 = vmul.f32 %v3961_v19, %v970_v55 }
 0x188   : > { %v4013_v3 = vadd.f32 %v3047_v59, %v3959_v17  ;;  %v492_v4 = vpop.f32.mrb[7].mxu0  ;;  %v906_v16 = vmul.f32 %v3969_v29, %v1171_v62  ;;  %v1207_v24 = vmul.f32 %v4007_v61, %v1171_v62  ;;  %v1412_v28 = vmul.f32 %v3982_v44, %v3990_v49 }
 0x189   : > { %v4021_v8 = vadd.f32 %v3959_v17, %v492_v4  ;;  %v1037_v9 = vadd.f32 %v1005_v60, %v936_v47  ;;  %v1038_v11 = vadd.f32 %v1006_v0, %v937_v50  ;;  %v837_v12 = vadd.f32 %v805_v57, %v736_v2  ;;  %v4035_v27 = vld [vmem:[#allocation2 + $0x3a] sm:$0xff] }
 0x18a   : > { %672 = vst [vmem:[#allocation2 + $0x69] sm:$0xff] %v4013_v3  ;;  %v1273_v13 = vld [vmem:[#allocation2 + $0x30] sm:$0xff]  ;;  %v4027_v15 = vld [vmem:[#allocation2 + $0x38] sm:$0xff]  ;;  %v838_v18 = vadd.f32 %v806_v52, %v737_v6  ;;  %v1512_v41 = vmul.f32 %v4033_v25, %v4035_v27  ;;  %v1210_v55 = vmul.f32 %v4007_v61, %v4035_v27 }
 0x18b   : > { %671 = vst [vmem:[#allocation2 + $0x61] sm:$0xff] %v4021_v8  ;;  %v3050_v21 = vpop.f32.mrb[8].mxu0  ;;  %v1138_v22 = vadd.f32 %v1106_v54, %v1037_v9  ;;  %v1139_v26 = vadd.f32 %v1107_v51, %v1038_v11  ;;  %v1309_v32 = vmul.f32 %v4023_v10, %v1273_v13  ;;  %v1475_v33 = vld [vmem:[#allocation2 + $0x32] sm:$0xff]  ;;  %v938_v34 = vadd.f32 %v906_v16, %v837_v12  ;;  %v4067_v11 = vld [vmem:[%s5494_s4] ss:$0 sm:$0xff] }
 0x18c   : > { %v508_v30 = vadd.f32 %v3050_v21, %v3959_v17  ;;  %v502_v31 = vpop.f32.mrb[9].mxu0  ;;  %v1007_v36 = vmul.f32 %v3987_v48, %v1273_v13  ;;  %v1310_v40 = vmul.f32 %v4023_v10, %v4027_v15  ;;  %v939_v46 = vadd.f32 %v907_v20, %v838_v18 }
 0x18d   : > { %v4043_v37 = vadd.f32 %v3959_v17, %v502_v31  ;;  %v1239_v38 = vadd.f32 %v1207_v24, %v1138_v22  ;;  %v1240_v39 = vadd.f32 %v1208_v14, %v1139_v26  ;;  %v1008_v47 = vmul.f32 %v3987_v48, %v4027_v15  ;;  %v4081_v31 = vld [vmem:[#allocation2 + $0x52] sm:$0xff] }
 0x18e   : > { %674 = vst [vmem:[#allocation2 + $0x81] sm:$0xff] %v508_v30  ;;  %v1039_v43 = vadd.f32 %v1007_v36, %v938_v34  ;;  %v1511_v52 = vmul.f32 %v4033_v25, %v1475_v33  ;;  %v4053_v54 = vld [vmem:[#allocation2 + $0x48] sm:$0xff]  ;;  %v1209_v62 = vmul.f32 %v4007_v61, %v1475_v33  ;;  %v4061_v6 = vld [vmem:[#allocation2 + $0x50] sm:$0xff]  ;;  %v738_v9 = vmul.f32 %v3961_v19, %v1273_v13 }
 0x18f   : > { %673 = vst [vmem:[#allocation2 + $0x79] sm:$0xff] %v4043_v37  ;;  %v3053_v50 = vpop.f32.mrb[10].mxu0  ;;  %v1341_v51 = vadd.f32 %v1309_v32, %v1239_v38  ;;  %v1342_v53 = vadd.f32 %v1310_v40, %v1240_v39  ;;  %v1040_v0 = vadd.f32 %v1008_v47, %v939_v46  ;;  %v4073_v20 = vld [vmem:[#allocation2 + $0x4a] sm:$0xff]  ;;  %v1009_v21 = vmul.f32 %v3987_v48, %v4053_v54 }
 0x190   : > { %v518_v57 = vadd.f32 %v3053_v50, %v3959_v17  ;;  %v512_v59 = vpop.f32.mrb[11].mxu0  ;;  %v1140_v60 = vadd.f32 %v1108_v5, %v1039_v43  ;;  %v1311_v5 = vmul.f32 %v4023_v10, %v4053_v54  ;;  %v839_v13 = vadd.f32 %v4018_v7, %v738_v9 }
 0x191   : > { %v513_v1 = vadd.f32 %v3959_v17, %v512_v59  ;;  %v1442_v2 = vadd.f32 %v1410_v63, %v1341_v51  ;;  %v1443_v4 = vadd.f32 %v3998_v56, %v1342_v53  ;;  %v1141_v14 = vadd.f32 %v4003_v58, %v1040_v0 }
 0x192   : > { %676 = vst [vmem:[#allocation2 + $0x99] sm:$0xff] %v518_v57  ;;  %v1241_v12 = vadd.f32 %v1209_v62, %v1140_v60  ;;  %v908_v63 = vmul.f32 %v3969_v29, %v1475_v33  ;;  %v1312_v58 = vmul.f32 %v4023_v10, %v4061_v6  ;;  %v1513_v38 = vmul.f32 %v4033_v25, %v4073_v20  ;;  %v4109_v0 = vld [vmem:[#allocation2 + $0x60] sm:$0xff] }
 0x193   : > { %675 = vst [vmem:[#allocation2 + $0x91] sm:$0xff] %v513_v1  ;;  %v3056_v56 = vpop.f32.mrb[12].mxu0  ;;  %v1543_v16 = vadd.f32 %v1511_v52, %v1442_v2  ;;  %v1544_v18 = vadd.f32 %v1512_v41, %v1443_v4  ;;  %v1242_v30 = vadd.f32 %v1210_v55, %v1141_v14  ;;  %v1413_v40 = vmul.f32 %v3982_v44, %v3985_v45 }
 0x194   : > { %v528_v22 = vadd.f32 %v3056_v56, %v3959_v17  ;;  %v522_v24 = vpop.f32.mrb[13].mxu0  ;;  %v1343_v26 = vadd.f32 %v1311_v5, %v1241_v12  ;;  %v940_v34 = vadd.f32 %v908_v63, %v839_v13  ;;  %v1514_v46 = vmul.f32 %v4033_v25, %v4081_v31 }
 0x195   : > { %v523_v32 = vadd.f32 %v3959_v17, %v522_v24  ;;  %v4085_v33 = vadd.f32 %v4067_v11, %v1543_v16  ;;  %v4088_v7 = vadd.f32 %v4067_v11, %v1544_v18  ;;  %v1344_v39 = vadd.f32 %v1312_v58, %v1242_v30 }
 0x196   : > { %678 = vst [vmem:[#allocation2 + $0xb1] sm:$0xff] %v528_v22  ;;  %v1444_v36 = vadd.f32 %v1412_v28, %v1343_v26  ;;  %v1041_v47 = vadd.f32 %v1009_v21, %v940_v34  ;;  %v1110_v50 = vmul.f32 %v3980_v42, %v3990_v49  ;;  %v1211_v62 = vmul.f32 %v4007_v61, %v4073_v20 }
 0x197   : > { %677 = vst [vmem:[#allocation2 + $0xa9] sm:$0xff] %v523_v32  ;;  %v3059_v41 = vpop.f32.mrb[14].mxu0  ;;  %v4095_v43 = vmul.f32 0.70710677, %v4085_v33  ;;  %v4103_v52 = vmul.f32 0.70710677, %v4088_v7  ;;  %v1445_v55 = vadd.f32 %v1413_v40, %v1344_v39  ;;  %v1313_v13 = vmul.f32 %v4023_v10, %v4109_v0 }
 0x198   : > { %v538_v28 = vadd.f32 %v3059_v41, %v3959_v17  ;;  %v532_v51 = vpop.f32.mrb[15].mxu0  ;;  %v1545_v53 = vadd.f32 %v1513_v38, %v1444_v36  ;;  %v1142_v60 = vadd.f32 %v1110_v50, %v1041_v47  ;;  %v739_v26 = vmul.f32 %v3961_v19, %v4027_v15  ;;  %v4127_v36 = vld [vmem:[#allocation2 + $0x62] sm:$0xff] }
 0x199   : > { %v533_v57 = vadd.f32 %v3959_v17, %v532_v51  ;;  %v1678_v59 = vand.u32 2147483647, %v4095_v43  ;;  %v1679_v1 = vand.u32 2147483647, %v4103_v52  ;;  %v1546_v4 = vadd.f32 %v1514_v46, %v1445_v55 }
 0x19a   : > { %680 = vst [vmem:[#allocation2 + $0xc9] sm:$0xff] %v538_v28  ;;  %v4113_v2 = vadd.f32 %v4067_v11, %v1545_v53  ;;  %v1243_v14 = vadd.f32 %v1211_v62, %v1142_v60  ;;  %v1414_v15 = vmul.f32 %v3982_v44, %v4021_v8  ;;  %v808_v47 = vmul.f32 %v3963_v23, %v3974_v35 }
 0x19b   : > { %679 = vst [vmem:[#allocation2 + $0xc1] sm:$0xff] %v533_v57  ;;  %v3062_v9 = vpop.f32.mrb[16].mxu0  ;;  %v1710_v12 = vmul.f32 0.3275911, %v1678_v59  ;;  %v2126_v5 = vsub.f32 0.0, %v1678_v59  ;;  %v2127_v18 = vsub.f32 0.0, %v1679_v1  ;;  %v4125_v32 = vadd.f32 %v4067_v11, %v1546_v4 }
 0x19c   : > { %v548_v63 = vadd.f32 %v3062_v9, %v3959_v17  ;;  %v542_v56 = vpop.f32.mrb[17].mxu0  ;;  %v1711_v16 = vmul.f32 0.3275911, %v1679_v1  ;;  %v4120_v24 = vmul.f32 0.70710677, %v4113_v2  ;;  %v1345_v34 = vadd.f32 %v1313_v13, %v1243_v14 }
 0x19d   : > { %v543_v21 = vadd.f32 %v3959_v17, %v542_v56  ;;  %v1742_v22 = vadd.f32 1.0, %v1710_v12  ;;  %v2158_v30 = vmul.f32 %v2126_v5, %v1678_v59  ;;  %v2159_v39 = vmul.f32 %v2127_v18, %v1679_v1 }
 0x19e   : > { %682 = vst [vmem:[#allocation2 + $0xe1] sm:$0xff] %v548_v63  ;;  %v1743_v58 = vadd.f32 1.0, %v1711_v16  ;;  %v1680_v40 = vand.u32 2147483647, %v4120_v24  ;;  %v1515_v53 = vmul.f32 %v4033_v25, %v4127_v36  ;;  %v4139_v57 = vmul.f32 0.70710677, %v4125_v32 }
 0x19f   : > { %681 = vst [vmem:[#allocation2 + $0xd9] sm:$0xff] %v543_v21  ;;  %v3065_v38 = vpop.f32.mrb[18].mxu0  ;;  %3310 = vrcp.f32 %v1742_v22  ;;  %v2190_v55 = vmul.f32 1.442695, %v2158_v30  ;;  %v1446_v59 = vadd.f32 %v1414_v15, %v1345_v34  ;;  %v840_v60 = vadd.f32 %v808_v47, %v739_v26 }
 0x1a0   : > { %v558_v41 = vadd.f32 %v3065_v38, %v3959_v17  ;;  %v552_v46 = vpop.f32.mrb[19].mxu0  ;;  %3312 = vrcp.f32 %v1743_v58  ;;  %v1712_v28 = vmul.f32 0.3275911, %v1680_v40  ;;  %v2128_v51 = vsub.f32 0.0, %v1680_v40 }
 0x1a1   : > { %v553_v50 = vadd.f32 %v3959_v17, %v552_v46  ;;  %v2192_v1 = vmul.f32 1.442695, %v2159_v39  ;;  %v909_v35 = vmul.f32 %v3969_v29, %v4035_v27  ;;  %v1010_v9 = vmul.f32 %v3987_v48, %v4061_v6 }
 0x1a2   : > { %684 = vst [vmem:[#allocation2 + $0xf9] sm:$0xff] %v558_v41  ;;  %v1744_v4 = vadd.f32 1.0, %v1712_v28  ;;  %v2160_v14 = vmul.f32 %v2128_v51, %v1680_v40  ;;  %v1681_v63 = vand.u32 2147483647, %v4139_v57  ;;  %v1547_v56 = vadd.f32 %v1515_v53, %v1446_v59  ;;  %v4163_v41 = vld [vmem:[#allocation2 + $0x68] sm:$0xff] }
 0x1a3   : > { %683 = vst [vmem:[#allocation2 + $0xf1] sm:$0xff] %v553_v50  ;;  %v3068_v62 = vpop.f32.mrb[20].mxu0  ;;  %v941_v18 = vadd.f32 %v909_v35, %v840_v60  ;;  %v1111_v13 = vmul.f32 %v3980_v42, %v3985_v45  ;;  %v4151_v27 = vmul.f32 0.5, %v4085_v33  ;;  %v4157_v58 = vmul.f32 0.5, %v4088_v7  ;;  %v4176_v53 = vld [vmem:[#allocation2 + $0x6a] sm:$0xff] }
 0x1a4   : > { %v568_v12 = vadd.f32 %v3068_v62, %v3959_v17  ;;  %v562_v5 = vpop.f32.mrb[21].mxu0  ;;  %3314 = vrcp.f32 %v1744_v4  ;;  %v1713_v21 = vmul.f32 0.3275911, %v1681_v63  ;;  %v2129_v22 = vsub.f32 0.0, %v1681_v63 }
 0x1a5   : > { %v563_v16 = vadd.f32 %v3959_v17, %v562_v5  ;;  %v4154_v26 = vadd.f32 %v4067_v11, %v1547_v56  ;;  %3316 = vpow2.f32 %v2190_v55  ;;  %v4160_v34 = vmul.f32 0.5, %v4113_v2 }
 0x1a6   : > { %686 = vst [vmem:[#allocation2 + $0x111] sm:$0xff] %v568_v12  ;;  %v1042_v38 = vadd.f32 %v1010_v9, %v941_v18  ;;  %3318 = vpow2.f32 %v2192_v1  ;;  %v2194_v33 = vmul.f32 1.442695, %v2160_v14  ;;  %v1745_v40 = vadd.f32 1.0, %v1713_v21 }
 0x1a7   : > { %685 = vst [vmem:[#allocation2 + $0x109] sm:$0xff] %v563_v16  ;;  %v3071_v30 = vpop.f32.mrb[22].mxu0  ;;  %v4169_v47 = vmul.f32 0.70710677, %v4154_v26  ;;  %v1212_v2 = vmul.f32 %v4007_v61, %v4081_v31  ;;  %v2161_v51 = vmul.f32 %v2129_v22, %v1681_v63  ;;  %v740_v55 = vmul.f32 %v3961_v19, %v4053_v54 }
 0x1a8   : > { %v578_v45 = vadd.f32 %v3071_v30, %v3959_v17  ;;  %v572_v39 = vpop.f32.mrb[23].mxu0  ;;  %v1143_v7 = vadd.f32 %v1111_v13, %v1042_v38  ;;  %3320 = vrcp.f32 %v1745_v40  ;;  %v1314_v4 = vmul.f32 %v4023_v10, %v4163_v41 }
 0x1a9   : > { %v4165_v46 = vpop.eup %3310  ;;  %v573_v15 = vadd.f32 %v3959_v17, %v572_v39  ;;  %v1682_v62 = vand.u32 2147483647, %v4169_v47  ;;  %v1415_v5 = vmul.f32 %v3982_v44, %v4013_v3  ;;  %v809_v54 = vmul.f32 %v3963_v23, %v3990_v49 }
 0x1aa   : > { %v4173_v50 = vpop.eup %3312  ;;  %688 = vst [vmem:[#allocation2 + $0x129] sm:$0xff] %v578_v45  ;;  %v1838_v28 = vmul.f32 1.0614054, %v4165_v46  ;;  %v1244_v1 = vadd.f32 %v1212_v2, %v1143_v7  ;;  %v1516_v16 = vmul.f32 %v4033_v25, %v4176_v53  ;;  %v2196_v13 = vmul.f32 1.442695, %v2161_v51 }
 0x1ab   : > { %687 = vst [vmem:[#allocation2 + $0x121] sm:$0xff] %v573_v15  ;;  %v3074_v59 = vpop.f32.mrb[24].mxu0  ;;  %v1839_v60 = vmul.f32 1.0614054, %v4173_v50  ;;  %v1714_v56 = vmul.f32 0.3275911, %v1682_v62  ;;  %v841_v22 = vadd.f32 %v809_v54, %v740_v55  ;;  %v910_v39 = vmul.f32 %v3969_v29, %v4073_v20 }
 0x1ac   : > { %v588_v35 = vadd.f32 %v3074_v59, %v3959_v17  ;;  %v582_v9 = vpop.f32.mrb[25].mxu0  ;;  %v1870_v12 = vadd.f32 -1.4531521, %v1838_v28  ;;  %v1346_v21 = vadd.f32 %v1314_v4, %v1244_v1  ;;  %v2130_v45 = vsub.f32 0.0, %v1682_v62 }
 0x1ad   : > { %v583_v14 = vadd.f32 %v3959_v17, %v582_v9  ;;  %v1871_v63 = vadd.f32 -1.4531521, %v1839_v60  ;;  %v1746_v49 = vadd.f32 1.0, %v1714_v56  ;;  %v1011_v60 = vmul.f32 %v3987_v48, %v4109_v0 }
 0x1ae   : > { %690 = vst [vmem:[#allocation2 + $0x141] sm:$0xff] %v588_v35  ;;  %v1902_v18 = vmul.f32 %v4165_v46, %v1870_v12  ;;  %v4193_v30 = vpop.eup %3314  ;;  %v1447_v28 = vadd.f32 %v1415_v5, %v1346_v21  ;;  %v942_v9 = vadd.f32 %v910_v39, %v841_v22  ;;  %v2162_v5 = vmul.f32 %v2130_v45, %v1682_v62 }
 0x1af   : > { %689 = vst [vmem:[#allocation2 + $0x139] sm:$0xff] %v583_v14  ;;  %v3077_v3 = vpop.f32.mrb[26].mxu0  ;;  %v1903_v38 = vmul.f32 %v4173_v50, %v1871_v63  ;;  %v1840_v2 = vmul.f32 1.0614054, %v4193_v30  ;;  %v3317_v51 = vpop.eup %3316  ;;  %3322 = vrcp.f32 %v1746_v49  ;;  %v1112_v14 = vmul.f32 %v3980_v42, %v4021_v8 }
 0x1b0   : > { %v598_v40 = vadd.f32 %v3077_v3, %v3959_v17  ;;  %v592_v15 = vpop.f32.mrb[27].mxu0  ;;  %v1934_v7 = vadd.f32 1.4214138, %v1902_v18  ;;  %v3319_v1 = vpop.eup %3318  ;;  %v1548_v35 = vadd.f32 %v1516_v16, %v1447_v28  ;;  %3324 = vpow2.f32 %v2194_v33  ;;  %v4221_v28 = vld [vmem:[#allocation2 + $0x78] sm:$0xff] }
 0x1b1   : > { %v593_v55 = vadd.f32 %v3959_v17, %v592_v15  ;;  %v1935_v59 = vadd.f32 1.4214138, %v1903_v38  ;;  %v1872_v20 = vadd.f32 -1.4531521, %v1840_v2  ;;  %v1043_v62 = vadd.f32 %v1011_v60, %v942_v9 }
 0x1b2   : > { %692 = vst [vmem:[#allocation2 + $0x159] sm:$0xff] %v598_v40  ;;  %v1966_v4 = vmul.f32 %v4165_v46, %v1934_v7  ;;  %v4207_v63 = vpop.eup %3320  ;;  %v4212_v16 = vadd.f32 %v4067_v11, %v1548_v35  ;;  %3326 = vpow2.f32 %v2196_v13  ;;  %v2198_v7 = vmul.f32 1.442695, %v2162_v5 }
 0x1b3   : > { %691 = vst [vmem:[#allocation2 + $0x151] sm:$0xff] %v593_v55  ;;  %v3080_v12 = vpop.f32.mrb[28].mxu0  ;;  %v1967_v54 = vmul.f32 %v4173_v50, %v1935_v59  ;;  %v1904_v3 = vmul.f32 %v4193_v30, %v1872_v20  ;;  %v1841_v33 = vmul.f32 1.0614054, %v4207_v63  ;;  %v1144_v2 = vadd.f32 %v1112_v14, %v1043_v62 }
 0x1b4   : > { %v608_v56 = vadd.f32 %v3080_v12, %v3959_v17  ;;  %v602_v18 = vpop.f32.mrb[29].mxu0  ;;  %v1998_v21 = vadd.f32 -0.28449672, %v1966_v4  ;;  %v4218_v45 = vmul.f32 0.70710677, %v4212_v16  ;;  %vm2318_vm0 = vcmp.lt.f32.partialorder %v4095_v43, 0.0 }
 0x1b5   : > { %v603_v22 = vadd.f32 %v3959_v17, %v602_v18  ;;  %v1999_v38 = vadd.f32 -0.28449672, %v1967_v54  ;;  %v1936_v49 = vadd.f32 1.4214138, %v1904_v3  ;;  %v1873_v15 = vadd.f32 -1.4531521, %v1841_v33 }
 0x1b6   : > { %694 = vst [vmem:[#allocation2 + $0x171] sm:$0xff] %v608_v56  ;;  %v2030_v8 = vmul.f32 %v4165_v46, %v1998_v21  ;;  %v1683_v13 = vand.u32 2147483647, %v4218_v45  ;;  %v1213_v12 = vmul.f32 %v4007_v61, %v4127_v36  ;;  %vm2319_vm1 = vcmp.lt.f32.partialorder %v4103_v52, 0.0 }
 0x1b7   : > { %693 = vst [vmem:[#allocation2 + $0x169] sm:$0xff] %v603_v22  ;;  %v3083_v39 = vpop.f32.mrb[30].mxu0  ;;  %v2031_v40 = vmul.f32 %v4173_v50, %v1999_v38  ;;  %v1968_v4 = vmul.f32 %v4193_v30, %v1936_v49  ;;  %v1905_v9 = vmul.f32 %v4207_v63, %v1873_v15  ;;  %v1315_v56 = vmul.f32 %v4023_v10, %v4221_v28 }
 0x1b8   : > { %v618_v55 = vadd.f32 %v3083_v39, %v3959_v17  ;;  %v612_v59 = vpop.f32.mrb[31].mxu0  ;;  %v2062_v60 = vadd.f32 0.2548296, %v2030_v8  ;;  %v1715_v14 = vmul.f32 0.3275911, %v1683_v13  ;;  %v2131_v3 = vsub.f32 0.0, %v1683_v13 }
 0x1b9   : > { %v613_v20 = vadd.f32 %v3959_v17, %v612_v59  ;;  %v2063_v35 = vadd.f32 0.2548296, %v2031_v40  ;;  %v2000_v5 = vadd.f32 -0.28449672, %v1968_v4  ;;  %v4235_v18 = vpop.eup %3322  ;;  %v1937_v21 = vadd.f32 1.4214138, %v1905_v9 }
 0x1ba   : > { %696 = vst [vmem:[#allocation2 + $0x189] sm:$0xff] %v618_v55  ;;  %v2094_v54 = vmul.f32 %v4165_v46, %v2062_v60  ;;  %v1245_v22 = vadd.f32 %v1213_v12, %v1144_v2  ;;  %v1842_v46 = vmul.f32 1.0614054, %v4235_v18  ;;  %v1747_v62 = vadd.f32 1.0, %v1715_v14  ;;  %v3325_v8 = vpop.eup %3324  ;;  %v4243_v55 = vld [vmem:[#allocation2 + $0x7a] sm:$0xff] }
 0x1bb   : > { %695 = vst [vmem:[#allocation2 + $0x181] sm:$0xff] %v613_v20  ;;  %v2095_v17 = vmul.f32 %v4173_v50, %v2063_v35  ;;  %v2032_v33 = vmul.f32 %v4193_v30, %v2000_v5  ;;  %v1969_v39 = vmul.f32 %v4207_v63, %v1937_v21  ;;  %v1416_v15 = vmul.f32 %v3982_v44, %v4043_v37  ;;  %v774_v37 = vld [vmem:[#allocation2 + $0x51] sm:$0xff] }
 0x1bc   : > { %v2254_v38 = vmul.f32 %v3317_v51, %v2094_v54  ;;  %v1347_v40 = vadd.f32 %v1315_v56, %v1245_v22  ;;  %v1874_v60 = vadd.f32 -1.4531521, %v1842_v46  ;;  %3328 = vrcp.f32 %v1747_v62  ;;  %v3327_v20 = vpop.eup %3326 }
 0x1bd   : > { %v2255_v49 = vmul.f32 %v3319_v1, %v2095_v17  ;;  %v2064_v59 = vadd.f32 0.2548296, %v2032_v33  ;;  %v2001_v2 = vadd.f32 -0.28449672, %v1969_v39  ;;  %3330 = vpow2.f32 %v2198_v7 }
 0x1be   : > { %v2286_v50 = vsub.f32 1.0, %v2254_v38  ;;  %v1448_v4 = vadd.f32 %v1416_v15, %v1347_v40  ;;  %v1906_v9 = vmul.f32 %v4235_v18, %v1874_v60  ;;  %v1517_v12 = vmul.f32 %v4033_v25, %v4243_v55 }
 0x1bf   : > { %v2287_v51 = vsub.f32 1.0, %v2255_v49  ;;  %v2096_v1 = vmul.f32 %v4193_v30, %v2064_v59  ;;  %v2033_v5 = vmul.f32 %v4207_v63, %v2001_v2  ;;  %v2163_v14 = vmul.f32 %v2131_v3, %v1683_v13 }
 0x1c0   : > { %v2350_v35 = vsub.f32 0.0, %v2286_v50  ;;  %v741_v56 = vmul.f32 %v3961_v19, %v4061_v6  ;;  %v1938_v21 = vadd.f32 1.4214138, %v1906_v9  ;;  %v1549_v22 = vadd.f32 %v1517_v12, %v1448_v4 }
 0x1c1   : > { %v2351_v54 = vsub.f32 0.0, %v2287_v51  ;;  %v2256_v17 = vmul.f32 %v3325_v8, %v2096_v1  ;;  %v2065_v33 = vadd.f32 0.2548296, %v2033_v5  ;;  %v810_v46 = vmul.f32 %v3963_v23, %v774_v37  ;;  %v4283_v5 = vld [vmem:[#allocation2 + $0x80] sm:$0xff] }
 0x1c2   : > { %v2382_v7 = vsel %vm2318_vm0, %v2350_v35, %v2286_v50  ;;  %v1970_v13 = vmul.f32 %v4235_v18, %v1938_v21  ;;  %v4259_v3 = vadd.f32 %v4067_v11, %v1549_v22  ;;  %v911_v39 = vmul.f32 %v3969_v29, %v4081_v31 }
 0x1c3   : > { %v2414_v30 = vadd.f32 1.0, %v2382_v7  ;;  %v2383_v38 = vsel %vm2319_vm1, %v2351_v54, %v2287_v51  ;;  %v2288_v49 = vsub.f32 1.0, %v2256_v17  ;;  %v2097_v43 = vmul.f32 %v4207_v63, %v2065_v33  ;;  %v4272_v63 = vld [vmem:[#allocation2 + $0x69] sm:$0xff] }
 0x1c4   : > { %v2415_v62 = vadd.f32 1.0, %v2383_v38  ;;  %v842_v8 = vadd.f32 %v810_v46, %v741_v56  ;;  %vm2320_vm2 = vcmp.lt.f32.partialorder %v4120_v24, 0.0  ;;  %v2002_v15 = vadd.f32 -0.28449672, %v1970_v13 }
 0x1c5   : > { %v2446_v6 = vmul.f32 %v2414_v30, %v4151_v27  ;;  %v2352_v40 = vsub.f32 0.0, %v2288_v49  ;;  %v2257_v50 = vmul.f32 %v3327_v20, %v2097_v43  ;;  %v4268_v59 = vmul.f32 0.70710677, %v4259_v3  ;;  %v4294_v43 = vld [vmem:[#allocation2 + $0x82] sm:$0xff] }
 0x1c6   : > { %v2447_v52 = vmul.f32 %v2415_v62, %v4157_v58  ;;  %v943_v60 = vadd.f32 %v911_v39, %v842_v8  ;;  %v1012_v27 = vmul.f32 %v3987_v48, %v4163_v41  ;;  %v4274_v51 = vpop.eup %3328  ;;  %v1617_v58 = vmul.f32 0.5, %v4125_v32 }
 0x1c7   : > { %3116 = vmatprep.mubr.f32.mxu1 %v2446_v6  ;;  %v2384_v31 = vsel %vm2320_vm2, %v2352_v40, %v2288_v49  ;;  %v2034_v24 = vmul.f32 %v4235_v18, %v2002_v15  ;;  %v2200_v2 = vmul.f32 1.442695, %v2163_v14  ;;  %v3331_v4 = vpop.eup %3330  ;;  %v2289_v35 = vsub.f32 1.0, %v2257_v50 }
 0x1c8   : > { %3117 = vmatmul.mubr.f32.vlgmr.msra.gmra.mrb[0].mxu1 %v2447_v52  ;;  %v2416_v20 = vadd.f32 1.0, %v2384_v31  ;;  %v1843_v1 = vmul.f32 1.0614054, %v4274_v51  ;;  %v1684_v9 = vand.u32 2147483647, %v4268_v59  ;;  %vm2321_vm3 = vcmp.lt.f32.partialorder %v4139_v57, 0.0 }
 0x1c9   : > { %v2066_v12 = vadd.f32 0.2548296, %v2034_v24  ;;  %v1044_v37 = vadd.f32 %v1012_v27, %v943_v60  ;;  %v1113_v54 = vmul.f32 %v3980_v42, %v4272_v63  ;;  %v2353_v56 = vsub.f32 0.0, %v2289_v35  ;;  %v775_v57 = vld [vmem:[#allocation2 + $0x61] sm:$0xff] }
 0x1ca   : > { %v2448_v32 = vmul.f32 %v2416_v20, %v4160_v34  ;;  %v1875_v14 = vadd.f32 -1.4531521, %v1843_v1  ;;  %v1716_v7 = vmul.f32 0.3275911, %v1684_v9  ;;  %3332 = vpow2.f32 %v2200_v2  ;;  %v4292_v34 = vld [vmem:[#allocation2 + $0x81] sm:$0xff]  ;;  %v1078_v2 = vld [vmem:[#allocation2 + $0x79] sm:$0xff] }
 0x1cb   : > { %v2098_v17 = vmul.f32 %v4235_v18, %v2066_v12  ;;  %v1145_v21 = vadd.f32 %v1113_v54, %v1044_v37  ;;  %v1214_v22 = vmul.f32 %v4007_v61, %v4176_v53  ;;  %v2385_v30 = vsel %vm2321_vm3, %v2353_v56, %v2289_v35 }
 0x1cc   : > { %3119 = vmatprep.mubr.f32.mxu1 %v2448_v32  ;;  %v1907_v38 = vmul.f32 %v4274_v51, %v1875_v14  ;;  %v1748_v33 = vadd.f32 1.0, %v1716_v7  ;;  %v1316_v46 = vmul.f32 %v4023_v10, %v4283_v5  ;;  %v2417_v62 = vadd.f32 1.0, %v2385_v30 }
 0x1cd   : > { %v2258_v49 = vmul.f32 %v3331_v4, %v2098_v17  ;;  %v2132_v13 = vsub.f32 0.0, %v1684_v9  ;;  %v1246_v18 = vadd.f32 %v1214_v22, %v1145_v21  ;;  %v742_v8 = vmul.f32 %v3961_v19, %v4109_v0  ;;  %v4322_v22 = vld [vmem:[#allocation2 + $0x91] sm:$0xff] }
 0x1ce   : > { %v1939_v6 = vadd.f32 1.4214138, %v1907_v38  ;;  %3334 = vrcp.f32 %v1748_v33  ;;  %v811_v39 = vmul.f32 %v3963_v23, %v775_v57  ;;  %v2449_v52 = vmul.f32 %v2417_v62, %v1617_v58 }
 0x1cf   : > { %v2290_v40 = vsub.f32 1.0, %v2258_v49  ;;  %v1348_v15 = vadd.f32 %v1316_v46, %v1246_v18  ;;  %v1417_v50 = vmul.f32 %v3982_v44, %v4292_v34  ;;  %v912_v31 = vmul.f32 %v3969_v29, %v4127_v36  ;;  %v4328_v46 = vld [vmem:[#allocation2 + $0x92] sm:$0xff] }
 0x1d0   : > { %v1971_v60 = vmul.f32 %v4274_v51, %v1939_v6  ;;  %v843_v27 = vadd.f32 %v811_v39, %v742_v8  ;;  %v1013_v24 = vmul.f32 %v3987_v48, %v4221_v28  ;;  %3120 = vmatmul.mubr.f32.gmra.mrb[2].mxu1 %v2449_v52  ;;  %v2164_v4 = vmul.f32 %v2132_v13, %v1684_v9 }
 0x1d1   : > { %v2354_v0 = vsub.f32 0.0, %v2290_v40  ;;  %v1449_v20 = vadd.f32 %v1417_v50, %v1348_v15  ;;  %v1518_v58 = vmul.f32 %v4033_v25, %v4294_v43  ;;  %vm2322_vm4 = vcmp.lt.f32.partialorder %v4169_v47, 0.0  ;;  %v4349_v50 = vld [vmem:[#allocation2 + $0x98] sm:$0xff] }
 0x1d2   : > { %v2003_v35 = vadd.f32 -0.28449672, %v1971_v60  ;;  %v944_v1 = vadd.f32 %v912_v31, %v843_v27  ;;  %v1618_v12 = vmul.f32 0.5, %v4154_v26  ;;  %v1114_v36 = vmul.f32 %v3980_v42, %v1078_v2  ;;  %v4320_v26 = vld [vmem:[#allocation2 + $0x90] sm:$0xff] }
 0x1d3   : > { %v2386_v37 = vsel %vm2322_vm4, %v2354_v0, %v2290_v40  ;;  %v1550_v54 = vadd.f32 %v1518_v58, %v1449_v20  ;;  %v743_v9 = vmul.f32 %v3961_v19, %v4163_v41  ;;  %v4315_v17 = vmul.f32 0.5, %v4212_v16 }
 0x1d4   : > { %v2418_v32 = vadd.f32 1.0, %v2386_v37  ;;  %v2035_v56 = vmul.f32 %v4274_v51, %v2003_v35  ;;  %v1045_v14 = vadd.f32 %v1013_v24, %v944_v1  ;;  %v3333_v7 = vpop.eup %3332  ;;  %v2202_v47 = vmul.f32 1.442695, %v2164_v4 }
 0x1d5   : > { %v4318_v21 = vadd.f32 %v4067_v11, %v1550_v54  ;;  %v812_v57 = vmul.f32 %v3963_v23, %v4272_v63  ;;  %v1215_v41 = vmul.f32 %v4007_v61, %v4243_v55  ;;  %vm2323_vm5 = vcmp.lt.f32.partialorder %v4218_v45, 0.0 }
 0x1d6   : > { %v2450_v30 = vmul.f32 %v2418_v32, %v1618_v12  ;;  %v2067_v38 = vadd.f32 0.2548296, %v2035_v56  ;;  %v1146_v33 = vadd.f32 %v1114_v36, %v1045_v14  ;;  %v913_v49 = vmul.f32 %v3969_v29, %v4176_v53  ;;  %v4363_v56 = vld [vmem:[#allocation2 + $0x99] sm:$0xff] }
 0x1d7   : > { %v4332_v16 = vmul.f32 0.70710677, %v4318_v21  ;;  %v844_v62 = vadd.f32 %v812_v57, %v743_v9  ;;  %v1014_v63 = vmul.f32 %v3987_v48, %v4283_v5  ;;  %v1317_v8 = vmul.f32 %v4023_v10, %v4320_v26 }
 0x1d8   : > { %v4338_v13 = vpop.eup %3334  ;;  %3122 = vmatprep.mubr.f32.mxu1 %v2450_v30  ;;  %v2099_v18 = vmul.f32 %v4274_v51, %v2067_v38  ;;  %v1247_v6 = vadd.f32 %v1215_v41, %v1146_v33  ;;  %v1418_v39 = vmul.f32 %v3982_v44, %v4322_v22  ;;  %v1519_v53 = vmul.f32 %v4033_v25, %v4328_v46 }
 0x1d9   : > { %v1844_v52 = vmul.f32 1.0614054, %v4338_v13  ;;  %v1685_v40 = vand.u32 2147483647, %v4332_v16  ;;  %v945_v15 = vadd.f32 %v913_v49, %v844_v62  ;;  %v1115_v51 = vmul.f32 %v3980_v42, %v4292_v34 }
 0x1da   : > { %v2259_v60 = vmul.f32 %v3333_v7, %v2099_v18  ;;  %v1349_v27 = vadd.f32 %v1317_v8, %v1247_v6  ;;  %v744_v31 = vmul.f32 %v3961_v19, %v4221_v28  ;;  %v1216_v20 = vmul.f32 %v4007_v61, %v4294_v43 }
 0x1db   : > { %v1876_v24 = vadd.f32 -1.4531521, %v1844_v52  ;;  %v1717_v0 = vmul.f32 0.3275911, %v1685_v40  ;;  %v1046_v4 = vadd.f32 %v1014_v63, %v945_v15  ;;  %v1318_v1 = vmul.f32 %v4023_v10, %v4349_v50  ;;  %v4390_v15 = vld [vmem:[#allocation2 + $0xa9] sm:$0xff] }
 0x1dc   : > { %v2291_v58 = vsub.f32 1.0, %v2259_v60  ;;  %v1450_v35 = vadd.f32 %v1418_v39, %v1349_v27  ;;  %v813_v12 = vmul.f32 %v3963_v23, %v1078_v2  ;;  %v914_v19 = vmul.f32 %v3969_v29, %v4243_v55  ;;  %v4367_v23 = vld [vmem:[#allocation2 + $0x9a] sm:$0xff]  ;;  %v4385_v39 = vld [vmem:[#allocation2 + $0xa8] sm:$0xff]  ;;  %v4396_v27 = vld [vmem:[#allocation8] ss:$0 sm:$0xff] }
 0x1dd   : > { %v1908_v37 = vmul.f32 %v4338_v13, %v1876_v24  ;;  %v1749_v54 = vadd.f32 1.0, %v1717_v0  ;;  %v1147_v36 = vadd.f32 %v1115_v51, %v1046_v4  ;;  %v1015_v9 = vmul.f32 %v3987_v48, %v4320_v26 }
 0x1de   : > { %v2355_v28 = vsub.f32 0.0, %v2291_v58  ;;  %v1551_v32 = vadd.f32 %v1519_v53, %v1450_v35  ;;  %v845_v14 = vadd.f32 %v813_v12, %v744_v31  ;;  %v2133_v57 = vsub.f32 0.0, %v1685_v40  ;;  %v4413_v35 = vld [vmem:[#allocation2 + $0xaa] sm:$0xff] }
 0x1df   : > { %v1940_v7 = vadd.f32 1.4214138, %v1908_v37  ;;  %3336 = vrcp.f32 %v1749_v54  ;;  %v1248_v30 = vadd.f32 %v1216_v20, %v1147_v36  ;;  %v1419_v48 = vmul.f32 %v3982_v44, %v4363_v56 }
 0x1e0   : > { %v2387_v2 = vsel %vm2323_vm5, %v2355_v28, %v2291_v58  ;;  %3338 = vpow2.f32 %v2202_v47  ;;  %v4372_v29 = vadd.f32 %v4067_v11, %v1551_v32  ;;  %v946_v55 = vadd.f32 %v914_v19, %v845_v14  ;;  %v4409_v58 = vld [vmem:[#allocation8 + $0x7] ss:$0 sm:$0xff]  ;;  %v4421_v19 = vld [vmem:[#allocation8 + $0x2] ss:$0 sm:$0xff]  ;;  %v4425_v32 = vld [vmem:[#allocation8 + $0x3] ss:$0 sm:$0xff] }
 0x1e1   : > { %v2419_v38 = vadd.f32 1.0, %v2387_v2  ;;  %v1972_v33 = vmul.f32 %v4338_v13, %v1940_v7  ;;  %v1350_v41 = vadd.f32 %v1318_v1, %v1248_v30  ;;  %v1520_v49 = vmul.f32 %v4033_v25, %v4367_v23 }
 0x1e2   : > { %v4378_v62 = vmul.f32 0.70710677, %v4372_v29  ;;  %v1047_v45 = vadd.f32 %v1015_v9, %v946_v55  ;;  %v1116_v47 = vmul.f32 %v3980_v42, %v4322_v22  ;;  %v2165_v6 = vmul.f32 %v2133_v57, %v1685_v40 }
 0x1e3   : > { %v2451_v63 = vmul.f32 %v2419_v38, %v4315_v17  ;;  %v2004_v18 = vadd.f32 -0.28449672, %v1972_v33  ;;  %v1451_v8 = vadd.f32 %v1419_v48, %v1350_v41  ;;  %v1217_v53 = vmul.f32 %v4007_v61, %v4328_v46  ;;  %v4402_v61 = vld [vmem:[#allocation8 + $0x1] ss:$0 sm:$0xff]  ;;  %v4434_v41 = vld [vmem:[#allocation8 + $0x4] ss:$0 sm:$0xff] }
 0x1e4   : > { %v1686_v52 = vand.u32 2147483647, %v4378_v62  ;;  %v1148_v44 = vadd.f32 %v1116_v47, %v1047_v45  ;;  %v4393_v60 = vmul.f32 0.5, %v4259_v3  ;;  %v745_v40 = vmul.f32 %v4396_v27, %v4283_v5 }
 0x1e5   : > { %3123 = vmatmul.mubr.f32.gmra.mrb[4].mxu1 %v2451_v63  ;;  %v2036_v42 = vmul.f32 %v4338_v13, %v2004_v18  ;;  %v1552_v17 = vadd.f32 %v1520_v49, %v1451_v8  ;;  %v1319_v24 = vmul.f32 %v4023_v10, %v4385_v39  ;;  %v814_v0 = vmul.f32 %v4402_v61, %v4292_v34  ;;  %v4438_v18 = vld [vmem:[#allocation2 + $0xb0] sm:$0xff] }
 0x1e6   : > { %v1718_v51 = vmul.f32 0.3275911, %v1686_v52  ;;  %v1249_v31 = vadd.f32 %v1217_v53, %v1148_v44  ;;  %v2204_v4 = vmul.f32 1.442695, %v2165_v6  ;;  %v1420_v5 = vmul.f32 %v4409_v58, %v4390_v15  ;;  %v4444_v8 = vld [vmem:[#allocation8 + $0x5] ss:$0 sm:$0xff] }
 0x1e7   : > { %v2068_v3 = vadd.f32 0.2548296, %v2036_v42  ;;  %v4407_v20 = vadd.f32 %v4067_v11, %v1552_v17  ;;  %v2134_v12 = vsub.f32 0.0, %v1686_v52  ;;  %v846_v37 = vadd.f32 %v814_v0, %v745_v40  ;;  %v4448_v44 = vld [vmem:[#allocation2 + $0xb1] sm:$0xff] }
 0x1e8   : > { %v1750_v1 = vadd.f32 1.0, %v1718_v51  ;;  %v1351_v10 = vadd.f32 %v1319_v24, %v1249_v31  ;;  %v915_v28 = vmul.f32 %v4421_v19, %v4294_v43  ;;  %v1016_v14 = vmul.f32 %v4425_v32, %v4349_v50  ;;  %v4450_v51 = vld [vmem:[#allocation2 + $0xb2] sm:$0xff] }
 0x1e9   : > { %v4415_v54 = vpop.eup %3336  ;;  %v2100_v34 = vmul.f32 %v4338_v13, %v2068_v3  ;;  %v4419_v36 = vmul.f32 0.70710677, %v4407_v20  ;;  %v1521_v13 = vmul.f32 %v4033_v25, %v4413_v35  ;;  %vm2324_vm6 = vcmp.lt.f32.partialorder %v4268_v59, 0.0  ;;  %v4455_v3 = vld [vmem:[#allocation8 + $0x6] ss:$0 sm:$0xff] }
 0x1ea   : > { %v3339_v9 = vpop.eup %3338  ;;  %v1845_v7 = vmul.f32 1.0614054, %v4415_v54  ;;  %3340 = vrcp.f32 %v1750_v1  ;;  %v1452_v57 = vadd.f32 %v1420_v5, %v1351_v10  ;;  %v947_v55 = vadd.f32 %v915_v28, %v846_v37  ;;  %v4465_v28 = vld [vmem:[#allocation8 + $0x8] ss:$0 sm:$0xff] }
 0x1eb   : > { %v2260_v30 = vmul.f32 %v3339_v9, %v2100_v34  ;;  %v1687_v2 = vand.u32 2147483647, %v4419_v36  ;;  %v2166_v38 = vmul.f32 %v2134_v12, %v1686_v52  ;;  %v1117_v48 = vmul.f32 %v4434_v41, %v4363_v56 }
 0x1ec   : > { %v1877_v43 = vadd.f32 -1.4531521, %v1845_v7  ;;  %v1553_v33 = vadd.f32 %v1521_v13, %v1452_v57  ;;  %v1048_v63 = vadd.f32 %v1016_v14, %v947_v55  ;;  %3342 = vpow2.f32 %v2204_v4 }
 0x1ed   : > { %v2292_v49 = vsub.f32 1.0, %v2260_v30  ;;  %v1719_v45 = vmul.f32 0.3275911, %v1687_v2  ;;  %v2135_v47 = vsub.f32 0.0, %v1687_v2  ;;  %v1218_v52 = vmul.f32 %v4444_v8, %v4367_v23 }
 0x1ee   : > { %v1909_v25 = vmul.f32 %v4415_v54, %v1877_v43  ;;  %v4442_v6 = vadd.f32 %v4067_v11, %v1553_v33  ;;  %v1149_v40 = vadd.f32 %v1117_v48, %v1048_v63  ;;  %v2206_v24 = vmul.f32 1.442695, %v2166_v38 }
 0x1ef   : > { %v2356_v53 = vsub.f32 0.0, %v2292_v49  ;;  %v1751_v42 = vadd.f32 1.0, %v1719_v45  ;;  %v2167_v17 = vmul.f32 %v2135_v47, %v1687_v2  ;;  %v1320_v4 = vmul.f32 %v4455_v3, %v4438_v18 }
 0x1f0   : > { %v1941_v31 = vadd.f32 1.4214138, %v1909_v25  ;;  %v4453_v0 = vmul.f32 0.70710677, %v4442_v6  ;;  %v1250_v1 = vadd.f32 %v1218_v52, %v1149_v40  ;;  %v1421_v12 = vmul.f32 %v4409_v58, %v4448_v44 }
 0x1f1   : > { %v2388_v5 = vsel %vm2324_vm6, %v2356_v53, %v2292_v49  ;;  %3344 = vrcp.f32 %v1751_v42  ;;  %v1522_v14 = vmul.f32 %v4465_v28, %v4450_v51  ;;  %v2208_v9 = vmul.f32 1.442695, %v2167_v17 }
 0x1f2   : > { %v2420_v10 = vadd.f32 1.0, %v2388_v5  ;;  %v1973_v37 = vmul.f32 %v4415_v54, %v1941_v31  ;;  %v1688_v34 = vand.u32 2147483647, %v4453_v0  ;;  %v1352_v7 = vadd.f32 %v1320_v4, %v1250_v1  ;;  %v4494_v5 = vld [vmem:[#allocation2 + $0xc0] sm:$0xff] }
 0x1f3   : > { %v746_v59 = vmul.f32 %v4396_v27, %v4320_v26  ;;  %v815_v57 = vmul.f32 %v4402_v61, %v4322_v22  ;;  %v916_v49 = vmul.f32 %v4421_v19, %v4328_v46  ;;  %v1017_v22 = vmul.f32 %v4425_v32, %v4385_v39 }
 0x1f4   : > { %v4473_v13 = vpop.eup %3340  ;;  %v2452_v30 = vmul.f32 %v2420_v10, %v4393_v60  ;;  %v2005_v2 = vadd.f32 -0.28449672, %v1973_v37  ;;  %v1720_v55 = vmul.f32 0.3275911, %v1688_v34  ;;  %v2136_v43 = vsub.f32 0.0, %v1688_v34 }
 0x1f5   : > { %v1846_v38 = vmul.f32 1.0614054, %v4473_v13  ;;  %v1453_v33 = vadd.f32 %v1421_v12, %v1352_v7  ;;  %v847_v48 = vadd.f32 %v815_v57, %v746_v59  ;;  %3346 = vpow2.f32 %v2206_v24 }
 0x1f6   : > { %3125 = vmatprep.mubr.f32.mxu1 %v2452_v30  ;;  %v2037_v26 = vmul.f32 %v4415_v54, %v2005_v2  ;;  %v1752_v45 = vadd.f32 1.0, %v1720_v55  ;;  %v2168_v47 = vmul.f32 %v2136_v43, %v1688_v34  ;;  %v3343_v52 = vpop.eup %3342  ;;  %v1621_v53 = vmul.f32 0.5, %v4318_v21  ;;  %v4514_v43 = vld [vmem:[#allocation2 + $0xc2] sm:$0xff] }
 0x1f7   : > { %v1878_v63 = vadd.f32 -1.4531521, %v1846_v38  ;;  %v1554_v60 = vadd.f32 %v1522_v14, %v1453_v33  ;;  %v948_v25 = vadd.f32 %v916_v49, %v847_v48  ;;  %vm2325_vm7 = vcmp.lt.f32.partialorder %v4332_v16, 0.0  ;;  %v4504_v14 = vld [vmem:[#allocation2 + $0xc1] sm:$0xff] }
 0x1f8   : > { %v2069_v42 = vadd.f32 0.2548296, %v2037_v26  ;;  %3348 = vrcp.f32 %v1752_v45  ;;  %v1118_v31 = vmul.f32 %v4434_v41, %v4390_v15  ;;  %v4492_v4 = vmul.f32 0.5, %v4372_v29 }
 0x1f9   : > { %v1910_v46 = vmul.f32 %v4473_v13, %v1878_v63  ;;  %v4486_v17 = vadd.f32 %v4067_v11, %v1554_v60  ;;  %v1049_v40 = vadd.f32 %v1017_v22, %v948_v25  ;;  %3350 = vpow2.f32 %v2208_v9 }
 0x1fa   : > { %v2101_v24 = vmul.f32 %v4415_v54, %v2069_v42  ;;  %v2210_v21 = vmul.f32 1.442695, %v2168_v47  ;;  %v1219_v37 = vmul.f32 %v4444_v8, %v4413_v35  ;;  %v747_v29 = vmul.f32 %v4396_v27, %v4349_v50 }
 0x1fb   : > { %v4496_v1 = vpop.eup %3344  ;;  %v1942_v12 = vadd.f32 1.4214138, %v1910_v46  ;;  %v4499_v10 = vmul.f32 0.70710677, %v4486_v17  ;;  %v1150_v11 = vadd.f32 %v1118_v31, %v1049_v40  ;;  %v816_v9 = vmul.f32 %v4402_v61, %v4363_v56 }
 0x1fc   : > { %v2261_v34 = vmul.f32 %v3343_v52, %v2101_v24  ;;  %v1847_v54 = vmul.f32 1.0614054, %v4496_v1  ;;  %v1321_v30 = vmul.f32 %v4455_v3, %v4494_v5  ;;  %v917_v33 = vmul.f32 %v4421_v19, %v4367_v23 }
 0x1fd   : > { %v1974_v7 = vmul.f32 %v4473_v13, %v1942_v12  ;;  %v1689_v59 = vand.u32 2147483647, %v4499_v10  ;;  %v1251_v57 = vadd.f32 %v1219_v37, %v1150_v11  ;;  %v848_v38 = vadd.f32 %v816_v9, %v747_v29 }
 0x1fe   : > { %v2293_v2 = vsub.f32 1.0, %v2261_v34  ;;  %v1879_v55 = vadd.f32 -1.4531521, %v1847_v54  ;;  %v1422_v56 = vmul.f32 %v4409_v58, %v4504_v14  ;;  %v1018_v22 = vmul.f32 %v4425_v32, %v4438_v18 }
 0x1ff   : > { %v2006_v50 = vadd.f32 -0.28449672, %v1974_v7  ;;  %v1721_v48 = vmul.f32 0.3275911, %v1689_v59  ;;  %v1353_v49 = vadd.f32 %v1321_v30, %v1251_v57  ;;  %v949_v47 = vadd.f32 %v917_v33, %v848_v38  ;;  %v3347_v63 = vpop.eup %3346  ;;  %v4534_v57 = vld [vmem:[#allocation2 + $0xc8] sm:$0xff] }
 0x200   : > { %v2357_v26 = vsub.f32 0.0, %v2293_v2  ;;  %v1911_v45 = vmul.f32 %v4496_v1, %v1879_v55  ;;  %v1523_v23 = vmul.f32 %v4465_v28, %v4514_v43  ;;  %v1119_v24 = vmul.f32 %v4434_v41, %v4448_v44  ;;  %v4539_v38 = vld [vmem:[#allocation2 + $0xc9] sm:$0xff] }
 0x201   : > { %v2038_v60 = vmul.f32 %v4473_v13, %v2006_v50  ;;  %v1753_v25 = vadd.f32 1.0, %v1721_v48  ;;  %v1454_v52 = vadd.f32 %v1422_v56, %v1353_v49  ;;  %v1050_v31 = vadd.f32 %v1018_v22, %v949_v47  ;;  %v4545_v50 = vld [vmem:[%s5494_s4] ss:$0 sm:$0xff] }
 0x202   : > { %v4526_v42 = vpop.eup %3348  ;;  %v2389_v46 = vsel %vm2325_vm7, %v2357_v26, %v2293_v2  ;;  %v1943_v40 = vadd.f32 1.4214138, %v1911_v45  ;;  %v2137_v29 = vsub.f32 0.0, %v1689_v59  ;;  %v1220_v55 = vmul.f32 %v4444_v8, %v4450_v51  ;;  %v4553_v26 = vld [vmem:[#allocation2 + $0xca] sm:$0xff] }
 0x203   : > { %v2421_v12 = vadd.f32 1.0, %v2389_v46  ;;  %v2070_v11 = vadd.f32 0.2548296, %v2038_v60  ;;  %v1848_v37 = vmul.f32 1.0614054, %v4526_v42  ;;  %3352 = vrcp.f32 %v1753_v25  ;;  %v3351_v34 = vpop.eup %3350 }
 0x204   : > { %v1975_v54 = vmul.f32 %v4496_v1, %v1943_v40  ;;  %v1555_v9 = vadd.f32 %v1523_v23, %v1454_v52  ;;  %v1151_v7 = vadd.f32 %v1119_v24, %v1050_v31  ;;  %vm2326_vm8 = vcmp.lt.f32.partialorder %v4378_v62, 0.0 }
 0x205   : > { %v2453_v16 = vmul.f32 %v2421_v12, %v1621_v53  ;;  %v2102_v30 = vmul.f32 %v4473_v13, %v2070_v11  ;;  %v1880_v2 = vadd.f32 -1.4531521, %v1848_v37  ;;  %3354 = vpow2.f32 %v2210_v21 }
 0x206   : > { %v2007_v33 = vadd.f32 -0.28449672, %v1975_v54  ;;  %v4548_v48 = vadd.f32 %v4545_v50, %v1555_v9  ;;  %v1252_v49 = vadd.f32 %v1220_v55, %v1151_v7  ;;  %v1322_v56 = vmul.f32 %v4455_v3, %v4534_v57 }
 0x207   : > { %3126 = vmatmul.mubr.f32.gmra.mrb[6].mxu1 %v2453_v16  ;;  %v2262_v13 = vmul.f32 %v3347_v63, %v2102_v30  ;;  %v1912_v53 = vmul.f32 %v4526_v42, %v1880_v2  ;;  %v2169_v45 = vmul.f32 %v2137_v29, %v1689_v59  ;;  %v1423_v22 = vmul.f32 %v4409_v58, %v4539_v38 }
 0x208   : > { %v2039_v21 = vmul.f32 %v4496_v1, %v2007_v33  ;;  %v4557_v47 = vmul.f32 0.70710677, %v4548_v48  ;;  %v1354_v63 = vadd.f32 %v1322_v56, %v1252_v49  ;;  %v748_v52 = vmul.f32 %v4396_v27, %v4385_v39 }
 0x209   : > { %v2294_v60 = vsub.f32 1.0, %v2262_v13  ;;  %v1944_v25 = vadd.f32 1.4214138, %v1912_v53  ;;  %v1524_v40 = vmul.f32 %v4465_v28, %v4553_v26  ;;  %v817_v59 = vmul.f32 %v4402_v61, %v4390_v15 }
 0x20a   : > { %v2071_v23 = vadd.f32 0.2548296, %v2039_v21  ;;  %v1690_v46 = vand.u32 2147483647, %v4557_v47  ;;  %v1455_v12 = vadd.f32 %v1423_v22, %v1354_v63  ;;  %v918_v11 = vmul.f32 %v4421_v19, %v4413_v35 }
 0x20b   : > { %v2358_v31 = vsub.f32 0.0, %v2294_v60  ;;  %v1976_v24 = vmul.f32 %v4526_v42, %v1944_v25  ;;  %v849_v29 = vadd.f32 %v817_v59, %v748_v52  ;;  %v1019_v15 = vmul.f32 %v4425_v32, %v4494_v5 }
 0x20c   : > { %v2103_v37 = vmul.f32 %v4496_v1, %v2071_v23  ;;  %v1722_v54 = vmul.f32 0.3275911, %v1690_v46  ;;  %v2138_v39 = vsub.f32 0.0, %v1690_v46  ;;  %v1556_v30 = vadd.f32 %v1524_v40, %v1455_v12 }
 0x20d   : > { %v4572_v9 = vpop.eup %3352  ;;  %v2390_v7 = vsel %vm2326_vm8, %v2358_v31, %v2294_v60  ;;  %v2008_v16 = vadd.f32 -0.28449672, %v1976_v24  ;;  %v2212_v13 = vmul.f32 1.442695, %v2169_v45  ;;  %v950_v49 = vadd.f32 %v918_v11, %v849_v29 }
 0x20e   : > { %v2422_v2 = vadd.f32 1.0, %v2390_v7  ;;  %v2263_v55 = vmul.f32 %v3351_v34, %v2103_v37  ;;  %v1849_v33 = vmul.f32 1.0614054, %v4572_v9  ;;  %v1754_v35 = vadd.f32 1.0, %v1722_v54  ;;  %v4599_v37 = vld [vmem:[#allocation2 + $0xd9] sm:$0xff] }
 0x20f   : > { %v2040_v1 = vmul.f32 %v4526_v42, %v2008_v16  ;;  %v4581_v53 = vadd.f32 %v4545_v50, %v1556_v30  ;;  %v3355_v56 = vpop.eup %3354  ;;  %v1623_v60 = vmul.f32 0.5, %v4407_v20  ;;  %v1051_v34 = vadd.f32 %v1019_v15, %v950_v49  ;;  %v4594_v20 = vld [vmem:[#allocation2 + $0xd8] sm:$0xff] }
 0x210   : > { %v2454_v62 = vmul.f32 %v2422_v2, %v4492_v4  ;;  %v2295_v21 = vsub.f32 1.0, %v2263_v55  ;;  %v1881_v22 = vadd.f32 -1.4531521, %v1849_v33  ;;  %3356 = vrcp.f32 %v1754_v35  ;;  %v4608_v35 = vld [vmem:[#allocation2 + $0xda] sm:$0xff] }
 0x211   : > { %v2072_v25 = vadd.f32 0.2548296, %v2040_v1  ;;  %v2170_v23 = vmul.f32 %v2138_v39, %v1690_v46  ;;  %v4587_v45 = vmul.f32 0.70710677, %v4581_v53  ;;  %vm2327_vm9 = vcmp.lt.f32.partialorder %v4419_v36, 0.0 }
 0x212   : > { %3128 = vmatprep.mubr.f32.mxu1 %v2454_v62  ;;  %v2359_v63 = vsub.f32 0.0, %v2295_v21  ;;  %v1913_v52 = vmul.f32 %v4572_v9, %v1881_v22  ;;  %vm2328_vm10 = vcmp.lt.f32.partialorder %v4453_v0, 0.0  ;;  %v1120_v4 = vmul.f32 %v4434_v41, %v4504_v14 }
 0x213   : > { %v2104_v40 = vmul.f32 %v4526_v42, %v2072_v25  ;;  %3358 = vpow2.f32 %v2212_v13  ;;  %v1691_v24 = vand.u32 2147483647, %v4587_v45  ;;  %v1221_v36 = vmul.f32 %v4444_v8, %v4514_v43 }
 0x214   : > { %v2391_v59 = vsel %vm2327_vm9, %v2359_v63, %v2295_v21  ;;  %v1945_v31 = vadd.f32 1.4214138, %v1913_v52  ;;  %v1152_v11 = vadd.f32 %v1120_v4, %v1051_v34  ;;  %v2214_v54 = vmul.f32 1.442695, %v2170_v23 }
 0x215   : > { %v2423_v46 = vadd.f32 1.0, %v2391_v59  ;;  %v2264_v12 = vmul.f32 %v3355_v56, %v2104_v40  ;;  %v1723_v39 = vmul.f32 0.3275911, %v1691_v24  ;;  %v1323_v29 = vmul.f32 %v4455_v3, %v4594_v20 }
 0x216   : > { %v1977_v42 = vmul.f32 %v4572_v9, %v1945_v31  ;;  %v1253_v30 = vadd.f32 %v1221_v36, %v1152_v11  ;;  %v749_v15 = vmul.f32 %v4396_v27, %v4438_v18  ;;  %v1424_v33 = vmul.f32 %v4409_v58, %v4599_v37 }
 0x217   : > { %v2455_v7 = vmul.f32 %v2423_v46, %v1623_v60  ;;  %v2296_v16 = vsub.f32 1.0, %v2264_v12  ;;  %v1755_v55 = vadd.f32 1.0, %v1723_v39  ;;  %v818_v1 = vmul.f32 %v4402_v61, %v4448_v44 }
 0x218   : > { %v2009_v2 = vadd.f32 -0.28449672, %v1977_v42  ;;  %v2139_v49 = vsub.f32 0.0, %v1691_v24  ;;  %v1355_v56 = vadd.f32 %v1323_v29, %v1253_v30  ;;  %v919_v62 = vmul.f32 %v4421_v19, %v4450_v51  ;;  %v4629_v42 = vld [vmem:[#allocation2 + $0xe0] sm:$0xff] }
 0x219   : > { %3129 = vmatmul.mubr.f32.gmra.mrb[8].mxu1 %v2455_v7  ;;  %v2360_v13 = vsub.f32 0.0, %v2296_v16  ;;  %3360 = vrcp.f32 %v1755_v55  ;;  %v850_v22 = vadd.f32 %v818_v1, %v749_v15  ;;  %v1020_v60 = vmul.f32 %v4425_v32, %v4534_v57  ;;  %v4650_v1 = vld [vmem:[#allocation2 + $0xe2] sm:$0xff] }
 0x21a   : > { %v4614_v21 = vpop.eup %3356  ;;  %v2041_v18 = vmul.f32 %v4572_v9, %v2009_v2  ;;  %v1456_v34 = vadd.f32 %v1424_v33, %v1355_v56  ;;  %v1525_v63 = vmul.f32 %v4465_v28, %v4608_v35  ;;  %v1624_v51 = vmul.f32 0.5, %v4442_v6  ;;  %v4646_v2 = vld [vmem:[#allocation2 + $0xe1] sm:$0xff] }
 0x21b   : > { %v2392_v25 = vsel %vm2328_vm10, %v2360_v13, %v2296_v16  ;;  %v1850_v44 = vmul.f32 1.0614054, %v4614_v21  ;;  %v951_v40 = vadd.f32 %v919_v62, %v850_v22  ;;  %v1625_v4 = vmul.f32 0.5, %v4486_v17 }
 0x21c   : > { %v2424_v52 = vadd.f32 1.0, %v2392_v25  ;;  %v2073_v23 = vadd.f32 0.2548296, %v2041_v18  ;;  %3362 = vpow2.f32 %v2214_v54  ;;  %v1557_v31 = vadd.f32 %v1525_v63, %v1456_v34 }
 0x21d   : > { %v1882_v59 = vadd.f32 -1.4531521, %v1850_v44  ;;  %v3359_v46 = vpop.eup %3358  ;;  %v1052_v11 = vadd.f32 %v1020_v60, %v951_v40  ;;  %v1121_v36 = vmul.f32 %v4434_v41, %v4539_v38  ;;  %v2171_v39 = vmul.f32 %v2139_v49, %v1691_v24  ;;  %v4661_v44 = vld [vmem:[#allocation2 + $0xf0] sm:$0xff] }
 0x21e   : > { %v2456_v12 = vmul.f32 %v2424_v52, %v1624_v51  ;;  %v2105_v0 = vmul.f32 %v4572_v9, %v2073_v23  ;;  %v4633_v29 = vadd.f32 %v4545_v50, %v1557_v31  ;;  %v750_v17 = vmul.f32 %v4396_v27, %v4494_v5 }
 0x21f   : > { %v1914_v6 = vmul.f32 %v4614_v21, %v1882_v59  ;;  %v1153_v7 = vadd.f32 %v1121_v36, %v1052_v11  ;;  %v1222_v9 = vmul.f32 %v4444_v8, %v4553_v26  ;;  %v819_v16 = vmul.f32 %v4402_v61, %v4504_v14 }
 0x220   : > { %3131 = vmatprep.mubr.f32.mxu1 %v2456_v12  ;;  %v2265_v54 = vmul.f32 %v3359_v46, %v2105_v0  ;;  %v4642_v15 = vmul.f32 0.70710677, %v4633_v29  ;;  %v1324_v24 = vmul.f32 %v4455_v3, %v4629_v42  ;;  %v920_v5 = vmul.f32 %v4421_v19, %v4514_v43 }
 0x221   : > { %v1946_v30 = vadd.f32 1.4214138, %v1914_v6  ;;  %v1254_v33 = vadd.f32 %v1222_v9, %v1153_v7  ;;  %v851_v13 = vadd.f32 %v819_v16, %v750_v17  ;;  %v1021_v14 = vmul.f32 %v4425_v32, %v4594_v20  ;;  %v4674_v16 = vld [vmem:[#allocation2 + $0xf1] sm:$0xff] }
 0x222   : > { %v2297_v55 = vsub.f32 1.0, %v2265_v54  ;;  %vm2329_vm11 = vcmp.lt.f32.partialorder %v4499_v10, 0.0  ;;  %v2216_v56 = vmul.f32 1.442695, %v2171_v39  ;;  %v1692_v62 = vand.u32 2147483647, %v4642_v15 }
 0x223   : > { %v1978_v49 = vmul.f32 %v4614_v21, %v1946_v30  ;;  %v4657_v18 = vpop.eup %3360  ;;  %v1356_v60 = vadd.f32 %v1324_v24, %v1254_v33  ;;  %v1425_v43 = vmul.f32 %v4409_v58, %v4646_v2  ;;  %v952_v25 = vadd.f32 %v920_v5, %v851_v13 }
 0x224   : > { %v2361_v22 = vsub.f32 0.0, %v2297_v55  ;;  %v1851_v63 = vmul.f32 1.0614054, %v4657_v18  ;;  %v1724_v51 = vmul.f32 0.3275911, %v1692_v62  ;;  %v1526_v10 = vmul.f32 %v4465_v28, %v4650_v1 }
 0x225   : > { %v2010_v34 = vadd.f32 -0.28449672, %v1978_v49  ;;  %v1457_v23 = vadd.f32 %v1425_v43, %v1356_v60  ;;  %v1053_v40 = vadd.f32 %v1021_v14, %v952_v25  ;;  %v1122_v59 = vmul.f32 %v4434_v41, %v4599_v37 }
 0x226   : > { %v2393_v52 = vsel %vm2329_vm11, %v2361_v22, %v2297_v55  ;;  %v3363_v31 = vpop.eup %3362  ;;  %v1883_v0 = vadd.f32 -1.4531521, %v1851_v63  ;;  %v1756_v11 = vadd.f32 1.0, %v1724_v51  ;;  %v1223_v39 = vmul.f32 %v4444_v8, %v4608_v35 }
 0x227   : > { %v2425_v46 = vadd.f32 1.0, %v2393_v52  ;;  %v2042_v12 = vmul.f32 %v4614_v21, %v2010_v34  ;;  %v1558_v36 = vadd.f32 %v1526_v10, %v1457_v23  ;;  %v1154_v6 = vadd.f32 %v1122_v59, %v1053_v40 }
 0x228   : > { %v1325_v17 = vmul.f32 %v4455_v3, %v4661_v44  ;;  %v1915_v9 = vmul.f32 %v4657_v18, %v1883_v0  ;;  %3364 = vrcp.f32 %v1756_v11  ;;  %v2140_v30 = vsub.f32 0.0, %v1692_v62 }
 0x229   : > { %v2457_v54 = vmul.f32 %v2425_v46, %v1625_v4  ;;  %v2074_v7 = vadd.f32 0.2548296, %v2042_v12  ;;  %v4677_v24 = vadd.f32 %v4545_v50, %v1558_v36  ;;  %v1255_v5 = vadd.f32 %v1223_v39, %v1154_v6  ;;  %v4682_v4 = vld [vmem:[#allocation2 + $0xf2] sm:$0xff] }
 0x22a   : > { %v751_v55 = vmul.f32 %v4396_v27, %v4534_v57  ;;  %v1947_v13 = vadd.f32 1.4214138, %v1915_v9  ;;  %3366 = vpow2.f32 %v2216_v56  ;;  %v820_v14 = vmul.f32 %v4402_v61, %v4539_v38 }
 0x22b   : > { %3132 = vmatmul.mubr.f32.gmra.mrb[10].mxu1 %v2457_v54  ;;  %v2106_v33 = vmul.f32 %v4614_v21, %v2074_v7  ;;  %v4687_v49 = vmul.f32 0.70710677, %v4677_v24  ;;  %v1357_v22 = vadd.f32 %v1325_v17, %v1255_v5  ;;  %v1426_v60 = vmul.f32 %v4409_v58, %v4674_v16 }
 0x22c   : > { %v921_v57 = vmul.f32 %v4421_v19, %v4553_v26  ;;  %v1979_v21 = vmul.f32 %v4657_v18, %v1947_v13  ;;  %v852_v25 = vadd.f32 %v820_v14, %v751_v55  ;;  %v1022_v56 = vmul.f32 %v4425_v32, %v4629_v42 }
 0x22d   : > { %v2266_v43 = vmul.f32 %v3363_v31, %v2106_v33  ;;  %v2172_v34 = vmul.f32 %v2140_v30, %v1692_v62  ;;  %v1693_v38 = vand.u32 2147483647, %v4687_v49  ;;  %v1458_v63 = vadd.f32 %v1426_v60, %v1357_v22  ;;  %v4718_v30 = vld [vmem:[#allocation2 + $0xf9] sm:$0xff] }
 0x22e   : > { %v1527_v51 = vmul.f32 %v4465_v28, %v4682_v4  ;;  %v2011_v52 = vadd.f32 -0.28449672, %v1979_v21  ;;  %v953_v23 = vadd.f32 %v921_v57, %v852_v25  ;;  %v1626_v40 = vmul.f32 0.5, %v4548_v48  ;;  %v4710_v48 = vld [vmem:[#allocation2 + $0xf8] sm:$0xff] }
 0x22f   : > { %v2298_v10 = vsub.f32 1.0, %v2266_v43  ;;  %vm2330_vm12 = vcmp.lt.f32.partialorder %v4557_v47, 0.0  ;;  %v1725_v26 = vmul.f32 0.3275911, %v1693_v38  ;;  %v1123_v62 = vmul.f32 %v4434_v41, %v4646_v2  ;;  %v4728_v21 = vld [vmem:[#allocation2 + $0xfa] sm:$0xff] }
 0x230   : > { %v1559_v59 = vadd.f32 %v1527_v51, %v1458_v63  ;;  %v2043_v46 = vmul.f32 %v4657_v18, %v2011_v52  ;;  %v1054_v12 = vadd.f32 %v1022_v56, %v953_v23  ;;  %v4705_v0 = vmul.f32 0.5, %v4581_v53 }
 0x231   : > { %v2362_v31 = vsub.f32 0.0, %v2298_v10  ;;  %v2218_v11 = vmul.f32 1.442695, %v2172_v34  ;;  %v1757_v36 = vadd.f32 1.0, %v1725_v26  ;;  %v1224_v7 = vmul.f32 %v4444_v8, %v4650_v1 }
 0x232   : > { %v4708_v6 = vadd.f32 %v4545_v50, %v1559_v59  ;;  %v4712_v47 = vpop.eup %3364  ;;  %v2075_v17 = vadd.f32 0.2548296, %v2043_v46  ;;  %v1155_v54 = vadd.f32 %v1123_v62, %v1054_v12  ;;  %vm2331_vm13 = vcmp.lt.f32.partialorder %v4587_v45, 0.0 }
 0x233   : > { %v2394_v39 = vsel %vm2330_vm12, %v2362_v31, %v2298_v10  ;;  %v1852_v53 = vmul.f32 1.0614054, %v4712_v47  ;;  %3368 = vrcp.f32 %v1757_v36  ;;  %v752_v5 = vmul.f32 %v4396_v27, %v4594_v20 }
 0x234   : > { %v2426_v9 = vadd.f32 1.0, %v2394_v39  ;;  %v3367_v55 = vpop.eup %3366  ;;  %v2107_v33 = vmul.f32 %v4657_v18, %v2075_v17  ;;  %v4724_v13 = vmul.f32 0.70710677, %v4708_v6  ;;  %v1256_v14 = vadd.f32 %v1224_v7, %v1155_v54 }
 0x235   : > { %v1326_v22 = vmul.f32 %v4455_v3, %v4710_v48  ;;  %v1884_v57 = vadd.f32 -1.4531521, %v1852_v53  ;;  %v2141_v43 = vsub.f32 0.0, %v1693_v38  ;;  %v821_v25 = vmul.f32 %v4402_v61, %v4599_v37 }
 0x236   : > { %v2458_v60 = vmul.f32 %v2426_v9, %v1626_v40  ;;  %v2267_v56 = vmul.f32 %v3367_v55, %v2107_v33  ;;  %v1694_v20 = vand.u32 2147483647, %v4724_v13  ;;  %v1427_v18 = vmul.f32 %v4409_v58, %v4718_v30  ;;  %v4748_v9 = vld [vmem:[#allocation2 + $0x108] sm:$0xff] }
 0x237   : > { %v1358_v34 = vadd.f32 %v1326_v22, %v1256_v14  ;;  %v1916_v63 = vmul.f32 %v4712_v47, %v1884_v57  ;;  %v853_v51 = vadd.f32 %v821_v25, %v752_v5  ;;  %v922_v10 = vmul.f32 %v4421_v19, %v4608_v35  ;;  %v4759_v22 = vld [vmem:[#allocation2 + $0x109] sm:$0xff] }
 0x238   : > { %3134 = vmatprep.mubr.f32.mxu1 %v2458_v60  ;;  %v1023_v52 = vmul.f32 %v4425_v32, %v4661_v44  ;;  %v2299_v23 = vsub.f32 1.0, %v2267_v56  ;;  %v1726_v40 = vmul.f32 0.3275911, %v1694_v20  ;;  %v1528_v26 = vmul.f32 %v4465_v28, %v4728_v21 }
 0x239   : > { %v1459_v37 = vadd.f32 %v1427_v18, %v1358_v34  ;;  %v1948_v59 = vadd.f32 1.4214138, %v1916_v63  ;;  %3370 = vpow2.f32 %v2218_v11  ;;  %v2142_v31 = vsub.f32 0.0, %v1694_v20 }
 0x23a   : > { %v954_v46 = vadd.f32 %v922_v10, %v853_v51  ;;  %v2363_v12 = vsub.f32 0.0, %v2299_v23  ;;  %v2173_v62 = vmul.f32 %v2141_v43, %v1693_v38  ;;  %v1758_v36 = vadd.f32 1.0, %v1726_v40  ;;  %v4774_v10 = vld [vmem:[#allocation2 + $0x10a] sm:$0xff] }
 0x23b   : > { %v1560_v39 = vadd.f32 %v1528_v26, %v1459_v37  ;;  %v4743_v17 = vmul.f32 0.5, %v4633_v29  ;;  %v1980_v35 = vmul.f32 %v4712_v47, %v1948_v59  ;;  %v1124_v7 = vmul.f32 %v4434_v41, %v4674_v16 }
 0x23c   : > { %v1055_v54 = vadd.f32 %v1023_v52, %v954_v46  ;;  %v2395_v11 = vsel %vm2331_vm13, %v2363_v12, %v2299_v23  ;;  %3372 = vrcp.f32 %v1758_v36  ;;  %v1225_v38 = vmul.f32 %v4444_v8, %v4682_v4 }
 0x23d   : > { %v4753_v53 = vadd.f32 %v4545_v50, %v1560_v39  ;;  %v4757_v29 = vpop.eup %3368  ;;  %v2427_v5 = vadd.f32 1.0, %v2395_v11  ;;  %v2012_v55 = vadd.f32 -0.28449672, %v1980_v35  ;;  %v2174_v33 = vmul.f32 %v2142_v31, %v1694_v20 }
 0x23e   : > { %v1156_v14 = vadd.f32 %v1124_v7, %v1055_v54  ;;  %v1853_v60 = vmul.f32 1.0614054, %v4757_v29  ;;  %v2220_v57 = vmul.f32 1.442695, %v2173_v62  ;;  %v1327_v43 = vmul.f32 %v4455_v3, %v4748_v9 }
 0x23f   : > { %v4763_v45 = vmul.f32 0.70710677, %v4753_v53  ;;  %v2459_v25 = vmul.f32 %v2427_v5, %v4705_v0  ;;  %v2044_v56 = vmul.f32 %v4712_v47, %v2012_v55  ;;  %v753_v20 = vmul.f32 %v4396_v27, %v4629_v42  ;;  %v4792_v55 = vld [vmem:[#allocation2 + $0x110] sm:$0xff] }
 0x240   : > { %v1257_v34 = vadd.f32 %v1225_v38, %v1156_v14  ;;  %v1885_v18 = vadd.f32 -1.4531521, %v1853_v60  ;;  %v1428_v51 = vmul.f32 %v4409_v58, %v4759_v22  ;;  %v822_v52 = vmul.f32 %v4402_v61, %v4646_v2 }
 0x241   : > { %v1695_v63 = vand.u32 2147483647, %v4763_v45  ;;  %3135 = vmatmul.mubr.f32.gmra.mrb[12].mxu1 %v2459_v25  ;;  %v2076_v23 = vadd.f32 0.2548296, %v2044_v56  ;;  %v2222_v0 = vmul.f32 1.442695, %v2174_v33  ;;  %v923_v37 = vmul.f32 %v4421_v19, %v4650_v1 }
 0x242   : > { %v1359_v40 = vadd.f32 %v1327_v43, %v1257_v34  ;;  %v1917_v42 = vmul.f32 %v4757_v29, %v1885_v18  ;;  %v854_v59 = vadd.f32 %v822_v52, %v753_v20  ;;  %v1024_v31 = vmul.f32 %v4425_v32, %v4710_v48  ;;  %v4800_v43 = vld [vmem:[#allocation2 + $0x111] sm:$0xff] }
 0x243   : > { %v1727_v26 = vmul.f32 0.3275911, %v1695_v63  ;;  %v3371_v46 = vpop.eup %3370  ;;  %v2108_v12 = vmul.f32 %v4712_v47, %v2076_v23  ;;  %3374 = vpow2.f32 %v2220_v57  ;;  %v1529_v2 = vmul.f32 %v4465_v28, %v4774_v10 }
 0x244   : > { %v1460_v62 = vadd.f32 %v1428_v51, %v1359_v40  ;;  %v1949_v36 = vadd.f32 1.4214138, %v1917_v42  ;;  %v2143_v35 = vsub.f32 0.0, %v1695_v63  ;;  %v955_v54 = vadd.f32 %v923_v37, %v854_v59  ;;  %v4812_v42 = vld [vmem:[#allocation2 + $0x112] sm:$0xff] }
 0x245   : > { %v1759_v39 = vadd.f32 1.0, %v1727_v26  ;;  %v2268_v1 = vmul.f32 %v3371_v46, %v2108_v12  ;;  %vm2332_vm14 = vcmp.lt.f32.partialorder %v4642_v15, 0.0  ;;  %3376 = vpow2.f32 %v2222_v0 }
 0x246   : > { %v1561_v7 = vadd.f32 %v1529_v2, %v1460_v62  ;;  %v4787_v11 = vpop.eup %3372  ;;  %v1981_v38 = vmul.f32 %v4757_v29, %v1949_v36  ;;  %v1056_v47 = vadd.f32 %v1024_v31, %v955_v54  ;;  %v1125_v5 = vmul.f32 %v4434_v41, %v4718_v30 }
 0x247   : > { %3378 = vrcp.f32 %v1759_v39  ;;  %v2300_v33 = vsub.f32 1.0, %v2268_v1  ;;  %v1854_v14 = vmul.f32 1.0614054, %v4787_v11  ;;  %v1226_v57 = vmul.f32 %v4444_v8, %v4728_v21 }
 0x248   : > { %v4796_v60 = vadd.f32 %v4545_v50, %v1561_v7  ;;  %v2013_v25 = vadd.f32 -0.28449672, %v1981_v38  ;;  %v2175_v56 = vmul.f32 %v2143_v35, %v1695_v63  ;;  %v1157_v34 = vadd.f32 %v1125_v5, %v1056_v47 }
 0x249   : > { %v754_v20 = vmul.f32 %v4396_v27, %v4661_v44  ;;  %v2364_v18 = vsub.f32 0.0, %v2300_v33  ;;  %v1886_v51 = vadd.f32 -1.4531521, %v1854_v14  ;;  %v1328_v23 = vmul.f32 %v4455_v3, %v4792_v55 }
 0x24a   : > { %v4805_v52 = vmul.f32 0.70710677, %v4796_v60  ;;  %v2045_v0 = vmul.f32 %v4757_v29, %v2013_v25  ;;  %v1258_v40 = vadd.f32 %v1226_v57, %v1157_v34  ;;  %v1429_v37 = vmul.f32 %v4409_v58, %v4800_v43 }
 0x24b   : > { %v823_v63 = vmul.f32 %v4402_v61, %v4674_v16  ;;  %v2396_v27 = vsel %vm2332_vm14, %v2364_v18, %v2300_v33  ;;  %v1918_v44 = vmul.f32 %v4787_v11, %v1886_v51  ;;  %v924_v59 = vmul.f32 %v4421_v19, %v4682_v4 }
 0x24c   : > { %v1696_v26 = vand.u32 2147483647, %v4805_v52  ;;  %v2428_v31 = vadd.f32 1.0, %v2396_v27  ;;  %v2077_v46 = vadd.f32 0.2548296, %v2045_v0  ;;  %v1360_v12 = vadd.f32 %v1328_v23, %v1258_v40  ;;  %v4844_v0 = vld [vmem:[#allocation2 + $0x121] sm:$0xff] }
 0x24d   : > { %v855_v62 = vadd.f32 %v823_v63, %v754_v20  ;;  %v3375_v2 = vpop.eup %3374  ;;  %v1950_v36 = vadd.f32 1.4214138, %v1918_v44  ;;  %v1530_v61 = vmul.f32 %v4465_v28, %v4812_v42  ;;  %v1025_v15 = vmul.f32 %v4425_v32, %v4748_v9  ;;  %v4835_v20 = vld [vmem:[#allocation2 + $0x120] sm:$0xff] }
 0x24e   : > { %v1728_v39 = vmul.f32 0.3275911, %v1696_v26  ;;  %v2460_v16 = vmul.f32 %v2428_v31, %v4743_v17  ;;  %v2109_v35 = vmul.f32 %v4757_v29, %v2077_v46  ;;  %v1461_v54 = vadd.f32 %v1429_v37, %v1360_v12  ;;  %v4852_v31 = vld [vmem:[#allocation2 + $0x122] sm:$0xff] }
 0x24f   : > { %v956_v1 = vadd.f32 %v924_v59, %v855_v62  ;;  %v3377_v4 = vpop.eup %3376  ;;  %v1629_v7 = vmul.f32 0.5, %v4677_v24  ;;  %v1982_v38 = vmul.f32 %v4787_v11, %v1950_v36  ;;  %v2224_v47 = vmul.f32 1.442695, %v2175_v56 }
 0x250   : > { %v1760_v5 = vadd.f32 1.0, %v1728_v39  ;;  %3137 = vmatprep.mubr.f32.mxu1 %v2460_v16  ;;  %v2269_v14 = vmul.f32 %v3375_v2, %v2109_v35  ;;  %v1562_v57 = vadd.f32 %v1530_v61, %v1461_v54  ;;  %v1126_v32 = vmul.f32 %v4434_v41, %v4759_v22 }
 0x251   : > { %v4830_v33 = vpop.eup %3378  ;;  %v1057_v25 = vadd.f32 %v1025_v15, %v956_v1  ;;  %v2014_v17 = vadd.f32 -0.28449672, %v1982_v38  ;;  %v2144_v34 = vsub.f32 0.0, %v1696_v26  ;;  %v1227_v51 = vmul.f32 %v4444_v8, %v4774_v10  ;;  %v4862_v15 = vld [vmem:[#allocation8 + $0x1] ss:$0 sm:$0xff] }
 0x252   : > { %v1855_v29 = vmul.f32 1.0614054, %v4830_v33  ;;  %3380 = vrcp.f32 %v1760_v5  ;;  %v2301_v24 = vsub.f32 1.0, %v2269_v14  ;;  %v4838_v56 = vadd.f32 %v4545_v50, %v1562_v57  ;;  %v4871_v57 = vld [vmem:[#allocation8 + $0x3] ss:$0 sm:$0xff] }
 0x253   : > { %v1158_v18 = vadd.f32 %v1126_v32, %v1057_v25  ;;  %vm2333_vm15 = vcmp.lt.f32.partialorder %v4687_v49, 0.0  ;;  %v2046_v23 = vmul.f32 %v4787_v11, %v2014_v17  ;;  %3382 = vpow2.f32 %v2224_v47  ;;  %v4854_v49 = vld [vmem:[#allocation8] ss:$0 sm:$0xff] }
 0x254   : > { %v1887_v41 = vadd.f32 -1.4531521, %v1855_v29  ;;  %v2365_v40 = vsub.f32 0.0, %v2301_v24  ;;  %v4847_v37 = vmul.f32 0.70710677, %v4838_v56  ;;  %v1329_v27 = vmul.f32 %v4455_v3, %v4835_v20 }
 0x255   : > { %v1259_v63 = vadd.f32 %v1227_v51, %v1158_v18  ;;  %v2078_v44 = vadd.f32 0.2548296, %v2046_v23  ;;  %v2176_v8 = vmul.f32 %v2144_v34, %v1696_v26  ;;  %v755_v46 = vmul.f32 %v4854_v49, %v4710_v48  ;;  %v4883_v51 = vld [vmem:[#allocation8 + $0x4] ss:$0 sm:$0xff]  ;;  %v4887_v23 = vld [vmem:[#allocation2 + $0x129] sm:$0xff] }
 0x256   : > { %v1919_v59 = vmul.f32 %v4830_v33, %v1887_v41  ;;  %v2397_v12 = vsel %vm2333_vm15, %v2365_v40, %v2301_v24  ;;  %v1697_v62 = vand.u32 2147483647, %v4847_v37  ;;  %v1430_v36 = vmul.f32 %v4409_v58, %v4844_v0 }
 0x257   : > { %v1361_v2 = vadd.f32 %v1329_v27, %v1259_v63  ;;  %v2429_v39 = vadd.f32 1.0, %v2397_v12  ;;  %v2110_v3 = vmul.f32 %v4787_v11, %v2078_v44  ;;  %v824_v26 = vmul.f32 %v4862_v15, %v4718_v30  ;;  %v4893_v63 = vld [vmem:[#allocation2 + $0x128] sm:$0xff] }
 0x258   : > { %v1951_v61 = vadd.f32 1.4214138, %v1919_v59  ;;  %v1729_v16 = vmul.f32 0.3275911, %v1697_v62  ;;  %v1531_v48 = vmul.f32 %v4465_v28, %v4852_v31  ;;  %v925_v54 = vmul.f32 %v4421_v19, %v4728_v21 }
 0x259   : > { %v1462_v35 = vadd.f32 %v1430_v36, %v1361_v2  ;;  %v2461_v1 = vmul.f32 %v2429_v39, %v1629_v7  ;;  %v2270_v38 = vmul.f32 %v3377_v4, %v2110_v3  ;;  %v856_v47 = vadd.f32 %v824_v26, %v755_v46 }
 0x25a   : > { %v1983_v58 = vmul.f32 %v4830_v33, %v1951_v61  ;;  %v2226_v11 = vmul.f32 1.442695, %v2176_v8  ;;  %v1761_v5 = vadd.f32 1.0, %v1729_v16  ;;  %v1026_v30 = vmul.f32 %v4871_v57, %v4792_v55  ;;  %v4895_v8 = vld [vmem:[#allocation8 + $0x5] ss:$0 sm:$0xff] }
 0x25b   : > { %v1563_v14 = vadd.f32 %v1531_v48, %v1462_v35  ;;  %3138 = vmatmul.mubr.f32.gmra.mrb[14].mxu1 %v2461_v1  ;;  %v1630_v28 = vmul.f32 0.5, %v4708_v6  ;;  %v2302_v32 = vsub.f32 1.0, %v2270_v38  ;;  %v957_v21 = vadd.f32 %v925_v54, %v856_v47  ;;  %v4902_v61 = vld [vmem:[#allocation8 + $0x6] ss:$0 sm:$0xff]  ;;  %v4906_v16 = vld [vmem:[#allocation8 + $0x7] ss:$0 sm:$0xff] }
 0x25c   : > { %v4875_v25 = vpop.eup %3380  ;;  %v2015_v19 = vadd.f32 -0.28449672, %v1983_v58  ;;  %3384 = vrcp.f32 %v1761_v5  ;;  %v2145_v7 = vsub.f32 0.0, %v1697_v62  ;;  %v1127_v6 = vmul.f32 %v4883_v51, %v4800_v43  ;;  %v4910_v48 = vld [vmem:[#allocation2 + $0x12a] sm:$0xff] }
 0x25d   : > { %v1856_v4 = vmul.f32 1.0614054, %v4875_v25  ;;  %v4880_v17 = vadd.f32 %v4545_v50, %v1563_v14  ;;  %v3383_v29 = vpop.eup %3382  ;;  %v2366_v34 = vsub.f32 0.0, %v2302_v32  ;;  %v1058_v18 = vadd.f32 %v1026_v30, %v957_v21  ;;  %v4917_v30 = vld [vmem:[#allocation8 + $0x8] ss:$0 sm:$0xff] }
 0x25e   : > { %v2047_v24 = vmul.f32 %v4830_v33, %v2015_v19  ;;  %vm2334_vm0 = vcmp.lt.f32.partialorder %v4724_v13, 0.0  ;;  %3386 = vpow2.f32 %v2226_v11  ;;  %v1228_v46 = vmul.f32 %v4895_v8, %v4812_v42 }
 0x25f   : > { %v1888_v41 = vadd.f32 -1.4531521, %v1856_v4  ;;  %v4891_v40 = vmul.f32 0.70710677, %v4880_v17  ;;  %v2398_v27 = vsel %vm2334_vm0, %v2366_v34, %v2302_v32  ;;  %v1159_v59 = vadd.f32 %v1127_v6, %v1058_v18  ;;  %v4921_v32 = vld [vmem:[#allocation8 + $0x2] ss:$0 sm:$0xff] }
 0x260   : > { %v2079_v44 = vadd.f32 0.2548296, %v2047_v24  ;;  %v2430_v12 = vadd.f32 1.0, %v2398_v27  ;;  %v2177_v36 = vmul.f32 %v2145_v7, %v1697_v62  ;;  %v1330_v26 = vmul.f32 %v4902_v61, %v4893_v63 }
 0x261   : > { %v1920_v2 = vmul.f32 %v4875_v25, %v1888_v41  ;;  %v1698_v13 = vand.u32 2147483647, %v4891_v40  ;;  %v1260_v3 = vadd.f32 %v1228_v46, %v1159_v59  ;;  %v1431_v35 = vmul.f32 %v4906_v16, %v4887_v23 }
 0x262   : > { %v2111_v39 = vmul.f32 %v4830_v33, %v2079_v44  ;;  %v2462_v54 = vmul.f32 %v2430_v12, %v1630_v28  ;;  %v756_v33 = vmul.f32 %v4854_v49, %v4748_v9  ;;  %v825_v11 = vmul.f32 %v4862_v15, %v4759_v22 }
 0x263   : > { %v1952_v1 = vadd.f32 1.4214138, %v1920_v2  ;;  %v1730_v62 = vmul.f32 0.3275911, %v1698_v13  ;;  %v2146_v38 = vsub.f32 0.0, %v1698_v13  ;;  %v1362_v47 = vadd.f32 %v1330_v26, %v1260_v3 }
 0x264   : > { %v2271_v58 = vmul.f32 %v3383_v29, %v2111_v39  ;;  %3140 = vmatprep.mubr.f32.mxu1 %v2462_v54  ;;  %v1532_v28 = vmul.f32 %v4917_v30, %v4910_v48  ;;  %v926_v19 = vmul.f32 %v4921_v32, %v4774_v10  ;;  %v857_v9 = vadd.f32 %v825_v11, %v756_v33 }
 0x265   : > { %v1984_v5 = vmul.f32 %v4875_v25, %v1952_v1  ;;  %v1762_v14 = vadd.f32 1.0, %v1730_v62  ;;  %v1463_v4 = vadd.f32 %v1431_v35, %v1362_v47  ;;  %v1027_v22 = vmul.f32 %v4871_v57, %v4835_v20  ;;  %v4938_v35 = vld [vmem:[#allocation2 + $0x138] sm:$0xff] }
 0x266   : > { %v2303_v21 = vsub.f32 1.0, %v2271_v58  ;;  %v4927_v7 = vpop.eup %3384  ;;  %v2228_v34 = vmul.f32 1.442695, %v2177_v36  ;;  %v2178_v24 = vmul.f32 %v2146_v38, %v1698_v13  ;;  %v958_v27 = vadd.f32 %v926_v19, %v857_v9 }
 0x267   : > { %v2016_v29 = vadd.f32 -0.28449672, %v1984_v5  ;;  %3388 = vrcp.f32 %v1762_v14  ;;  %v1857_v6 = vmul.f32 1.0614054, %v4927_v7  ;;  %v1564_v41 = vadd.f32 %v1532_v28, %v1463_v4  ;;  %v4954_v28 = vld [vmem:[#allocation2 + $0x139] sm:$0xff] }
 0x268   : > { %v2367_v18 = vsub.f32 0.0, %v2303_v21  ;;  %v3387_v44 = vpop.eup %3386  ;;  %v1631_v10 = vmul.f32 0.5, %v4753_v53  ;;  %vm2335_vm1 = vcmp.lt.f32.partialorder %v4763_v45, 0.0  ;;  %v1128_v46 = vmul.f32 %v4883_v51, %v4844_v0 }
 0x269   : > { %v2048_v59 = vmul.f32 %v4875_v25, %v2016_v29  ;;  %v1889_v2 = vadd.f32 -1.4531521, %v1857_v6  ;;  %v4936_v36 = vadd.f32 %v4545_v50, %v1564_v41  ;;  %v1059_v13 = vadd.f32 %v1027_v22, %v958_v27 }
 0x26a   : > { %v2399_v12 = vsel %vm2335_vm1, %v2367_v18, %v2303_v21  ;;  %3390 = vpow2.f32 %v2228_v34  ;;  %v2230_v26 = vmul.f32 1.442695, %v2178_v24  ;;  %v1229_v1 = vmul.f32 %v4895_v8, %v4852_v31  ;;  %v4956_v21 = vld [vmem:[#allocation2 + $0x13a] sm:$0xff] }
 0x26b   : > { %v2431_v39 = vadd.f32 1.0, %v2399_v12  ;;  %v2080_v3 = vadd.f32 0.2548296, %v2048_v59  ;;  %v1921_v53 = vmul.f32 %v4927_v7, %v1889_v2  ;;  %v4942_v45 = vmul.f32 0.70710677, %v4936_v36 }
 0x26c   : > { %v1160_v54 = vadd.f32 %v1128_v46, %v1059_v13  ;;  %v757_v58 = vmul.f32 %v4854_v49, %v4792_v55  ;;  %v826_v47 = vmul.f32 %v4862_v15, %v4800_v43  ;;  %v1331_v14 = vmul.f32 %v4902_v61, %v4938_v35  ;;  %v4975_v13 = vld [vmem:[#allocation2 + $0x140] sm:$0xff] }
 0x26d   : > { %v2463_v62 = vmul.f32 %v2431_v39, %v1631_v10  ;;  %v2112_v38 = vmul.f32 %v4875_v25, %v2080_v3  ;;  %v1953_v33 = vadd.f32 1.4214138, %v1921_v53  ;;  %v1699_v11 = vand.u32 2147483647, %v4942_v45 }
 0x26e   : > { %v1261_v5 = vadd.f32 %v1229_v1, %v1160_v54  ;;  %v858_v25 = vadd.f32 %v826_v47, %v757_v58  ;;  %v927_v55 = vmul.f32 %v4921_v32, %v4812_v42  ;;  %v1028_v43 = vmul.f32 %v4871_v57, %v4893_v63  ;;  %v4980_v47 = vld [vmem:[#allocation2 + $0x141] sm:$0xff] }
 0x26f   : > { %3141 = vmatmul.mubr.f32.gmra.mrb[16].mxu1 %v2463_v62  ;;  %v2272_v19 = vmul.f32 %v3387_v44, %v2112_v38  ;;  %v1632_v4 = vmul.f32 0.5, %v4796_v60  ;;  %v1985_v9 = vmul.f32 %v4927_v7, %v1953_v33  ;;  %v1731_v22 = vmul.f32 0.3275911, %v1699_v11 }
 0x270   : > { %v1363_v29 = vadd.f32 %v1331_v14, %v1261_v5  ;;  %3392 = vpow2.f32 %v2230_v26  ;;  %v1432_v18 = vmul.f32 %v4906_v16, %v4954_v28  ;;  %v959_v6 = vadd.f32 %v927_v55, %v858_v25 }
 0x271   : > { %v4964_v34 = vpop.eup %3388  ;;  %v2304_v24 = vsub.f32 1.0, %v2272_v19  ;;  %v2017_v41 = vadd.f32 -0.28449672, %v1985_v9  ;;  %v1763_v27 = vadd.f32 1.0, %v1731_v22  ;;  %v1533_v44 = vmul.f32 %v4917_v30, %v4956_v21 }
 0x272   : > { %v1858_v42 = vmul.f32 1.0614054, %v4964_v34  ;;  %v1464_v10 = vadd.f32 %v1432_v18, %v1363_v29  ;;  %v1060_v59 = vadd.f32 %v1028_v43, %v959_v6  ;;  %v1129_v46 = vmul.f32 %v4883_v51, %v4887_v23  ;;  %v4990_v43 = vld [vmem:[#allocation2 + $0x142] sm:$0xff] }
 0x273   : > { %v2368_v60 = vsub.f32 0.0, %v2304_v24  ;;  %vm2336_vm2 = vcmp.lt.f32.partialorder %v4805_v52, 0.0  ;;  %v2049_v12 = vmul.f32 %v4927_v7, %v2017_v41  ;;  %3394 = vrcp.f32 %v1763_v27 }
 0x274   : > { %v1890_v2 = vadd.f32 -1.4531521, %v1858_v42  ;;  %v3391_v39 = vpop.eup %3390  ;;  %v1565_v26 = vadd.f32 %v1533_v44, %v1464_v10  ;;  %v1161_v53 = vadd.f32 %v1129_v46, %v1060_v59  ;;  %v1230_v54 = vmul.f32 %v4895_v8, %v4910_v48 }
 0x275   : > { %v2400_v3 = vsel %vm2336_vm2, %v2368_v60, %v2304_v24  ;;  %v2081_v62 = vadd.f32 0.2548296, %v2049_v12  ;;  %v2147_v58 = vsub.f32 0.0, %v1699_v11  ;;  %v1332_v5 = vmul.f32 %v4902_v61, %v4975_v13 }
 0x276   : > { %v2432_v1 = vadd.f32 1.0, %v2400_v3  ;;  %v1922_v38 = vmul.f32 %v4964_v34, %v1890_v2  ;;  %v4983_v52 = vadd.f32 %v4545_v50, %v1565_v26  ;;  %v1262_v33 = vadd.f32 %v1230_v54, %v1161_v53 }
 0x277   : > { %v758_v14 = vmul.f32 %v4854_v49, %v4835_v20  ;;  %v2113_v25 = vmul.f32 %v4927_v7, %v2081_v62  ;;  %v827_v9 = vmul.f32 %v4862_v15, %v4844_v0  ;;  %v1433_v29 = vmul.f32 %v4906_v16, %v4980_v47  ;;  %v5023_v62 = vld [vmem:[#allocation2 + $0x150] sm:$0xff] }
 0x278   : > { %v2464_v19 = vmul.f32 %v2432_v1, %v1632_v4  ;;  %v1954_v55 = vadd.f32 1.4214138, %v1922_v38  ;;  %v4995_v22 = vmul.f32 0.70710677, %v4983_v52  ;;  %v1364_v50 = vadd.f32 %v1332_v5, %v1262_v33 }
 0x279   : > { %v928_v24 = vmul.f32 %v4921_v32, %v4852_v31  ;;  %v2273_v20 = vmul.f32 %v3391_v39, %v2113_v25  ;;  %v859_v4 = vadd.f32 %v827_v9, %v758_v14  ;;  %v1029_v18 = vmul.f32 %v4871_v57, %v4938_v35 }
 0x27a   : > { %3143 = vmatprep.mubr.f32.mxu1 %v2464_v19  ;;  %v1986_v7 = vmul.f32 %v4964_v34, %v1954_v55  ;;  %v3393_v6 = vpop.eup %3392  ;;  %v2179_v0 = vmul.f32 %v2147_v58, %v1699_v11  ;;  %v1700_v41 = vand.u32 2147483647, %v4995_v22  ;;  %v1465_v42 = vadd.f32 %v1433_v29, %v1364_v50  ;;  %v5027_v55 = vld [vmem:[#allocation2 + $0x151] sm:$0xff] }
 0x27b   : > { %v1534_v27 = vmul.f32 %v4917_v30, %v4990_v43  ;;  %v1633_v44 = vmul.f32 0.5, %v4838_v56  ;;  %v2305_v60 = vsub.f32 1.0, %v2273_v20  ;;  %v960_v10 = vadd.f32 %v928_v24, %v859_v4 }
 0x27c   : > { %v2018_v31 = vadd.f32 -0.28449672, %v1986_v7  ;;  %vm2337_vm3 = vcmp.lt.f32.partialorder %v4847_v37, 0.0  ;;  %v1732_v59 = vmul.f32 0.3275911, %v1700_v41  ;;  %v2148_v46 = vsub.f32 0.0, %v1700_v41 }
 0x27d   : > { %v1566_v12 = vadd.f32 %v1534_v27, %v1465_v42  ;;  %v5009_v2 = vpop.eup %3394  ;;  %v2369_v39 = vsub.f32 0.0, %v2305_v60  ;;  %v1061_v3 = vadd.f32 %v1029_v18, %v960_v10  ;;  %v1130_v26 = vmul.f32 %v4883_v51, %v4954_v28  ;;  %v5018_v37 = vld [vmem:[%s5494_s4] ss:$0 sm:$0xff]  ;;  %v5037_v18 = vld [vmem:[#allocation2 + $0x152] sm:$0xff] }
 0x27e   : > { %v2050_v11 = vmul.f32 %v4964_v34, %v2018_v31  ;;  %v1859_v53 = vmul.f32 1.0614054, %v5009_v2  ;;  %v2232_v56 = vmul.f32 1.442695, %v2179_v0  ;;  %v1764_v54 = vadd.f32 1.0, %v1732_v59 }
 0x27f   : > { %v5021_v1 = vadd.f32 %v5018_v37, %v1566_v12  ;;  %v2401_v38 = vsel %vm2337_vm3, %v2369_v39, %v2305_v60  ;;  %v1162_v33 = vadd.f32 %v1130_v26, %v1061_v3  ;;  %v1231_v5 = vmul.f32 %v4895_v8, %v4956_v21 }
 0x280   : > { %v2082_v58 = vadd.f32 0.2548296, %v2050_v11  ;;  %v2433_v14 = vadd.f32 1.0, %v2401_v38  ;;  %v1891_v19 = vadd.f32 -1.4531521, %v1859_v53  ;;  %3396 = vrcp.f32 %v1764_v54 }
 0x281   : > { %v2180_v25 = vmul.f32 %v2148_v46, %v1700_v41  ;;  %v5031_v50 = vmul.f32 0.70710677, %v5021_v1  ;;  %v1263_v29 = vadd.f32 %v1231_v5, %v1162_v33  ;;  %v1333_v24 = vmul.f32 %v4902_v61, %v5023_v62 }
 0x282   : > { %v2114_v9 = vmul.f32 %v4964_v34, %v2082_v58  ;;  %v2465_v20 = vmul.f32 %v2433_v14, %v1633_v44  ;;  %v1634_v7 = vmul.f32 0.5, %v4880_v17  ;;  %v1923_v4 = vmul.f32 %v5009_v2, %v1891_v19  ;;  %v5065_v19 = vld [vmem:[#allocation2 + $0x158] sm:$0xff] }
 0x283   : > { %v759_v0 = vmul.f32 %v4854_v49, %v4893_v63  ;;  %v1701_v34 = vand.u32 2147483647, %v5031_v50  ;;  %v1365_v42 = vadd.f32 %v1333_v24, %v1263_v29  ;;  %v1434_v27 = vmul.f32 %v4906_v16, %v5027_v55 }
 0x284   : > { %v2274_v41 = vmul.f32 %v3393_v6, %v2114_v9  ;;  %3144 = vmatmul.mubr.f32.gmra.mrb[18].mxu1 %v2465_v20  ;;  %v1955_v60 = vadd.f32 1.4214138, %v1923_v4  ;;  %3398 = vpow2.f32 %v2232_v56  ;;  %v2234_v44 = vmul.f32 1.442695, %v2180_v25 }
 0x285   : > { %v828_v17 = vmul.f32 %v4862_v15, %v4887_v23  ;;  %v1733_v10 = vmul.f32 0.3275911, %v1701_v34  ;;  %v1466_v59 = vadd.f32 %v1434_v27, %v1365_v42  ;;  %v1535_v63 = vmul.f32 %v4917_v30, %v5037_v18  ;;  %v5079_v27 = vld [vmem:[#allocation2 + $0x159] sm:$0xff] }
 0x286   : > { %v2306_v31 = vsub.f32 1.0, %v2274_v41  ;;  %v1987_v6 = vmul.f32 %v5009_v2, %v1955_v60  ;;  %v929_v12 = vmul.f32 %v4921_v32, %v4910_v48  ;;  %v1030_v39 = vmul.f32 %v4871_v57, %v4975_v13 }
 0x287   : > { %v860_v46 = vadd.f32 %v828_v17, %v759_v0  ;;  %v1765_v3 = vadd.f32 1.0, %v1733_v10  ;;  %v2149_v26 = vsub.f32 0.0, %v1701_v34  ;;  %v1567_v53 = vadd.f32 %v1535_v63, %v1466_v59 }
 0x288   : > { %v2370_v11 = vsub.f32 0.0, %v2306_v31  ;;  %vm2338_vm4 = vcmp.lt.f32.partialorder %v4891_v40, 0.0  ;;  %v2019_v23 = vadd.f32 -0.28449672, %v1987_v6  ;;  %3400 = vpow2.f32 %v2234_v44 }
 0x289   : > { %v961_v56 = vadd.f32 %v929_v12, %v860_v46  ;;  %v5055_v38 = vmul.f32 0.5, %v4936_v36  ;;  %3402 = vrcp.f32 %v1765_v3  ;;  %v5058_v58 = vadd.f32 %v5018_v37, %v1567_v53  ;;  %v5095_v53 = vld [vmem:[#allocation2 + $0x168] sm:$0xff] }
 0x28a   : > { %v2402_v54 = vsel %vm2338_vm4, %v2370_v11, %v2306_v31  ;;  %v5060_v48 = vpop.eup %3396  ;;  %v2051_v5 = vmul.f32 %v5009_v2, %v2019_v23  ;;  %v1131_v40 = vmul.f32 %v4883_v51, %v4980_v47  ;;  %v2181_v9 = vmul.f32 %v2149_v26, %v1701_v34  ;;  %v5084_v31 = vld [vmem:[#allocation2 + $0x15a] sm:$0xff] }
 0x28b   : > { %v2434_v33 = vadd.f32 1.0, %v2402_v54  ;;  %v1062_v14 = vadd.f32 %v1030_v39, %v961_v56  ;;  %v1860_v25 = vmul.f32 1.0614054, %v5060_v48  ;;  %v5069_v36 = vmul.f32 0.70710677, %v5058_v58 }
 0x28c   : > { %v1232_v29 = vmul.f32 %v4895_v8, %v4990_v43  ;;  %v2083_v20 = vadd.f32 0.2548296, %v2051_v5  ;;  %v760_v0 = vmul.f32 %v4854_v49, %v4938_v35  ;;  %vm2339_vm5 = vcmp.lt.f32.partialorder %v4942_v45, 0.0 }
 0x28d   : > { %v2466_v24 = vmul.f32 %v2434_v33, %v1634_v7  ;;  %v1163_v4 = vadd.f32 %v1131_v40, %v1062_v14  ;;  %v1892_v41 = vadd.f32 -1.4531521, %v1860_v25  ;;  %v1702_v42 = vand.u32 2147483647, %v5069_v36  ;;  %v5101_v14 = vld [vmem:[#allocation2 + $0x169] sm:$0xff] }
 0x28e   : > { %v1334_v34 = vmul.f32 %v4902_v61, %v5065_v19  ;;  %v829_v60 = vmul.f32 %v4862_v15, %v4954_v28  ;;  %v3399_v44 = vpop.eup %3398  ;;  %v2115_v7 = vmul.f32 %v5009_v2, %v2083_v20  ;;  %v930_v35 = vmul.f32 %v4921_v32, %v4956_v21 }
 0x28f   : > { %3146 = vmatprep.mubr.f32.mxu1 %v2466_v24  ;;  %v1264_v17 = vadd.f32 %v1232_v29, %v1163_v4  ;;  %v1031_v10 = vmul.f32 %v4871_v57, %v5023_v62  ;;  %v1924_v59 = vmul.f32 %v5060_v48, %v1892_v41  ;;  %v1734_v63 = vmul.f32 0.3275911, %v1702_v42 }
 0x290   : > { %v2150_v6 = vsub.f32 0.0, %v1702_v42  ;;  %v861_v46 = vadd.f32 %v829_v60, %v760_v0  ;;  %v2275_v12 = vmul.f32 %v3399_v44, %v2115_v7  ;;  %v2236_v28 = vmul.f32 1.442695, %v2181_v9 }
 0x291   : > { %v1366_v39 = vadd.f32 %v1334_v34, %v1264_v17  ;;  %v1435_v2 = vmul.f32 %v4906_v16, %v5079_v27  ;;  %v1956_v11 = vadd.f32 1.4214138, %v1924_v59  ;;  %v1766_v3 = vadd.f32 1.0, %v1734_v63 }
 0x292   : > { %v1536_v26 = vmul.f32 %v4917_v30, %v5084_v31  ;;  %v962_v21 = vadd.f32 %v930_v35, %v861_v46  ;;  %v3401_v23 = vpop.eup %3400  ;;  %v2307_v56 = vsub.f32 1.0, %v2275_v12  ;;  %v1132_v33 = vmul.f32 %v4883_v51, %v5027_v55 }
 0x293   : > { %v1467_v54 = vadd.f32 %v1435_v2, %v1366_v39  ;;  %v1233_v5 = vmul.f32 %v4895_v8, %v5037_v18  ;;  %v5103_v40 = vpop.eup %3402  ;;  %v1988_v25 = vmul.f32 %v5060_v48, %v1956_v11  ;;  %3404 = vrcp.f32 %v1766_v3 }
 0x294   : > { %v2182_v9 = vmul.f32 %v2150_v6, %v1702_v42  ;;  %v1063_v29 = vadd.f32 %v1031_v10, %v962_v21  ;;  %v2371_v24 = vsub.f32 0.0, %v2307_v56  ;;  %v1861_v20 = vmul.f32 1.0614054, %v5103_v40 }
 0x295   : > { %v1568_v4 = vadd.f32 %v1536_v26, %v1467_v54  ;;  %v1335_v0 = vmul.f32 %v4902_v61, %v5095_v53  ;;  %v2020_v41 = vadd.f32 -0.28449672, %v1988_v25  ;;  %v1436_v60 = vmul.f32 %v4906_v16, %v5101_v14 }
 0x296   : > { %v1164_v34 = vadd.f32 %v1132_v33, %v1063_v29  ;;  %v761_v44 = vmul.f32 %v4854_v49, %v4975_v13  ;;  %v2403_v7 = vsel %vm2339_vm5, %v2371_v24, %v2307_v56  ;;  %v1893_v42 = vadd.f32 -1.4531521, %v1861_v20  ;;  %v5125_v13 = vld [vmem:[#allocation2 + $0x16a] sm:$0xff] }
 0x297   : > { %v5116_v17 = vadd.f32 %v5018_v37, %v1568_v4  ;;  %v830_v35 = vmul.f32 %v4862_v15, %v4980_v47  ;;  %v2435_v10 = vadd.f32 1.0, %v2403_v7  ;;  %v2052_v59 = vmul.f32 %v5060_v48, %v2020_v41 }
 0x298   : > { %v2238_v63 = vmul.f32 1.442695, %v2182_v9  ;;  %v1265_v6 = vadd.f32 %v1233_v5, %v1164_v34  ;;  %v1925_v46 = vmul.f32 %v5103_v40, %v1893_v42  ;;  %v931_v39 = vmul.f32 %v4921_v32, %v4990_v43 }
 0x299   : > { %v5123_v12 = vmul.f32 0.70710677, %v5116_v17  ;;  %v862_v45 = vadd.f32 %v830_v35, %v761_v44  ;;  %v2467_v2 = vmul.f32 %v2435_v10, %v5055_v38  ;;  %v2084_v11 = vadd.f32 0.2548296, %v2052_v59  ;;  %v5154_v35 = vld [vmem:[#allocation2 + $0x171] sm:$0xff] }
 0x29a   : > { %v1367_v47 = vadd.f32 %v1335_v0, %v1265_v6  ;;  %v1032_v3 = vmul.f32 %v4871_v57, %v5065_v19  ;;  %v1957_v21 = vadd.f32 1.4214138, %v1925_v46  ;;  %3406 = vpow2.f32 %v2236_v28 }
 0x29b   : > { %v5132_v26 = vpop.f32.mrb[0].mxu1  ;;  %v1703_v56 = vand.u32 2147483647, %v5123_v12  ;;  %v963_v54 = vadd.f32 %v931_v39, %v862_v45  ;;  %3147 = vmatmul.mubr.f32.gmra.mrb[20].mxu1 %v2467_v2  ;;  %v2116_v5 = vmul.f32 %v5060_v48, %v2084_v11  ;;  %v1537_v38 = vmul.f32 %v4917_v30, %v5125_v13 }
 0x29c   : > { %v5135_v33 = vpop.f32.mrb[1].mxu1  ;;  %v1468_v43 = vadd.f32 %v1436_v60, %v1367_v47  ;;  %v1636_v25 = vmul.f32 0.5, %v4983_v52  ;;  %v1989_v9 = vmul.f32 %v5103_v40, %v1957_v21  ;;  %3408 = vpow2.f32 %v2238_v63  ;;  %v5149_v52 = vld [vmem:[#allocation2 + $0x170] sm:$0xff] }
 0x29d   : > { %v1735_v29 = vmul.f32 0.3275911, %v1703_v56  ;;  %v1064_v24 = vadd.f32 %v1032_v3, %v963_v54  ;;  %v5142_v20 = vpop.eup %3404  ;;  %v2276_v4 = vmul.f32 %v3401_v23, %v2116_v5  ;;  %v1133_v41 = vmul.f32 %v4883_v51, %v5079_v27  ;;  %v5166_v47 = vld [vmem:[#allocation2 + $0x172] sm:$0xff] }
 0x29e   : > { %v1569_v0 = vadd.f32 %v1537_v38, %v1468_v43  ;;  %v2021_v48 = vadd.f32 -0.28449672, %v1989_v9  ;;  %v1862_v28 = vmul.f32 1.0614054, %v5142_v20  ;;  %v1234_v60 = vmul.f32 %v4895_v8, %v5084_v31 }
 0x29f   : > { %v1767_v34 = vadd.f32 1.0, %v1735_v29  ;;  %v2308_v44 = vsub.f32 1.0, %v2276_v4  ;;  %v2151_v7 = vsub.f32 0.0, %v1703_v56  ;;  %v1165_v23 = vadd.f32 %v1133_v41, %v1064_v24 }
 0x2a0   : > { %v5152_v42 = vadd.f32 %v5018_v37, %v1569_v0  ;;  %vm2340_vm6 = vcmp.lt.f32.partialorder %v4995_v22, 0.0  ;;  %v2053_v10 = vmul.f32 %v5103_v40, %v2021_v48  ;;  %v1894_v59 = vadd.f32 -1.4531521, %v1862_v28 }
 0x2a1   : > { %3410 = vrcp.f32 %v1767_v34  ;;  %v2372_v63 = vsub.f32 0.0, %v2308_v44  ;;  %v1266_v46 = vadd.f32 %v1234_v60, %v1165_v23  ;;  %v1336_v45 = vmul.f32 %v4902_v61, %v5149_v52 }
 0x2a2   : > { %v5159_v6 = vmul.f32 0.70710677, %v5152_v42  ;;  %v2085_v39 = vadd.f32 0.2548296, %v2053_v10  ;;  %v1926_v2 = vmul.f32 %v5142_v20, %v1894_v59  ;;  %v1437_v11 = vmul.f32 %v4906_v16, %v5154_v35 }
 0x2a3   : > { %v762_v22 = vmul.f32 %v4854_v49, %v5023_v62  ;;  %v2404_v3 = vsel %vm2340_vm6, %v2372_v63, %v2308_v44  ;;  %v2183_v21 = vmul.f32 %v2151_v7, %v1703_v56  ;;  %v1368_v5 = vadd.f32 %v1336_v45, %v1266_v46  ;;  %v5171_v43 = vpop.f32.mrb[2].mxu1 }
 0x2a4   : > { %v1704_v54 = vand.u32 2147483647, %v5159_v6  ;;  %v2436_v38 = vadd.f32 1.0, %v2404_v3  ;;  %v2117_v9 = vmul.f32 %v5103_v40, %v2085_v39  ;;  %v1958_v29 = vadd.f32 1.4214138, %v1926_v2  ;;  %v5176_v4 = vpop.f32.mrb[3].mxu1  ;;  %v3407_v0 = vpop.eup %3406 }
 0x2a5   : > { %v831_v24 = vmul.f32 %v4862_v15, %v5027_v55  ;;  %v1469_v48 = vadd.f32 %v1437_v11, %v1368_v5  ;;  %v1538_v62 = vmul.f32 %v4917_v30, %v5166_v47  ;;  %v932_v56 = vmul.f32 %v4921_v32, %v5037_v18  ;;  %v5202_v5 = vld [vmem:[#allocation2 + $0x180] sm:$0xff] }
 0x2a6   : > { %v1736_v41 = vmul.f32 0.3275911, %v1704_v54  ;;  %v2468_v28 = vmul.f32 %v2436_v38, %v1636_v25  ;;  %v2277_v34 = vmul.f32 %v3407_v0, %v2117_v9  ;;  %v1990_v60 = vmul.f32 %v5142_v20, %v1958_v29  ;;  %v3409_v44 = vpop.eup %3408 }
 0x2a7   : > { %v863_v40 = vadd.f32 %v831_v24, %v762_v22  ;;  %v2240_v7 = vmul.f32 1.442695, %v2183_v21  ;;  %v1570_v55 = vadd.f32 %v1538_v62, %v1469_v48  ;;  %v1033_v10 = vmul.f32 %v4871_v57, %v5095_v53  ;;  %v5207_v62 = vld [vmem:[#allocation2 + $0x181] sm:$0xff] }
 0x2a8   : > { %v1768_v23 = vadd.f32 1.0, %v1736_v41  ;;  %3149 = vmatprep.mubr.f32.mxu1 %v2468_v28  ;;  %v1637_v59 = vmul.f32 0.5, %v5021_v1  ;;  %v2309_v63 = vsub.f32 1.0, %v2277_v34  ;;  %v2022_v46 = vadd.f32 -0.28449672, %v1990_v60  ;;  %v5212_v60 = vld [vmem:[#allocation2 + $0x182] sm:$0xff] }
 0x2a9   : > { %v964_v45 = vadd.f32 %v932_v56, %v863_v40  ;;  %vm2341_vm7 = vcmp.lt.f32.partialorder %v5031_v50, 0.0  ;;  %v2152_v18 = vsub.f32 0.0, %v1704_v54  ;;  %v5188_v25 = vadd.f32 %v5018_v37, %v1570_v55 }
 0x2aa   : > { %3412 = vrcp.f32 %v1768_v23  ;;  %v2373_v2 = vsub.f32 0.0, %v2309_v63  ;;  %v2054_v11 = vmul.f32 %v5142_v20, %v2022_v46  ;;  %v1134_v3 = vmul.f32 %v4883_v51, %v5101_v14 }
 0x2ab   : > { %v5190_v39 = vpop.eup %3410  ;;  %v1065_v22 = vadd.f32 %v1033_v10, %v964_v45  ;;  %v5196_v1 = vmul.f32 0.5, %v5058_v58  ;;  %3414 = vpow2.f32 %v2240_v7  ;;  %v5200_v50 = vmul.f32 0.70710677, %v5188_v25 }
 0x2ac   : > { %v1863_v21 = vmul.f32 1.0614054, %v5190_v39  ;;  %v2405_v38 = vsel %vm2341_vm7, %v2373_v2, %v2309_v63  ;;  %v2086_v9 = vadd.f32 0.2548296, %v2054_v11  ;;  %v1235_v24 = vmul.f32 %v4895_v8, %v5125_v13 }
 0x2ad   : > { %v1166_v29 = vadd.f32 %v1134_v3, %v1065_v22  ;;  %v2437_v0 = vadd.f32 1.0, %v2405_v38  ;;  %v2184_v48 = vmul.f32 %v2152_v18, %v1704_v54  ;;  %v1705_v58 = vand.u32 2147483647, %v5200_v50 }
 0x2ae   : > { %v1895_v41 = vadd.f32 -1.4531521, %v1863_v21  ;;  %v2118_v56 = vmul.f32 %v5142_v20, %v2086_v9  ;;  %v1337_v34 = vmul.f32 %v4902_v61, %v5202_v5  ;;  %v763_v40 = vmul.f32 %v4854_v49, %v5065_v19 }
 0x2af   : > { %v1267_v28 = vadd.f32 %v1235_v24, %v1166_v29  ;;  %v2469_v7 = vmul.f32 %v2437_v0, %v1637_v59  ;;  %v1737_v55 = vmul.f32 0.3275911, %v1705_v58  ;;  %v2153_v54 = vsub.f32 0.0, %v1705_v58 }
 0x2b0   : > { %v1927_v23 = vmul.f32 %v5190_v39, %v1895_v41  ;;  %v2278_v10 = vmul.f32 %v3409_v44, %v2118_v56  ;;  %v1438_v46 = vmul.f32 %v4906_v16, %v5207_v62  ;;  %v832_v20 = vmul.f32 %v4862_v15, %v5079_v27 }
 0x2b1   : > { %v1369_v63 = vadd.f32 %v1337_v34, %v1267_v28  ;;  %3150 = vmatmul.mubr.f32.gmra.mrb[22].mxu1 %v2469_v7  ;;  %v1769_v18 = vadd.f32 1.0, %v1737_v55  ;;  %v1539_v2 = vmul.f32 %v4917_v30, %v5212_v60  ;;  %v933_v19 = vmul.f32 %v4921_v32, %v5084_v31 }
 0x2b2   : > { %v1959_v45 = vadd.f32 1.4214138, %v1927_v23  ;;  %v2310_v59 = vsub.f32 1.0, %v2278_v10  ;;  %v864_v22 = vadd.f32 %v832_v20, %v763_v40  ;;  %v1034_v44 = vmul.f32 %v4871_v57, %v5149_v52 }
 0x2b3   : > { %v1470_v11 = vadd.f32 %v1438_v46, %v1369_v63  ;;  %vm2342_vm8 = vcmp.lt.f32.partialorder %v5069_v36, 0.0  ;;  %3416 = vrcp.f32 %v1769_v18  ;;  %v2185_v21 = vmul.f32 %v2153_v54, %v1705_v58  ;;  %v5241_v54 = vld [vmem:[#allocation2 + $0x188] sm:$0xff] }
 0x2b4   : > { %v5227_v3 = vpop.eup %3412  ;;  %v1991_v27 = vmul.f32 %v5190_v39, %v1959_v45  ;;  %v2374_v38 = vsub.f32 0.0, %v2310_v59  ;;  %v965_v24 = vadd.f32 %v933_v19, %v864_v22  ;;  %v5233_v0 = vmul.f32 0.5, %v5116_v17 }
 0x2b5   : > { %v1864_v9 = vmul.f32 1.0614054, %v5227_v3  ;;  %v1571_v29 = vadd.f32 %v1539_v2, %v1470_v11  ;;  %v3415_v31 = vpop.eup %3414  ;;  %v2242_v56 = vmul.f32 1.442695, %v2184_v48  ;;  %v1135_v28 = vmul.f32 %v4883_v51, %v5154_v35 }
 0x2b6   : > { %v2023_v41 = vadd.f32 -0.28449672, %v1991_v27  ;;  %v2406_v34 = vsel %vm2342_vm8, %v2374_v38, %v2310_v59  ;;  %v1066_v58 = vadd.f32 %v1034_v44, %v965_v24  ;;  %v2244_v55 = vmul.f32 1.442695, %v2185_v21  ;;  %v5264_v44 = vld [vmem:[#allocation2 + $0x189] sm:$0xff] }
 0x2b7   : > { %v1896_v36 = vadd.f32 -1.4531521, %v1864_v9  ;;  %v5238_v40 = vadd.f32 %v5018_v37, %v1571_v29  ;;  %v2438_v7 = vadd.f32 1.0, %v2406_v34  ;;  %v764_v17 = vmul.f32 %v4854_v49, %v5095_v53  ;;  %v5266_v27 = vld [vmem:[#allocation2 + $0x18a] sm:$0xff] }
 0x2b8   : > { %v2055_v23 = vmul.f32 %v5190_v39, %v2023_v41  ;;  %v5245_v10 = vpop.f32.mrb[4].mxu1  ;;  %v1167_v46 = vadd.f32 %v1135_v28, %v1066_v58  ;;  %v1236_v20 = vmul.f32 %v4895_v8, %v5166_v47  ;;  %3418 = vpow2.f32 %v2242_v56 }
 0x2b9   : > { %v1928_v48 = vmul.f32 %v5227_v3, %v1896_v36  ;;  %v5249_v63 = vmul.f32 0.70710677, %v5238_v40  ;;  %v5253_v45 = vpop.f32.mrb[5].mxu1  ;;  %v2470_v18 = vmul.f32 %v2438_v7, %v5196_v1  ;;  %v833_v53 = vmul.f32 %v4862_v15, %v5101_v14  ;;  %v1303_v7 = vld [vmem:[#allocation2 + $0x198] sm:$0xff] }
 0x2ba   : > { %v2087_v2 = vadd.f32 0.2548296, %v2055_v23  ;;  %vm2343_vm9 = vcmp.lt.f32.partialorder %v5123_v12, 0.0  ;;  %v1268_v11 = vadd.f32 %v1236_v20, %v1167_v46  ;;  %v1338_v22 = vmul.f32 %v4902_v61, %v5241_v54 }
 0x2bb   : > { %v1960_v19 = vadd.f32 1.4214138, %v1928_v48  ;;  %v5260_v59 = vand.u32 2147483647, %v5249_v63  ;;  %3152 = vmatprep.mubr.f32.mxu1 %v2470_v18  ;;  %v865_v21 = vadd.f32 %v833_v53, %v764_v17  ;;  %v934_v14 = vmul.f32 %v4921_v32, %v5125_v13  ;;  %v1404_v48 = vld [vmem:[#allocation2 + $0x199] sm:$0xff] }
 0x2bc   : > { %v2119_v1 = vmul.f32 %v5190_v39, %v2087_v2  ;;  %v1035_v38 = vmul.f32 %v4871_v57, %v5202_v5  ;;  %3420 = vpow2.f32 %v2244_v55  ;;  %v1370_v24 = vadd.f32 %v1338_v22, %v1268_v11 }
 0x2bd   : > { %v1992_v9 = vmul.f32 %v5227_v3, %v1960_v19  ;;  %v1738_v29 = vmul.f32 0.3275911, %v5260_v59  ;;  %v5275_v41 = vpop.eup %3416  ;;  %v1439_v28 = vmul.f32 %v4906_v16, %v5264_v44  ;;  %v1540_v39 = vmul.f32 %v4917_v30, %v5266_v27 }
 0x2be   : > { %v2279_v56 = vmul.f32 %v3415_v31, %v2119_v1  ;;  %v966_v34 = vadd.f32 %v934_v14, %v865_v21  ;;  %v1865_v36 = vmul.f32 1.0614054, %v5275_v41  ;;  %v1136_v58 = vmul.f32 %v4883_v51, %v5207_v62  ;;  %v1505_v62 = vld [vmem:[#allocation2 + $0x19a] sm:$0xff] }
 0x2bf   : > { %v2024_v13 = vadd.f32 -0.28449672, %v1992_v9  ;;  %v1770_v5 = vadd.f32 1.0, %v1738_v29  ;;  %v2154_v55 = vsub.f32 0.0, %v5260_v59  ;;  %v1471_v17 = vadd.f32 %v1439_v28, %v1370_v24 }
 0x2c0   : > { %v2311_v23 = vsub.f32 1.0, %v2279_v56  ;;  %v1067_v31 = vadd.f32 %v1035_v38, %v966_v34  ;;  %v1897_v20 = vadd.f32 -1.4531521, %v1865_v36  ;;  %v1237_v18 = vmul.f32 %v4895_v8, %v5212_v60 }
 0x2c1   : > { %v2056_v46 = vmul.f32 %v5227_v3, %v2024_v13  ;;  %3422 = vrcp.f32 %v1770_v5  ;;  %v1572_v53 = vadd.f32 %v1540_v39, %v1471_v17  ;;  %v1339_v11 = vmul.f32 %v4902_v61, %v1303_v7 }
 0x2c2   : > { %v2375_v2 = vsub.f32 0.0, %v2311_v23  ;;  %v1168_v19 = vadd.f32 %v1136_v58, %v1067_v31  ;;  %v1929_v1 = vmul.f32 %v5275_v41, %v1897_v20  ;;  %v1440_v21 = vmul.f32 %v4906_v16, %v1404_v48  ;;  %v3419_v38 = vpop.eup %3418 }
 0x2c3   : > { %v2088_v22 = vadd.f32 0.2548296, %v2056_v46  ;;  %v765_v14 = vmul.f32 %v4854_v49, %v5149_v52  ;;  %v5296_v60 = vadd.f32 %v5018_v37, %v1572_v53  ;;  %v834_v24 = vmul.f32 %v4862_v15, %v5154_v35 }
 0x2c4   : > { %v2407_v9 = vsel %vm2343_vm9, %v2375_v2, %v2311_v23  ;;  %v1269_v29 = vadd.f32 %v1237_v18, %v1168_v19  ;;  %v1961_v39 = vadd.f32 1.4214138, %v1929_v1  ;;  %v1541_v34 = vmul.f32 %v4917_v30, %v1505_v62 }
 0x2c5   : > { %v2439_v56 = vadd.f32 1.0, %v2407_v9  ;;  %v2120_v28 = vmul.f32 %v5227_v3, %v2088_v22  ;;  %v5303_v13 = vmul.f32 0.70710677, %v5296_v60  ;;  %v866_v52 = vadd.f32 %v834_v24, %v765_v14  ;;  %v1506_v14 = vld [vmem:[#allocation2 + $0x1a2] sm:$0xff] }
 0x2c6   : > { %v1371_v49 = vadd.f32 %v1339_v11, %v1269_v29  ;;  %v935_v12 = vmul.f32 %v4921_v32, %v5166_v47  ;;  %v3421_v36 = vpop.eup %3420  ;;  %v1993_v15 = vmul.f32 %v5275_v41, %v1961_v39  ;;  %v1036_v35 = vmul.f32 %v4871_v57, %v5241_v54 }
 0x2c7   : > { %v2471_v5 = vmul.f32 %v2439_v56, %v5233_v0  ;;  %v2280_v58 = vmul.f32 %v3419_v38, %v2120_v28  ;;  %v5312_v3 = vand.u32 2147483647, %v5303_v13  ;;  %v1640_v17 = vmul.f32 0.5, %v5152_v42 }
 0x2c8   : > { %v1472_v7 = vadd.f32 %v1440_v21, %v1371_v49  ;;  %v967_v23 = vadd.f32 %v935_v12, %v866_v52  ;;  %v2025_v48 = vadd.f32 -0.28449672, %v1993_v15  ;;  %v2186_v32 = vmul.f32 %v2154_v55, %v5260_v59  ;;  %v1405_v55 = vld [vmem:[#allocation2 + $0x1a1] sm:$0xff] }
 0x2c9   : > { %3153 = vmatmul.mubr.f32.gmra.mrb[24].mxu1 %v2471_v5  ;;  %v2312_v31 = vsub.f32 1.0, %v2280_v58  ;;  %v1739_v47 = vmul.f32 0.3275911, %v5312_v3  ;;  %vm2344_vm10 = vcmp.lt.f32.partialorder %v5159_v6, 0.0  ;;  %v1137_v18 = vmul.f32 %v4883_v51, %v5264_v44  ;;  %v3458_v6 = vld [vmem:[#allocation2 + $0x8] sm:$0xff] }
 0x2ca   : > { %v1573_v0 = vadd.f32 %v1541_v34, %v1472_v7  ;;  %v1068_v46 = vadd.f32 %v1036_v35, %v967_v23  ;;  %v2057_v54 = vmul.f32 %v5275_v41, %v2025_v48  ;;  %v1238_v59 = vmul.f32 %v4895_v8, %v5266_v27  ;;  %v5333_v51 = vld [vmem:[%s5496_s6] ss:$0 sm:$0xff] }
 0x2cb   : > { %v5317_v20 = vpop.eup %3422  ;;  %v2376_v57 = vsub.f32 0.0, %v2312_v31  ;;  %v1771_v2 = vadd.f32 1.0, %v1739_v47  ;;  %v1340_v22 = vmul.f32 %v3458_v6, %v4902_v61  ;;  %v2246_v21 = vmul.f32 1.442695, %v2186_v32 }
 0x2cc   : > { %v1866_v42 = vmul.f32 1.0614054, %v5317_v20  ;;  %v5325_v53 = vadd.f32 %v5018_v37, %v1573_v0  ;;  %v2089_v11 = vadd.f32 0.2548296, %v2057_v54  ;;  %v1169_v62 = vadd.f32 %v1137_v18, %v1068_v46 }
 0x2cd   : > { %v2408_v19 = vsel %vm2344_vm10, %v2376_v57, %v2312_v31  ;;  %3424 = vrcp.f32 %v1771_v2  ;;  %v1441_v9 = vmul.f32 %v4906_v16, %v1405_v55  ;;  %v2573_v24 = vadd.f32 %v5132_v26, %v5333_v51 }
 0x2ce   : > { %v2440_v44 = vadd.f32 1.0, %v2408_v19  ;;  %v1898_v1 = vadd.f32 -1.4531521, %v1866_v42  ;;  %v2121_v8 = vmul.f32 %v5275_v41, %v2089_v11  ;;  %v5337_v27 = vmul.f32 0.70710677, %v5325_v53 }
 0x2cf   : > { %v1270_v38 = vadd.f32 %v1238_v59, %v1169_v62  ;;  %v1542_v34 = vmul.f32 %v4917_v30, %v1506_v14  ;;  %2727 = vst [vmem:[%s5347_s29 + $0x8] sm:$0xff] %v2573_v24  ;;  %v2568_v16 = vadd.f32 %v5333_v51, %v5135_v33  ;;  %v2583_v26 = vadd.f32 %v5171_v43, %v5333_v51 }
 0x2d0   : > { %v2472_v61 = vmul.f32 %v2440_v44, %v1640_v17  ;;  %v1930_v29 = vmul.f32 %v5317_v20, %v1898_v1  ;;  %v2281_v56 = vmul.f32 %v3421_v36, %v2121_v8  ;;  %v1708_v28 = vand.u32 2147483647, %v5337_v27 }
 0x2d1   : > { %v1372_v39 = vadd.f32 %v1340_v22, %v1270_v38  ;;  %v2578_v49 = vadd.f32 %v5333_v51, %v5176_v4  ;;  %3426 = vpow2.f32 %v2246_v21  ;;  %v2155_v5 = vsub.f32 0.0, %v5312_v3  ;;  %2726 = vst [vmem:[%s5347_s29] sm:$0xff] %v2568_v16  ;;  %2729 = vst [vmem:[%s5347_s29 + $0x18] sm:$0xff] %v2583_v26 }
 0x2d2   : > { %3155 = vmatprep.mubr.f32.mxu1 %v2472_v61  ;;  %v1962_v41 = vadd.f32 1.4214138, %v1930_v29  ;;  %v2313_v30 = vsub.f32 1.0, %v2281_v56  ;;  %v1740_v52 = vmul.f32 0.3275911, %v1708_v28  ;;  %v2593_v33 = vadd.f32 %v5245_v10, %v5333_v51 }
 0x2d3   : > { %v1473_v12 = vadd.f32 %v1441_v9, %v1372_v39  ;;  %2728 = vst [vmem:[%s5347_s29 + $0x10] sm:$0xff] %v2578_v49  ;;  %v2588_v43 = vadd.f32 %v5333_v51, %v5253_v45  ;;  %vm2345_vm11 = vcmp.lt.f32.partialorder %v5200_v50, 0.0  ;;  %v1641_v31 = vmul.f32 0.5, %v5188_v25 }
 0x2d4   : > { %v1994_v36 = vmul.f32 %v5317_v20, %v1962_v41  ;;  %v2377_v4 = vsub.f32 0.0, %v2313_v30  ;;  %v1772_v58 = vadd.f32 1.0, %v1740_v52  ;;  %2731 = vst [vmem:[%s5347_s29 + $0x28] sm:$0xff] %v2593_v33  ;;  %v2187_v45 = vmul.f32 %v2155_v5, %v5312_v3 }
 0x2d5   : > { %v1574_v15 = vadd.f32 %v1542_v34, %v1473_v12  ;;  %2730 = vst [vmem:[%s5347_s29 + $0x20] sm:$0xff] %v2588_v43  ;;  %v2156_v55 = vsub.f32 0.0, %v1708_v28  ;;  %vm2346_vm12 = vcmp.lt.f32.partialorder %v5249_v63, 0.0  ;;  %v1642_v61 = vmul.f32 0.5, %v5238_v40 }
 0x2d6   : > { %v2026_v35 = vadd.f32 -0.28449672, %v1994_v36  ;;  %v2409_v7 = vsel %vm2345_vm11, %v2377_v4, %v2313_v30  ;;  %3428 = vrcp.f32 %v1772_v58  ;;  %v2248_v42 = vmul.f32 1.442695, %v2187_v45 }
 0x2d7   : > { %v5369_v23 = vadd.f32 %v5018_v37, %v1574_v15  ;;  %v3425_v17 = vpop.eup %3424  ;;  %v2441_v10 = vadd.f32 1.0, %v2409_v7  ;;  %v2188_v21 = vmul.f32 %v2156_v55, %v1708_v28  ;;  %vm2347_vm13 = vcmp.lt.f32.partialorder %v5303_v13, 0.0 }
 0x2d8   : > { %v2058_v48 = vmul.f32 %v5317_v20, %v2026_v35  ;;  %v1867_v32 = vmul.f32 1.0614054, %v3425_v17  ;;  %3430 = vpow2.f32 %v2248_v42  ;;  %v1643_v45 = vmul.f32 0.5, %v5296_v60 }
 0x2d9   : > { %v5375_v47 = vmul.f32 0.70710677, %v5369_v23  ;;  %v2473_v50 = vmul.f32 %v2441_v10, %v1641_v31  ;;  %v2250_v56 = vmul.f32 1.442695, %v2188_v21  ;;  %vm2348_vm14 = vcmp.lt.f32.partialorder %v5337_v27, 0.0 }
 0x2da   : > { %v2090_v0 = vadd.f32 0.2548296, %v2058_v48  ;;  %v3127_v46 = vpop.f32.mrb[6].mxu1  ;;  %v1899_v57 = vadd.f32 -1.4531521, %v1867_v32  ;;  %v1644_v60 = vmul.f32 0.5, %v5325_v53 }
 0x2db   : > { %v1709_v37 = vand.u32 2147483647, %v5375_v47  ;;  %v2603_v54 = vadd.f32 %v3127_v46, %v5333_v51  ;;  %v2597_v25 = vpop.f32.mrb[7].mxu1  ;;  %3156 = vmatmul.mubr.f32.gmra.mrb[26].mxu1 %v2473_v50  ;;  %v3427_v2 = vpop.eup %3426  ;;  %vm2349_vm15 = vcmp.lt.f32.partialorder %v5375_v47, 0.0 }
 0x2dc   : > { %v2122_v18 = vmul.f32 %v5317_v20, %v2090_v0  ;;  %v2598_v3 = vadd.f32 %v5333_v51, %v2597_v25  ;;  %v1931_v59 = vmul.f32 %v3425_v17, %v1899_v57 }
 0x2dd   : > { %v1741_v19 = vmul.f32 0.3275911, %v1709_v37  ;;  %2733 = vst [vmem:[%s5347_s29 + $0x38] sm:$0xff] %v2603_v54  ;;  %v2157_v16 = vsub.f32 0.0, %v1709_v37 }
 0x2de   : > { %v2282_v11 = vmul.f32 %v3427_v2, %v2122_v18  ;;  %2732 = vst [vmem:[%s5347_s29 + $0x30] sm:$0xff] %v2598_v3  ;;  %v1963_v62 = vadd.f32 1.4214138, %v1931_v59 }
 0x2df   : > { %v1773_v6 = vadd.f32 1.0, %v1741_v19  ;;  %v2189_v12 = vmul.f32 %v2157_v16, %v1709_v37 }
 0x2e0   : > { %v2314_v22 = vsub.f32 1.0, %v2282_v11  ;;  %v3429_v44 = vpop.eup %3428  ;;  %v1995_v1 = vmul.f32 %v3425_v17, %v1963_v62 }
 0x2e1   : > { %3432 = vrcp.f32 %v1773_v6  ;;  %v1868_v20 = vmul.f32 1.0614054, %v3429_v44 }
 0x2e2   : > { %v2378_v14 = vsub.f32 0.0, %v2314_v22  ;;  %v2027_v8 = vadd.f32 -0.28449672, %v1995_v1  ;;  %3434 = vpow2.f32 %v2250_v56  ;;  %v3431_v49 = vpop.eup %3430 }
 0x2e3   : > { %v1900_v9 = vadd.f32 -1.4531521, %v1868_v20 }
 0x2e4   : > { %v2410_v38 = vsel %vm2346_vm12, %v2378_v14, %v2314_v22  ;;  %v2059_v24 = vmul.f32 %v3425_v17, %v2027_v8  ;;  %v1645_v14 = vmul.f32 0.5, %v5369_v23 }
 0x2e5   : > { %v2442_v29 = vadd.f32 1.0, %v2410_v38  ;;  %v1932_v39 = vmul.f32 %v3429_v44, %v1900_v9 }
 0x2e6   : > { %v2091_v41 = vadd.f32 0.2548296, %v2059_v24 }
 0x2e7   : > { %v2474_v34 = vmul.f32 %v2442_v29, %v1642_v61  ;;  %v1964_v26 = vadd.f32 1.4214138, %v1932_v39 }
 0x2e8   : > { %v2123_v28 = vmul.f32 %v3425_v17, %v2091_v41  ;;  %v2252_v17 = vmul.f32 1.442695, %v2189_v12 }
 0x2e9   : > { %3158 = vmatprep.mubr.f32.mxu1 %v2474_v34  ;;  %v1996_v30 = vmul.f32 %v3429_v44, %v1964_v26 }
 0x2ea   : > { %v2283_v52 = vmul.f32 %v3431_v49, %v2123_v28  ;;  %3436 = vpow2.f32 %v2252_v17 }
 0x2eb   : > { %v3433_v63 = vpop.eup %3432  ;;  %v2028_v36 = vadd.f32 -0.28449672, %v1996_v30 }
 0x2ec   : > { %v1869_v40 = vmul.f32 1.0614054, %v3433_v63  ;;  %v3130_v5 = vpop.f32.mrb[8].mxu1  ;;  %v2315_v33 = vsub.f32 1.0, %v2283_v52  ;;  %v3435_v46 = vpop.eup %3434 }
 0x2ed   : > { %v2613_v43 = vadd.f32 %v3130_v5, %v5333_v51  ;;  %v2607_v4 = vpop.f32.mrb[9].mxu1  ;;  %v2060_v58 = vmul.f32 %v3429_v44, %v2028_v36 }
 0x2ee   : > { %v1901_v15 = vadd.f32 -1.4531521, %v1869_v40  ;;  %v2608_v35 = vadd.f32 %v5333_v51, %v2607_v4  ;;  %v2379_v7 = vsub.f32 0.0, %v2315_v33 }
 0x2ef   : > { %2735 = vst [vmem:[%s5347_s29 + $0x48] sm:$0xff] %v2613_v43  ;;  %v2092_v31 = vadd.f32 0.2548296, %v2060_v58 }
 0x2f0   : > { %v1933_v10 = vmul.f32 %v3433_v63, %v1901_v15  ;;  %2734 = vst [vmem:[%s5347_s29 + $0x40] sm:$0xff] %v2608_v35  ;;  %v2411_v48 = vsel %vm2347_vm13, %v2379_v7, %v2315_v33 }
 0x2f1   : > { %v2443_v32 = vadd.f32 1.0, %v2411_v48  ;;  %v2124_v50 = vmul.f32 %v3429_v44, %v2092_v31 }
 0x2f2   : > { %v1965_v0 = vadd.f32 1.4214138, %v1933_v10 }
 0x2f3   : > { %v2475_v57 = vmul.f32 %v2443_v32, %v1643_v45  ;;  %v2284_v37 = vmul.f32 %v3435_v46, %v2124_v50 }
 0x2f4   : > { %v1997_v54 = vmul.f32 %v3433_v63, %v1965_v0  ;;  %v3437_v19 = vpop.eup %3436 }
 0x2f5   : > { %3159 = vmatmul.mubr.f32.gmra.mrb[28].mxu1 %v2475_v57  ;;  %v2316_v25 = vsub.f32 1.0, %v2284_v37 }
 0x2f6   : > { %v2029_v18 = vadd.f32 -0.28449672, %v1997_v54 }
 0x2f7   : > { %v2380_v42 = vsub.f32 0.0, %v2316_v25 }
 0x2f8   : > { %v2061_v3 = vmul.f32 %v3433_v63, %v2029_v18 }
 0x2f9   : > { %v2412_v13 = vsel %vm2348_vm14, %v2380_v42, %v2316_v25 }
 0x2fa   : > { %v2093_v2 = vadd.f32 0.2548296, %v2061_v3  ;;  %v2444_v59 = vadd.f32 1.0, %v2412_v13 }
 0x2fc   : > { %v2125_v55 = vmul.f32 %v3433_v63, %v2093_v2  ;;  %v2476_v11 = vmul.f32 %v2444_v59, %v1644_v60 }
 0x2fe   : > { %v2285_v62 = vmul.f32 %v3437_v19, %v2125_v55  ;;  %v3133_v6 = vpop.f32.mrb[10].mxu1  ;;  %3161 = vmatprep.mubr.f32.mxu1 %v2476_v11 }
 0x2ff   : > { %v2623_v22 = vadd.f32 %v3133_v6, %v5333_v51  ;;  %v2617_v44 = vpop.f32.mrb[11].mxu1 }
 0x300   : > { %v2317_v1 = vsub.f32 1.0, %v2285_v62  ;;  %v2618_v27 = vadd.f32 %v5333_v51, %v2617_v44 }
 0x301   : > { %2737 = vst [vmem:[%s5347_s29 + $0x58] sm:$0xff] %v2623_v22 }
 0x302   : > { %v2381_v21 = vsub.f32 0.0, %v2317_v1  ;;  %2736 = vst [vmem:[%s5347_s29 + $0x50] sm:$0xff] %v2618_v27 }
 0x304   : > { %v2413_v53 = vsel %vm2349_vm15, %v2381_v21, %v2317_v1 }
 0x305   : > { %v2445_v20 = vadd.f32 1.0, %v2413_v53 }
 0x307   : > { %v2477_v8 = vmul.f32 %v2445_v20, %v1645_v14 }
 0x309   : > { %3162 = vmatmul.mubr.f32.gmra.mrb[30].mxu1 %v2477_v8 }
 0x314   : > { %v3136_v38 = vpop.f32.mrb[12].mxu1 }
 0x315   : > { %v2633_v9 = vadd.f32 %v3136_v38, %v5333_v51  ;;  %v2627_v61 = vpop.f32.mrb[13].mxu1 }
 0x316   : > { %v2628_v29 = vadd.f32 %v5333_v51, %v2627_v61 }
 0x317   : > { %2739 = vst [vmem:[%s5347_s29 + $0x68] sm:$0xff] %v2633_v9 }
 0x318   : > { %2738 = vst [vmem:[%s5347_s29 + $0x60] sm:$0xff] %v2628_v29 }
 0x32e   : > { %v3139_v24 = vpop.f32.mrb[14].mxu1 }
 0x32f   : > { %v2643_v47 = vadd.f32 %v3139_v24, %v5333_v51  ;;  %v2637_v56 = vpop.f32.mrb[15].mxu1 }
 0x330   : > { %v2638_v23 = vadd.f32 %v5333_v51, %v2637_v56 }
 0x331   : > { %2741 = vst [vmem:[%s5347_s29 + $0x78] sm:$0xff] %v2643_v47 }
 0x332   : > { %2740 = vst [vmem:[%s5347_s29 + $0x70] sm:$0xff] %v2638_v23 }
 0x342   : > { %v3142_v39 = vpop.f32.mrb[16].mxu1 }
 0x343   : > { %v2653_v34 = vadd.f32 %v3142_v39, %v5333_v51  ;;  %v2647_v41 = vpop.f32.mrb[17].mxu1 }
 0x344   : > { %v2648_v16 = vadd.f32 %v5333_v51, %v2647_v41 }
 0x345   : > { %2743 = vst [vmem:[%s5347_s29 + $0x88] sm:$0xff] %v2653_v34 }
 0x346   : > { %2742 = vst [vmem:[%s5347_s29 + $0x80] sm:$0xff] %v2648_v16 }
 0x357   : > { %v3145_v26 = vpop.f32.mrb[18].mxu1 }
 0x358   : > { %v2663_v28 = vadd.f32 %v3145_v26, %v5333_v51  ;;  %v2657_v49 = vpop.f32.mrb[19].mxu1 }
 0x359   : > { %v2658_v30 = vadd.f32 %v5333_v51, %v2657_v49 }
 0x35a   : > { %2745 = vst [vmem:[%s5347_s29 + $0x98] sm:$0xff] %v2663_v28 }
 0x35b   : > { %2744 = vst [vmem:[%s5347_s29 + $0x90] sm:$0xff] %v2658_v30 }
 0x36e   : > { %v3148_v63 = vpop.f32.mrb[20].mxu1 }
 0x36f   : > { %v2673_v52 = vadd.f32 %v3148_v63, %v5333_v51  ;;  %v2667_v12 = vpop.f32.mrb[21].mxu1 }
 0x370   : > { %v2668_v36 = vadd.f32 %v5333_v51, %v2667_v12 }
 0x371   : > { %2747 = vst [vmem:[%s5347_s29 + $0xa8] sm:$0xff] %v2673_v52 }
 0x372   : > { %2746 = vst [vmem:[%s5347_s29 + $0xa0] sm:$0xff] %v2668_v36 }
 0x384   : > { %v3151_v40 = vpop.f32.mrb[22].mxu1 }
 0x385   : > { %v2683_v5 = vadd.f32 %v3151_v40, %v5333_v51  ;;  %v2677_v33 = vpop.f32.mrb[23].mxu1 }
 0x386   : > { %v2678_v43 = vadd.f32 %v5333_v51, %v2677_v33 }
 0x387   : > { %2749 = vst [vmem:[%s5347_s29 + $0xb8] sm:$0xff] %v2683_v5 }
 0x388   : > { %2748 = vst [vmem:[%s5347_s29 + $0xb0] sm:$0xff] %v2678_v43 }
 0x39c   : > { %v3154_v4 = vpop.f32.mrb[24].mxu1 }
 0x39d   : > { %v2693_v58 = vadd.f32 %v3154_v4, %v5333_v51  ;;  %v2687_v15 = vpop.f32.mrb[25].mxu1 }
 0x39e   : > { %v2688_v35 = vadd.f32 %v5333_v51, %v2687_v15 }
 0x39f   : > { %2751 = vst [vmem:[%s5347_s29 + $0xc8] sm:$0xff] %v2693_v58 }
 0x3a0   : > { %2750 = vst [vmem:[%s5347_s29 + $0xc0] sm:$0xff] %v2688_v35 }
 0x3ae   : > { %v3157_v7 = vpop.f32.mrb[26].mxu1 }
 0x3af   : > { %v2703_v17 = vadd.f32 %v3157_v7, %v5333_v51  ;;  %v2697_v31 = vpop.f32.mrb[27].mxu1 }
 0x3b0   : > { %v2698_v10 = vadd.f32 %v5333_v51, %v2697_v31 }
 0x3b1   : > { %2753 = vst [vmem:[%s5347_s29 + $0xd8] sm:$0xff] %v2703_v17 }
 0x3b2   : > { %2752 = vst [vmem:[%s5347_s29 + $0xd0] sm:$0xff] %v2698_v10 }
 0x3c8   : > { %v3160_v48 = vpop.f32.mrb[28].mxu1 }
 0x3c9   : > { %v2713_v45 = vadd.f32 %v3160_v48, %v5333_v51  ;;  %v2707_v32 = vpop.f32.mrb[29].mxu1 }
 0x3ca   : > { %v2708_v50 = vadd.f32 %v5333_v51, %v2707_v32 }
 0x3cb   : > { %2755 = vst [vmem:[%s5347_s29 + $0xe8] sm:$0xff] %v2713_v45 }
 0x3cc   : > { %2754 = vst [vmem:[%s5347_s29 + $0xe0] sm:$0xff] %v2708_v50 }
 0x3dc   : > { %v3163_v0 = vpop.f32.mrb[30].mxu1 }
 0x3dd   : > { %v2723_v46 = vadd.f32 %v3163_v0, %v5333_v51  ;;  %v2717_v57 = vpop.f32.mrb[31].mxu1 }
 0x3de   : > { %v2718_v37 = vadd.f32 %v5333_v51, %v2717_v57 }
 0x3df   : > { %2757 = vst [vmem:[%s5347_s29 + $0xf8] sm:$0xff] %v2723_v46 }
 0x3e0   : > { %2756 = vst [vmem:[%s5347_s29 + $0xf0] sm:$0xff] %v2718_v37 }
 0x3e1   : > { %3586 = shalt.err (!%p3583_p4)
}
 0x3e2   : > { %s3587_s12 = scalar_lea.hbm %s5441_s9, 4096  ;;  %s3591_s16 = scalar_lea.hbm %s5497_s7, 8192 }
 0x3e3   : > { %p3588_p9 = scmp.ne.s32.totalorder %s5441_s9, %s3587_s12  ;;  %p3592_p8 = scmp.lt.u32.totalorder %s5441_s9, %s5497_s7 }
 0x3e4   : > { %p3593_p13 = scmp.lt.u32.totalorder %s3591_s16, %s3587_s12  ;;  %p3595_p10 = scmp.lt.u32.totalorder %s3587_s12, %s5441_s9 }
 0x3e5   : > { %p3589_p0 = pnand %p3588_p9, %p3853_p5 }
 0x3e6   : > { %p3594_p6 = por %p3593_p13, %p3592_p8 }
 0x3e7   : > { %p3590_p11 = pneg %p3589_p0 }
 0x3e8   : > { %p3596_p3 = por %p3595_p10, %p3594_p6 }
 0x3ea   : > { %p3597_p7 = pnand %p3596_p3, %p3590_p11 }
 0x3ec   : > { %3600 = shalt.err (!%p3597_p7)
}
 0x3ed   : > { %s3657_s8 = smov 128   ;;  %s3658_s30 = smov 8  }
 0x3ee   : > { %3242 = dma.vmem_to_hbm [thread:$0]  (%p3853_p5), %s5443_s11, 4096, %s5441_s9, %s2759_s28, %s3657_s8, %s3657_s8, %s3658_s30  }
 0x3ef PF: > { %s5517_s13 = sld [smem:[#allocation16_spill]]  ;;  %s2787_s15 = sand.u32 1, %s3635_s24  }
 0x3f0   : > { %p5519_p1 = scmp.ge.s32.totalorder %s3647_s27, 2  ;;  %s2788_s10 = scalar_lea.sflag [#allocation5], %s2787_s15 }
 0x3f5   : > { %p5518_p12 = scmp.ne.s32.totalorder %s5517_s13, 0 }
 0x3f7   : > { %p3259_p2 = pnand %p5519_p1, %p5518_p12 }
 0x3f9   : > { %3630 = dma.done.wait (!%p3259_p2), %s2788_s10, 4096  }
 0x3fa   : > { %3632 = vsyncadd (!%p3259_p2), %s2788_s10, 4294963200  ;;  %p22_p4 = scmp.ge.s32.totalorder %s3839_s22, 4   ;;  %s5520_s24 = smov %s3639_s25 }
 0x3fb   : > { %s5521_s25 = smov %s3643_s26  ;;  %s5522_s26 = smov %s3849_s18 }
 0x3fc   : > { %s5523_s27 = smov %s3839_s22  ;;  %24 = sbr.rel (!%p22_p4) target bundleno = 7 (0x7), region = 108 }
 0x403   :  { %2793 = vsyncpa [#allocation4], 1 }
 0x404   :  { %2795 = vsyncpa [#allocation4 + $0x1], 1 }
 0x405   :  { %2796 = vsyncpa [#allocation7], 1 }
 0x406   :  { %2797 = vsyncpa [#allocation10], 1 }
 0x407   :  { %2798 = vsyncpa [#allocation5], 1 }
 0x408   :  { %2800 = vsyncpa [#allocation5 + $0x1], 1 }

</bundles_post_ra>
